<compile_context>
chip_gen: v6e
topology: v6e:2x2x1
jax: 0.10.0
libtpu: 0.0.40
codegen_flags: <defaults>
</compile_context>

<pallas_src>
import jax
import jax.numpy as jnp
from jax.experimental import pallas as pl
from jax.experimental.pallas import tpu as pltpu

K1 = 64   # block_1 temporal kernel width
K3 = 16   # block_3 depthwise temporal kernel width
F1 = 8    # block_1 output channels
F2 = 16   # block_2 / block_3 output channels

_HI = jax.lax.Precision.HIGHEST


def _elu(x):
    # min() keeps the discarded branch finite (no inf from exp of large x).
    return jnp.where(x > 0.0, x, jnp.exp(jnp.minimum(x, 0.0)) - 1.0)


def patch_embed_kernel(x_ref, prm_ref, pool_ref, out_ref):
    BBLK, C8, Tp = x_ref.shape          # channel dim already padded to mult. of 8
    T = Tp - (K1 - 1)
    T4 = T // 4
    F2_ = prm_ref.shape[0]
    base = C8 * K1                      # columns of the fused conv weight

    x = x_ref[...]                      # (BBLK, C8, Tp)   time on lanes
    prm = prm_ref[...]                  # (16, K1*C8 + 2 + 16) packed params
    pool = pool_ref[...]                # (T, T4) grid-invariant 0.25 matrix

    # ---- im2col along time: (BBLK, K1*C8, T), T stays on lanes --------------
    # K1 lane-shifted slices concatenated on the sublane axis (C8 % 8 == 0, so
    # every concat offset is tile-aligned).  Row index n = k*C8 + c.
    xcol = jnp.concatenate([x[:, :, k:k + T] for k in range(K1)], axis=1)

    # ---- fused block_1 + block_2 conv (BN1 & BN2 folded): MXU matmuls -------
    Wf2 = prm[:, :base]                                        # (16, K1*C8)
    outs = [jnp.dot(Wf2, xcol[b], precision=_HI,
                    preferred_element_type=jnp.float32)        # (16, T) each
            for b in range(BBLK)]                              # BBLK <= 8
    out2 = jnp.stack(outs, axis=0)                             # (BBLK, 16, T)
    y2 = out2 + prm[:, base:base + 1][None, :, :]              # fused bias
    e2 = _elu(y2)

    # ---- AvgPool2d((1, 4)) as one MXU matmul (M = BBLK*16 rows) -------------
    p2 = jnp.dot(e2.reshape(BBLK * F2_, T), pool, precision=_HI,
                 preferred_element_type=jnp.float32).reshape(BBLK, F2_, T4)
    # dropout(0.25): identity (inference)

    # ---- block_3: ZeroPad2d((7, 8)) + depthwise Conv2d(16->16, (1, 16)) -----
    x3 = jnp.concatenate(
        [jnp.zeros((BBLK, F2_, 7), jnp.float32), p2,
         jnp.zeros((BBLK, F2_, 8), jnp.float32)], axis=-1)     # (BBLK, 16, T4+15)
    w3 = prm[:, base + 2:base + 2 + K3]                        # (16, 16), hoisted
    acc3 = jnp.zeros((BBLK, F2_, T4), jnp.float32)
    for k in range(K3):                 # 16 genuinely-distinct taps; cheap VPU fma
        acc3 = acc3 + w3[:, k:k + 1][None, :, :] * x3[:, :, k:k + T4]
    e3 = _elu(acc3 + prm[:, base + 1:base + 2][None, :, :])    # + BN3 bias, ELU
    # dropout(0.25): identity (inference)

    # ---- lane-dense store: flatten (16, T4) onto lanes via concat -----------
    out_ref[...] = jnp.concatenate(
        [e3[:, e:e + 1, :] for e in range(F2_)], axis=-1)      # (BBLK, 1, 16*T4)


def patch_embedding_forward(x, params, block_b=8):
    """x: (B, 1, C, T) float32 (NCHW, matching the PyTorch module)."""
    (w1, s1, b1, w2, s2, b2, w3, s3, b3) = params
    B, _, C, T = x.shape
    assert T % 4 == 0
    T4 = T // 4
    Tp = T + K1 - 1
    C8 = ((C + 7) // 8) * 8            # sublane-aligned channel count

    # ---- fold BatchNorms into the conv weights (inference mode) -------------
    s1f, b1f = s1[:, 0], b1[:, 0]
    s2f, b2f = s2[:, 0], b2[:, 0]
    s3f, b3f = s3[:, 0], b3[:, 0]
    w1r = jnp.repeat(w1, 2, axis=0)          # (16, 64): output ch e uses input ch e//2
    s1r = jnp.repeat(s1f, 2)
    b1r = jnp.repeat(b1f, 2)
    # Wf[e, c, k] = s2[e] * s1[e//2] * w2[e, c] * w1[e//2, k]
    Wf = (s2f * s1r)[:, None, None] * w2[:, :, None] * w1r[:, None, :]   # (16, C, 64)
    bf = s2f * b1r * jnp.sum(w2, axis=1) + b2f                           # (16,)
    w3f = s3f[:, None] * w3                                              # (16, 16)

    # Flatten the fused weight k-major / c-minor to match the kernel's im2col
    # row order (n = k*C8 + c), with zero weights on the padded channels.
    Wf_kc = jnp.pad(Wf, ((0, 0), (0, C8 - C), (0, 0)))
    Wf_kc = jnp.transpose(Wf_kc, (0, 2, 1)).reshape(F2, K1 * C8)

    # Pack everything into one lane-dense parameter array: one resident block.
    prm = jnp.concatenate([Wf_kc, bf[:, None], b3f[:, None], w3f], axis=1)
    n_prm = K1 * C8 + 2 + K3

    # Grid-invariant avg-pool matrix, built once here (resident in VMEM).
    t_idx = jnp.arange(T)[:, None]
    u_idx = jnp.arange(T4)[None, :]
    d = t_idx - 4 * u_idx
    pool = jnp.where((d >= 0) & (d < 4), 0.25, 0.0).astype(jnp.float32)  # (T, T4)

    # block_1 zero-padding (31, 32) along time; pad channels to C8; drop the
    # singleton in-channel dim.
    xpad = jnp.pad(x[:, 0], ((0, 0), (0, C8 - C), (31, 32)))  # (B, C8, T+63)

    # Keep grid >= 2 whenever B >= 2 so both v7x TensorCores get work.
    BBLK = max(1, min(block_b, B // 2)) if B >= 2 else 1
    Bp = ((B + BBLK - 1) // BBLK) * BBLK
    if Bp != B:
        xpad = jnp.pad(xpad, ((0, Bp - B), (0, 0), (0, 0)))

    # Explicit VMEM budget from the actual per-step footprint (+ headroom);
    # clamped to stay inside v7x's 64 MiB physical VMEM.
    f32 = 4
    step_bytes = (2 * BBLK * C8 * Tp           # double-buffered input blocks
                  + 2 * F2 * n_prm             # resident packed params
                  + 2 * T * T4                 # resident pool matrix
                  + 2 * BBLK * F2 * T4         # double-buffered output blocks
                  + BBLK * C8 * K1 * T         # im2col tile
                  + 4 * BBLK * F2 * T) * f32   # out2 / e2 / x3 / acc3 live values
    vmem_limit = int(min(max(4 * step_bytes, 16 * 1024 * 1024), 48 * 1024 * 1024))

    grid_spec = pltpu.PrefetchScalarGridSpec(
        num_scalar_prefetch=0,
        grid=(Bp // BBLK,),
        in_specs=[
            pl.BlockSpec((BBLK, C8, Tp), lambda g: (g, 0, 0)),   # batch block
            pl.BlockSpec((F2, n_prm), lambda g: (0, 0)),         # packed params
            pl.BlockSpec((T, T4), lambda g: (0, 0)),             # pool matrix
        ],
        out_specs=pl.BlockSpec((BBLK, 1, F2 * T4), lambda g: (g, 0, 0)),
    )

    out = pl.pallas_call(
        patch_embed_kernel,
        out_shape=jax.ShapeDtypeStruct((Bp, 1, F2 * T4), jnp.float32),
        grid_spec=grid_spec,
        compiler_params=pltpu.CompilerParams(
            dimension_semantics=("parallel",),    # batch axis shards across TCs
            vmem_limit_bytes=vmem_limit),
    )(xpad, prm, pool)

    # Rearrange 'b e (h) (w) -> b (h w) e' (h == 1): flat (e*T4 + t4) layout ->
    # (B, T4, 16).  Cheap wrapper-side reshape + transpose.
    return jnp.transpose(out[:B, 0].reshape(B, F2, T4), (0, 2, 1))


def make_params(key, C):
    """Deterministic synthetic parameters matching the PyTorch module shapes."""
    ks = jax.random.split(key, 9)
    eps = 1e-5
    # conv weights (bias=False everywhere)
    w1 = 0.1 * jax.random.normal(ks[0], (F1, 1, 1, K1), jnp.float32)    # Conv2d(1,8,(1,64))
    w2 = 0.1 * jax.random.normal(ks[1], (F2, 1, C, 1), jnp.float32)     # Conv2d(8,16,(C,1),groups=8)
    w3 = 0.1 * jax.random.normal(ks[2], (F2, 1, 1, K3), jnp.float32)    # Conv2d(16,16,(1,16),groups=16)
    # BatchNorm affine params; fresh-module running stats (mean=0, var=1).
    # General folding would use scale = gamma/sqrt(var+eps), bias = beta - mean*scale.
    def bn(kg, kb, n):
        gamma = 1.0 + 0.1 * jax.random.normal(kg, (n,), jnp.float32)
        beta = 0.1 * jax.random.normal(kb, (n,), jnp.float32)
        scale = gamma / jnp.sqrt(1.0 + eps)
        bias = beta
        return scale.reshape(n, 1), bias.reshape(n, 1)
    s1, b1 = bn(ks[3], ks[4], F1)
    s2, b2 = bn(ks[5], ks[6], F2)
    s3, b3 = bn(ks[7], ks[8], F2)
    return (w1.reshape(F1, K1), s1, b1,
            w2.reshape(F2, C), s2, b2,
            w3.reshape(F2, K3), s3, b3)


def reference_forward(x, params):
    """Pure-JAX reference of the same (inference-mode) forward pass."""
    (w1, s1, b1, w2, s2, b2, w3, s3, b3) = params
    B, _, C, T = x.shape
    T4 = T // 4
    hi = jax.lax.Precision.HIGHEST
    xpad = jnp.pad(x[:, 0], ((0, 0), (0, 0), (31, 32)))                      # (B,C,T+63)
    win1 = jnp.stack([xpad[..., k:k + T] for k in range(K1)], axis=-1)       # (B,C,T,64)
    out1 = jnp.einsum('bctk,ok->boct', win1, w1, precision=hi)
    y1 = out1 * s1.reshape(1, F1, 1, 1) + b1.reshape(1, F1, 1, 1)
    x1r = jnp.repeat(y1, 2, axis=1)                                          # (B,16,C,T)
    out2 = jnp.einsum('bect,ec->bet', x1r, w2, precision=hi)
    y2 = out2 * s2.reshape(1, F2, 1) + b2.reshape(1, F2, 1)
    e2 = jnp.where(y2 > 0, y2, jnp.exp(jnp.minimum(y2, 0.0)) - 1.0)
    p2 = e2.reshape(B, F2, T4, 4).mean(-1)
    x3 = jnp.pad(p2, ((0, 0), (0, 0), (7, 8)))
    win3 = jnp.stack([x3[..., k:k + T4] for k in range(K3)], axis=-1)        # (B,16,T4,16)
    out3 = jnp.einsum('betk,ek->bet', win3, w3, precision=hi)
    y3 = out3 * s3.reshape(1, F2, 1) + b3.reshape(1, F2, 1)
    e3 = jnp.where(y3 > 0, y3, jnp.exp(jnp.minimum(y3, 0.0)) - 1.0)
    return jnp.transpose(e3, (0, 2, 1))                                      # (B, T4, 16)


if __name__ == "__main__":
    key = jax.random.PRNGKey(0)
    kx, kp = jax.random.split(key)

    B, C, T = 2, 4, 64                      # batch, EEG channels, time samples
    x = jax.random.normal(kx, (B, 1, C, T), jnp.float32)
    params = make_params(kp, C)

    out = patch_embedding_forward(x, params)
    out = jax.block_until_ready(out)

    ref = reference_forward(x, params)
    assert out.shape == (B, T // 4, 16), out.shape
    # Slight tolerance slack vs. the unfused reference: BN weights are pre-folded
    # into the conv weights, so accumulation/association order differs.
    assert jnp.allclose(out, ref, rtol=1e-3, atol=2e-4), \
        float(jnp.max(jnp.abs(out - ref)))

    print("KERNEL_OK")
</pallas_src>

<mosaic_0001>
module attributes {stable_mosaic.version = 11 : i64} {
  func.func @patch_embed_kernel(%arg0: i32, %arg1: memref<1x8x127xf32, #tpu.memory_space<vmem>>, %arg2: memref<16x530xf32, #tpu.memory_space<vmem>>, %arg3: memref<64x16xf32, #tpu.memory_space<vmem>>, %arg4: memref<1x1x256xf32, #tpu.memory_space<vmem>>) attributes {dimension_semantics = [#tpu.dimension_semantics<parallel>], iteration_bounds = array<i64: 2>, scalar_prefetch = 0 : i64, scratch_operands = 0 : i64, tpu.core_type = #tpu.core_type<tc>, window_params = [{transform_indices = @transform_0, window_bounds = array<i64: 1, 8, 127>}, {pipeline_mode = #tpu.pipeline_mode<synchronous>, transform_indices = @transform_1, window_bounds = array<i64: 16, 530>}, {pipeline_mode = #tpu.pipeline_mode<synchronous>, transform_indices = @transform_2, window_bounds = array<i64: 64, 16>}, {transform_indices = @transform_3, window_bounds = array<i64: 1, 1, 256>}]} {
    %c0 = arith.constant 0 : index
    %c0_0 = arith.constant 0 : index
    %c0_1 = arith.constant 0 : index
    %0 = vector.load %arg1[%c0, %c0_0, %c0_1] : memref<1x8x127xf32, #tpu.memory_space<vmem>>, vector<1x8x127xf32>
    %c0_2 = arith.constant 0 : index
    %c0_3 = arith.constant 0 : index
    %1 = vector.load %arg2[%c0_2, %c0_3] : memref<16x530xf32, #tpu.memory_space<vmem>>, vector<16x530xf32>
    %c0_4 = arith.constant 0 : index
    %c0_5 = arith.constant 0 : index
    %2 = vector.load %arg3[%c0_4, %c0_5] : memref<64x16xf32, #tpu.memory_space<vmem>>, vector<64x16xf32>
    %3 = vector.extract_strided_slice %0 {offsets = [0, 0, 0], sizes = [1, 8, 64], strides = [1, 1, 1]} : vector<1x8x127xf32> to vector<1x8x64xf32>
    %4 = vector.extract_strided_slice %0 {offsets = [0, 0, 1], sizes = [1, 8, 64], strides = [1, 1, 1]} : vector<1x8x127xf32> to vector<1x8x64xf32>
    %5 = vector.extract_strided_slice %0 {offsets = [0, 0, 2], sizes = [1, 8, 64], strides = [1, 1, 1]} : vector<1x8x127xf32> to vector<1x8x64xf32>
    %6 = vector.extract_strided_slice %0 {offsets = [0, 0, 3], sizes = [1, 8, 64], strides = [1, 1, 1]} : vector<1x8x127xf32> to vector<1x8x64xf32>
    %7 = vector.extract_strided_slice %0 {offsets = [0, 0, 4], sizes = [1, 8, 64], strides = [1, 1, 1]} : vector<1x8x127xf32> to vector<1x8x64xf32>
    %8 = vector.extract_strided_slice %0 {offsets = [0, 0, 5], sizes = [1, 8, 64], strides = [1, 1, 1]} : vector<1x8x127xf32> to vector<1x8x64xf32>
    %9 = vector.extract_strided_slice %0 {offsets = [0, 0, 6], sizes = [1, 8, 64], strides = [1, 1, 1]} : vector<1x8x127xf32> to vector<1x8x64xf32>
    %10 = vector.extract_strided_slice %0 {offsets = [0, 0, 7], sizes = [1, 8, 64], strides = [1, 1, 1]} : vector<1x8x127xf32> to vector<1x8x64xf32>
    %11 = vector.extract_strided_slice %0 {offsets = [0, 0, 8], sizes = [1, 8, 64], strides = [1, 1, 1]} : vector<1x8x127xf32> to vector<1x8x64xf32>
    %12 = vector.extract_strided_slice %0 {offsets = [0, 0, 9], sizes = [1, 8, 64], strides = [1, 1, 1]} : vector<1x8x127xf32> to vector<1x8x64xf32>
    %13 = vector.extract_strided_slice %0 {offsets = [0, 0, 10], sizes = [1, 8, 64], strides = [1, 1, 1]} : vector<1x8x127xf32> to vector<1x8x64xf32>
    %14 = vector.extract_strided_slice %0 {offsets = [0, 0, 11], sizes = [1, 8, 64], strides = [1, 1, 1]} : vector<1x8x127xf32> to vector<1x8x64xf32>
    %15 = vector.extract_strided_slice %0 {offsets = [0, 0, 12], sizes = [1, 8, 64], strides = [1, 1, 1]} : vector<1x8x127xf32> to vector<1x8x64xf32>
    %16 = vector.extract_strided_slice %0 {offsets = [0, 0, 13], sizes = [1, 8, 64], strides = [1, 1, 1]} : vector<1x8x127xf32> to vector<1x8x64xf32>
    %17 = vector.extract_strided_slice %0 {offsets = [0, 0, 14], sizes = [1, 8, 64], strides = [1, 1, 1]} : vector<1x8x127xf32> to vector<1x8x64xf32>
    %18 = vector.extract_strided_slice %0 {offsets = [0, 0, 15], sizes = [1, 8, 64], strides = [1, 1, 1]} : vector<1x8x127xf32> to vector<1x8x64xf32>
    %19 = vector.extract_strided_slice %0 {offsets = [0, 0, 16], sizes = [1, 8, 64], strides = [1, 1, 1]} : vector<1x8x127xf32> to vector<1x8x64xf32>
    %20 = vector.extract_strided_slice %0 {offsets = [0, 0, 17], sizes = [1, 8, 64], strides = [1, 1, 1]} : vector<1x8x127xf32> to vector<1x8x64xf32>
    %21 = vector.extract_strided_slice %0 {offsets = [0, 0, 18], sizes = [1, 8, 64], strides = [1, 1, 1]} : vector<1x8x127xf32> to vector<1x8x64xf32>
    %22 = vector.extract_strided_slice %0 {offsets = [0, 0, 19], sizes = [1, 8, 64], strides = [1, 1, 1]} : vector<1x8x127xf32> to vector<1x8x64xf32>
    %23 = vector.extract_strided_slice %0 {offsets = [0, 0, 20], sizes = [1, 8, 64], strides = [1, 1, 1]} : vector<1x8x127xf32> to vector<1x8x64xf32>
    %24 = vector.extract_strided_slice %0 {offsets = [0, 0, 21], sizes = [1, 8, 64], strides = [1, 1, 1]} : vector<1x8x127xf32> to vector<1x8x64xf32>
    %25 = vector.extract_strided_slice %0 {offsets = [0, 0, 22], sizes = [1, 8, 64], strides = [1, 1, 1]} : vector<1x8x127xf32> to vector<1x8x64xf32>
    %26 = vector.extract_strided_slice %0 {offsets = [0, 0, 23], sizes = [1, 8, 64], strides = [1, 1, 1]} : vector<1x8x127xf32> to vector<1x8x64xf32>
    %27 = vector.extract_strided_slice %0 {offsets = [0, 0, 24], sizes = [1, 8, 64], strides = [1, 1, 1]} : vector<1x8x127xf32> to vector<1x8x64xf32>
    %28 = vector.extract_strided_slice %0 {offsets = [0, 0, 25], sizes = [1, 8, 64], strides = [1, 1, 1]} : vector<1x8x127xf32> to vector<1x8x64xf32>
    %29 = vector.extract_strided_slice %0 {offsets = [0, 0, 26], sizes = [1, 8, 64], strides = [1, 1, 1]} : vector<1x8x127xf32> to vector<1x8x64xf32>
    %30 = vector.extract_strided_slice %0 {offsets = [0, 0, 27], sizes = [1, 8, 64], strides = [1, 1, 1]} : vector<1x8x127xf32> to vector<1x8x64xf32>
    %31 = vector.extract_strided_slice %0 {offsets = [0, 0, 28], sizes = [1, 8, 64], strides = [1, 1, 1]} : vector<1x8x127xf32> to vector<1x8x64xf32>
    %32 = vector.extract_strided_slice %0 {offsets = [0, 0, 29], sizes = [1, 8, 64], strides = [1, 1, 1]} : vector<1x8x127xf32> to vector<1x8x64xf32>
    %33 = vector.extract_strided_slice %0 {offsets = [0, 0, 30], sizes = [1, 8, 64], strides = [1, 1, 1]} : vector<1x8x127xf32> to vector<1x8x64xf32>
    %34 = vector.extract_strided_slice %0 {offsets = [0, 0, 31], sizes = [1, 8, 64], strides = [1, 1, 1]} : vector<1x8x127xf32> to vector<1x8x64xf32>
    %35 = vector.extract_strided_slice %0 {offsets = [0, 0, 32], sizes = [1, 8, 64], strides = [1, 1, 1]} : vector<1x8x127xf32> to vector<1x8x64xf32>
    %36 = vector.extract_strided_slice %0 {offsets = [0, 0, 33], sizes = [1, 8, 64], strides = [1, 1, 1]} : vector<1x8x127xf32> to vector<1x8x64xf32>
    %37 = vector.extract_strided_slice %0 {offsets = [0, 0, 34], sizes = [1, 8, 64], strides = [1, 1, 1]} : vector<1x8x127xf32> to vector<1x8x64xf32>
    %38 = vector.extract_strided_slice %0 {offsets = [0, 0, 35], sizes = [1, 8, 64], strides = [1, 1, 1]} : vector<1x8x127xf32> to vector<1x8x64xf32>
    %39 = vector.extract_strided_slice %0 {offsets = [0, 0, 36], sizes = [1, 8, 64], strides = [1, 1, 1]} : vector<1x8x127xf32> to vector<1x8x64xf32>
    %40 = vector.extract_strided_slice %0 {offsets = [0, 0, 37], sizes = [1, 8, 64], strides = [1, 1, 1]} : vector<1x8x127xf32> to vector<1x8x64xf32>
    %41 = vector.extract_strided_slice %0 {offsets = [0, 0, 38], sizes = [1, 8, 64], strides = [1, 1, 1]} : vector<1x8x127xf32> to vector<1x8x64xf32>
    %42 = vector.extract_strided_slice %0 {offsets = [0, 0, 39], sizes = [1, 8, 64], strides = [1, 1, 1]} : vector<1x8x127xf32> to vector<1x8x64xf32>
    %43 = vector.extract_strided_slice %0 {offsets = [0, 0, 40], sizes = [1, 8, 64], strides = [1, 1, 1]} : vector<1x8x127xf32> to vector<1x8x64xf32>
    %44 = vector.extract_strided_slice %0 {offsets = [0, 0, 41], sizes = [1, 8, 64], strides = [1, 1, 1]} : vector<1x8x127xf32> to vector<1x8x64xf32>
    %45 = vector.extract_strided_slice %0 {offsets = [0, 0, 42], sizes = [1, 8, 64], strides = [1, 1, 1]} : vector<1x8x127xf32> to vector<1x8x64xf32>
    %46 = vector.extract_strided_slice %0 {offsets = [0, 0, 43], sizes = [1, 8, 64], strides = [1, 1, 1]} : vector<1x8x127xf32> to vector<1x8x64xf32>
    %47 = vector.extract_strided_slice %0 {offsets = [0, 0, 44], sizes = [1, 8, 64], strides = [1, 1, 1]} : vector<1x8x127xf32> to vector<1x8x64xf32>
    %48 = vector.extract_strided_slice %0 {offsets = [0, 0, 45], sizes = [1, 8, 64], strides = [1, 1, 1]} : vector<1x8x127xf32> to vector<1x8x64xf32>
    %49 = vector.extract_strided_slice %0 {offsets = [0, 0, 46], sizes = [1, 8, 64], strides = [1, 1, 1]} : vector<1x8x127xf32> to vector<1x8x64xf32>
    %50 = vector.extract_strided_slice %0 {offsets = [0, 0, 47], sizes = [1, 8, 64], strides = [1, 1, 1]} : vector<1x8x127xf32> to vector<1x8x64xf32>
    %51 = vector.extract_strided_slice %0 {offsets = [0, 0, 48], sizes = [1, 8, 64], strides = [1, 1, 1]} : vector<1x8x127xf32> to vector<1x8x64xf32>
    %52 = vector.extract_strided_slice %0 {offsets = [0, 0, 49], sizes = [1, 8, 64], strides = [1, 1, 1]} : vector<1x8x127xf32> to vector<1x8x64xf32>
    %53 = vector.extract_strided_slice %0 {offsets = [0, 0, 50], sizes = [1, 8, 64], strides = [1, 1, 1]} : vector<1x8x127xf32> to vector<1x8x64xf32>
    %54 = vector.extract_strided_slice %0 {offsets = [0, 0, 51], sizes = [1, 8, 64], strides = [1, 1, 1]} : vector<1x8x127xf32> to vector<1x8x64xf32>
    %55 = vector.extract_strided_slice %0 {offsets = [0, 0, 52], sizes = [1, 8, 64], strides = [1, 1, 1]} : vector<1x8x127xf32> to vector<1x8x64xf32>
    %56 = vector.extract_strided_slice %0 {offsets = [0, 0, 53], sizes = [1, 8, 64], strides = [1, 1, 1]} : vector<1x8x127xf32> to vector<1x8x64xf32>
    %57 = vector.extract_strided_slice %0 {offsets = [0, 0, 54], sizes = [1, 8, 64], strides = [1, 1, 1]} : vector<1x8x127xf32> to vector<1x8x64xf32>
    %58 = vector.extract_strided_slice %0 {offsets = [0, 0, 55], sizes = [1, 8, 64], strides = [1, 1, 1]} : vector<1x8x127xf32> to vector<1x8x64xf32>
    %59 = vector.extract_strided_slice %0 {offsets = [0, 0, 56], sizes = [1, 8, 64], strides = [1, 1, 1]} : vector<1x8x127xf32> to vector<1x8x64xf32>
    %60 = vector.extract_strided_slice %0 {offsets = [0, 0, 57], sizes = [1, 8, 64], strides = [1, 1, 1]} : vector<1x8x127xf32> to vector<1x8x64xf32>
    %61 = vector.extract_strided_slice %0 {offsets = [0, 0, 58], sizes = [1, 8, 64], strides = [1, 1, 1]} : vector<1x8x127xf32> to vector<1x8x64xf32>
    %62 = vector.extract_strided_slice %0 {offsets = [0, 0, 59], sizes = [1, 8, 64], strides = [1, 1, 1]} : vector<1x8x127xf32> to vector<1x8x64xf32>
    %63 = vector.extract_strided_slice %0 {offsets = [0, 0, 60], sizes = [1, 8, 64], strides = [1, 1, 1]} : vector<1x8x127xf32> to vector<1x8x64xf32>
    %64 = vector.extract_strided_slice %0 {offsets = [0, 0, 61], sizes = [1, 8, 64], strides = [1, 1, 1]} : vector<1x8x127xf32> to vector<1x8x64xf32>
    %65 = vector.extract_strided_slice %0 {offsets = [0, 0, 62], sizes = [1, 8, 64], strides = [1, 1, 1]} : vector<1x8x127xf32> to vector<1x8x64xf32>
    %66 = vector.extract_strided_slice %0 {offsets = [0, 0, 63], sizes = [1, 8, 64], strides = [1, 1, 1]} : vector<1x8x127xf32> to vector<1x8x64xf32>
    %67 = tpu.concatenate %3, %4, %5, %6, %7, %8, %9, %10, %11, %12, %13, %14, %15, %16, %17, %18 in 1 : vector<1x8x64xf32>, vector<1x8x64xf32>, vector<1x8x64xf32>, vector<1x8x64xf32>, vector<1x8x64xf32>, vector<1x8x64xf32>, vector<1x8x64xf32>, vector<1x8x64xf32>, vector<1x8x64xf32>, vector<1x8x64xf32>, vector<1x8x64xf32>, vector<1x8x64xf32>, vector<1x8x64xf32>, vector<1x8x64xf32>, vector<1x8x64xf32>, vector<1x8x64xf32> -> vector<1x128x64xf32>
    %68 = tpu.concatenate %19, %20, %21, %22, %23, %24, %25, %26, %27, %28, %29, %30, %31, %32, %33, %34 in 1 : vector<1x8x64xf32>, vector<1x8x64xf32>, vector<1x8x64xf32>, vector<1x8x64xf32>, vector<1x8x64xf32>, vector<1x8x64xf32>, vector<1x8x64xf32>, vector<1x8x64xf32>, vector<1x8x64xf32>, vector<1x8x64xf32>, vector<1x8x64xf32>, vector<1x8x64xf32>, vector<1x8x64xf32>, vector<1x8x64xf32>, vector<1x8x64xf32>, vector<1x8x64xf32> -> vector<1x128x64xf32>
    %69 = tpu.concatenate %35, %36, %37, %38, %39, %40, %41, %42, %43, %44, %45, %46, %47, %48, %49, %50 in 1 : vector<1x8x64xf32>, vector<1x8x64xf32>, vector<1x8x64xf32>, vector<1x8x64xf32>, vector<1x8x64xf32>, vector<1x8x64xf32>, vector<1x8x64xf32>, vector<1x8x64xf32>, vector<1x8x64xf32>, vector<1x8x64xf32>, vector<1x8x64xf32>, vector<1x8x64xf32>, vector<1x8x64xf32>, vector<1x8x64xf32>, vector<1x8x64xf32>, vector<1x8x64xf32> -> vector<1x128x64xf32>
    %70 = tpu.concatenate %51, %52, %53, %54, %55, %56, %57, %58, %59, %60, %61, %62, %63, %64, %65, %66 in 1 : vector<1x8x64xf32>, vector<1x8x64xf32>, vector<1x8x64xf32>, vector<1x8x64xf32>, vector<1x8x64xf32>, vector<1x8x64xf32>, vector<1x8x64xf32>, vector<1x8x64xf32>, vector<1x8x64xf32>, vector<1x8x64xf32>, vector<1x8x64xf32>, vector<1x8x64xf32>, vector<1x8x64xf32>, vector<1x8x64xf32>, vector<1x8x64xf32>, vector<1x8x64xf32> -> vector<1x128x64xf32>
    %71 = tpu.concatenate %67, %68, %69, %70 in 1 : vector<1x128x64xf32>, vector<1x128x64xf32>, vector<1x128x64xf32>, vector<1x128x64xf32> -> vector<1x512x64xf32>
    %72 = vector.extract_strided_slice %1 {offsets = [0, 0], sizes = [16, 512], strides = [1, 1]} : vector<16x530xf32> to vector<16x512xf32>
    %73 = vector.shape_cast %71 : vector<1x512x64xf32> to vector<512x64xf32>
    %cst = arith.constant dense<0.000000e+00> : vector<16x64xf32>
    %74 = tpu.matmul %72, %73, %cst {dimension_numbers = #tpu.dot_dimension_numbers<[1], [0], [0], [1], [0, 0, 1, 1], [], []>, precision = #tpu.contract_precision<fp32>} : vector<16x512xf32>, vector<512x64xf32>, vector<16x64xf32> -> vector<16x64xf32>
    %75 = vector.shape_cast %74 : vector<16x64xf32> to vector<1x16x64xf32>
    %76 = vector.extract_strided_slice %1 {offsets = [0, 512], sizes = [16, 1], strides = [1, 1]} : vector<16x530xf32> to vector<16x1xf32>
    %77 = vector.shape_cast %76 : vector<16x1xf32> to vector<1x16x1xf32>
    %78 = vector.broadcast %77 : vector<1x16x1xf32> to vector<1x16x64xf32>
    %79 = arith.addf %75, %78 : vector<1x16x64xf32>
    %cst_6 = arith.constant 0.000000e+00 : f32
    %80 = vector.broadcast %cst_6 : f32 to vector<1x16x64xf32>
    %81 = arith.cmpf ogt, %79, %80 : vector<1x16x64xf32>
    %cst_7 = arith.constant 0.000000e+00 : f32
    %82 = vector.broadcast %cst_7 : f32 to vector<1x16x64xf32>
    %83 = arith.minimumf %79, %82 : vector<1x16x64xf32>
    %84 = math.exp %83 : vector<1x16x64xf32>
    %cst_8 = arith.constant 1.000000e+00 : f32
    %85 = vector.broadcast %cst_8 : f32 to vector<1x16x64xf32>
    %86 = arith.subf %84, %85 : vector<1x16x64xf32>
    %87 = arith.select %81, %79, %86 : vector<1x16x64xi1>, vector<1x16x64xf32>
    %88 = vector.shape_cast %87 : vector<1x16x64xf32> to vector<16x64xf32>
    %cst_9 = arith.constant dense<0.000000e+00> : vector<16x16xf32>
    %89 = tpu.matmul %88, %2, %cst_9 {dimension_numbers = #tpu.dot_dimension_numbers<[1], [0], [0], [1], [0, 0, 1, 1], [], []>, precision = #tpu.contract_precision<fp32>} : vector<16x64xf32>, vector<64x16xf32>, vector<16x16xf32> -> vector<16x16xf32>
    %90 = vector.shape_cast %89 : vector<16x16xf32> to vector<1x16x16xf32>
    %cst_10 = arith.constant 0.000000e+00 : f32
    %91 = vector.broadcast %cst_10 : f32 to vector<1x16x7xf32>
    %cst_11 = arith.constant 0.000000e+00 : f32
    %92 = vector.broadcast %cst_11 : f32 to vector<1x16x8xf32>
    %93 = tpu.concatenate %91, %90, %92 in 2 : vector<1x16x7xf32>, vector<1x16x16xf32>, vector<1x16x8xf32> -> vector<1x16x31xf32>
    %94 = vector.extract_strided_slice %1 {offsets = [0, 514], sizes = [16, 16], strides = [1, 1]} : vector<16x530xf32> to vector<16x16xf32>
    %cst_12 = arith.constant 0.000000e+00 : f32
    %95 = vector.broadcast %cst_12 : f32 to vector<1x16x16xf32>
    %96 = vector.extract_strided_slice %94 {offsets = [0, 0], sizes = [16, 1], strides = [1, 1]} : vector<16x16xf32> to vector<16x1xf32>
    %97 = vector.shape_cast %96 : vector<16x1xf32> to vector<1x16x1xf32>
    %98 = vector.extract_strided_slice %93 {offsets = [0, 0, 0], sizes = [1, 16, 16], strides = [1, 1, 1]} : vector<1x16x31xf32> to vector<1x16x16xf32>
    %99 = vector.broadcast %97 : vector<1x16x1xf32> to vector<1x16x16xf32>
    %100 = arith.mulf %99, %98 : vector<1x16x16xf32>
    %101 = arith.addf %95, %100 : vector<1x16x16xf32>
    %102 = vector.extract_strided_slice %94 {offsets = [0, 1], sizes = [16, 1], strides = [1, 1]} : vector<16x16xf32> to vector<16x1xf32>
    %103 = vector.shape_cast %102 : vector<16x1xf32> to vector<1x16x1xf32>
    %104 = vector.extract_strided_slice %93 {offsets = [0, 0, 1], sizes = [1, 16, 16], strides = [1, 1, 1]} : vector<1x16x31xf32> to vector<1x16x16xf32>
    %105 = vector.broadcast %103 : vector<1x16x1xf32> to vector<1x16x16xf32>
    %106 = arith.mulf %105, %104 : vector<1x16x16xf32>
    %107 = arith.addf %101, %106 : vector<1x16x16xf32>
    %108 = vector.extract_strided_slice %94 {offsets = [0, 2], sizes = [16, 1], strides = [1, 1]} : vector<16x16xf32> to vector<16x1xf32>
    %109 = vector.shape_cast %108 : vector<16x1xf32> to vector<1x16x1xf32>
    %110 = vector.extract_strided_slice %93 {offsets = [0, 0, 2], sizes = [1, 16, 16], strides = [1, 1, 1]} : vector<1x16x31xf32> to vector<1x16x16xf32>
    %111 = vector.broadcast %109 : vector<1x16x1xf32> to vector<1x16x16xf32>
    %112 = arith.mulf %111, %110 : vector<1x16x16xf32>
    %113 = arith.addf %107, %112 : vector<1x16x16xf32>
    %114 = vector.extract_strided_slice %94 {offsets = [0, 3], sizes = [16, 1], strides = [1, 1]} : vector<16x16xf32> to vector<16x1xf32>
    %115 = vector.shape_cast %114 : vector<16x1xf32> to vector<1x16x1xf32>
    %116 = vector.extract_strided_slice %93 {offsets = [0, 0, 3], sizes = [1, 16, 16], strides = [1, 1, 1]} : vector<1x16x31xf32> to vector<1x16x16xf32>
    %117 = vector.broadcast %115 : vector<1x16x1xf32> to vector<1x16x16xf32>
    %118 = arith.mulf %117, %116 : vector<1x16x16xf32>
    %119 = arith.addf %113, %118 : vector<1x16x16xf32>
    %120 = vector.extract_strided_slice %94 {offsets = [0, 4], sizes = [16, 1], strides = [1, 1]} : vector<16x16xf32> to vector<16x1xf32>
    %121 = vector.shape_cast %120 : vector<16x1xf32> to vector<1x16x1xf32>
    %122 = vector.extract_strided_slice %93 {offsets = [0, 0, 4], sizes = [1, 16, 16], strides = [1, 1, 1]} : vector<1x16x31xf32> to vector<1x16x16xf32>
    %123 = vector.broadcast %121 : vector<1x16x1xf32> to vector<1x16x16xf32>
    %124 = arith.mulf %123, %122 : vector<1x16x16xf32>
    %125 = arith.addf %119, %124 : vector<1x16x16xf32>
    %126 = vector.extract_strided_slice %94 {offsets = [0, 5], sizes = [16, 1], strides = [1, 1]} : vector<16x16xf32> to vector<16x1xf32>
    %127 = vector.shape_cast %126 : vector<16x1xf32> to vector<1x16x1xf32>
    %128 = vector.extract_strided_slice %93 {offsets = [0, 0, 5], sizes = [1, 16, 16], strides = [1, 1, 1]} : vector<1x16x31xf32> to vector<1x16x16xf32>
    %129 = vector.broadcast %127 : vector<1x16x1xf32> to vector<1x16x16xf32>
    %130 = arith.mulf %129, %128 : vector<1x16x16xf32>
    %131 = arith.addf %125, %130 : vector<1x16x16xf32>
    %132 = vector.extract_strided_slice %94 {offsets = [0, 6], sizes = [16, 1], strides = [1, 1]} : vector<16x16xf32> to vector<16x1xf32>
    %133 = vector.shape_cast %132 : vector<16x1xf32> to vector<1x16x1xf32>
    %134 = vector.extract_strided_slice %93 {offsets = [0, 0, 6], sizes = [1, 16, 16], strides = [1, 1, 1]} : vector<1x16x31xf32> to vector<1x16x16xf32>
    %135 = vector.broadcast %133 : vector<1x16x1xf32> to vector<1x16x16xf32>
    %136 = arith.mulf %135, %134 : vector<1x16x16xf32>
    %137 = arith.addf %131, %136 : vector<1x16x16xf32>
    %138 = vector.extract_strided_slice %94 {offsets = [0, 7], sizes = [16, 1], strides = [1, 1]} : vector<16x16xf32> to vector<16x1xf32>
    %139 = vector.shape_cast %138 : vector<16x1xf32> to vector<1x16x1xf32>
    %140 = vector.extract_strided_slice %93 {offsets = [0, 0, 7], sizes = [1, 16, 16], strides = [1, 1, 1]} : vector<1x16x31xf32> to vector<1x16x16xf32>
    %141 = vector.broadcast %139 : vector<1x16x1xf32> to vector<1x16x16xf32>
    %142 = arith.mulf %141, %140 : vector<1x16x16xf32>
    %143 = arith.addf %137, %142 : vector<1x16x16xf32>
    %144 = vector.extract_strided_slice %94 {offsets = [0, 8], sizes = [16, 1], strides = [1, 1]} : vector<16x16xf32> to vector<16x1xf32>
    %145 = vector.shape_cast %144 : vector<16x1xf32> to vector<1x16x1xf32>
    %146 = vector.extract_strided_slice %93 {offsets = [0, 0, 8], sizes = [1, 16, 16], strides = [1, 1, 1]} : vector<1x16x31xf32> to vector<1x16x16xf32>
    %147 = vector.broadcast %145 : vector<1x16x1xf32> to vector<1x16x16xf32>
    %148 = arith.mulf %147, %146 : vector<1x16x16xf32>
    %149 = arith.addf %143, %148 : vector<1x16x16xf32>
    %150 = vector.extract_strided_slice %94 {offsets = [0, 9], sizes = [16, 1], strides = [1, 1]} : vector<16x16xf32> to vector<16x1xf32>
    %151 = vector.shape_cast %150 : vector<16x1xf32> to vector<1x16x1xf32>
    %152 = vector.extract_strided_slice %93 {offsets = [0, 0, 9], sizes = [1, 16, 16], strides = [1, 1, 1]} : vector<1x16x31xf32> to vector<1x16x16xf32>
    %153 = vector.broadcast %151 : vector<1x16x1xf32> to vector<1x16x16xf32>
    %154 = arith.mulf %153, %152 : vector<1x16x16xf32>
    %155 = arith.addf %149, %154 : vector<1x16x16xf32>
    %156 = vector.extract_strided_slice %94 {offsets = [0, 10], sizes = [16, 1], strides = [1, 1]} : vector<16x16xf32> to vector<16x1xf32>
    %157 = vector.shape_cast %156 : vector<16x1xf32> to vector<1x16x1xf32>
    %158 = vector.extract_strided_slice %93 {offsets = [0, 0, 10], sizes = [1, 16, 16], strides = [1, 1, 1]} : vector<1x16x31xf32> to vector<1x16x16xf32>
    %159 = vector.broadcast %157 : vector<1x16x1xf32> to vector<1x16x16xf32>
    %160 = arith.mulf %159, %158 : vector<1x16x16xf32>
    %161 = arith.addf %155, %160 : vector<1x16x16xf32>
    %162 = vector.extract_strided_slice %94 {offsets = [0, 11], sizes = [16, 1], strides = [1, 1]} : vector<16x16xf32> to vector<16x1xf32>
    %163 = vector.shape_cast %162 : vector<16x1xf32> to vector<1x16x1xf32>
    %164 = vector.extract_strided_slice %93 {offsets = [0, 0, 11], sizes = [1, 16, 16], strides = [1, 1, 1]} : vector<1x16x31xf32> to vector<1x16x16xf32>
    %165 = vector.broadcast %163 : vector<1x16x1xf32> to vector<1x16x16xf32>
    %166 = arith.mulf %165, %164 : vector<1x16x16xf32>
    %167 = arith.addf %161, %166 : vector<1x16x16xf32>
    %168 = vector.extract_strided_slice %94 {offsets = [0, 12], sizes = [16, 1], strides = [1, 1]} : vector<16x16xf32> to vector<16x1xf32>
    %169 = vector.shape_cast %168 : vector<16x1xf32> to vector<1x16x1xf32>
    %170 = vector.extract_strided_slice %93 {offsets = [0, 0, 12], sizes = [1, 16, 16], strides = [1, 1, 1]} : vector<1x16x31xf32> to vector<1x16x16xf32>
    %171 = vector.broadcast %169 : vector<1x16x1xf32> to vector<1x16x16xf32>
    %172 = arith.mulf %171, %170 : vector<1x16x16xf32>
    %173 = arith.addf %167, %172 : vector<1x16x16xf32>
    %174 = vector.extract_strided_slice %94 {offsets = [0, 13], sizes = [16, 1], strides = [1, 1]} : vector<16x16xf32> to vector<16x1xf32>
    %175 = vector.shape_cast %174 : vector<16x1xf32> to vector<1x16x1xf32>
    %176 = vector.extract_strided_slice %93 {offsets = [0, 0, 13], sizes = [1, 16, 16], strides = [1, 1, 1]} : vector<1x16x31xf32> to vector<1x16x16xf32>
    %177 = vector.broadcast %175 : vector<1x16x1xf32> to vector<1x16x16xf32>
    %178 = arith.mulf %177, %176 : vector<1x16x16xf32>
    %179 = arith.addf %173, %178 : vector<1x16x16xf32>
    %180 = vector.extract_strided_slice %94 {offsets = [0, 14], sizes = [16, 1], strides = [1, 1]} : vector<16x16xf32> to vector<16x1xf32>
    %181 = vector.shape_cast %180 : vector<16x1xf32> to vector<1x16x1xf32>
    %182 = vector.extract_strided_slice %93 {offsets = [0, 0, 14], sizes = [1, 16, 16], strides = [1, 1, 1]} : vector<1x16x31xf32> to vector<1x16x16xf32>
    %183 = vector.broadcast %181 : vector<1x16x1xf32> to vector<1x16x16xf32>
    %184 = arith.mulf %183, %182 : vector<1x16x16xf32>
    %185 = arith.addf %179, %184 : vector<1x16x16xf32>
    %186 = vector.extract_strided_slice %94 {offsets = [0, 15], sizes = [16, 1], strides = [1, 1]} : vector<16x16xf32> to vector<16x1xf32>
    %187 = vector.shape_cast %186 : vector<16x1xf32> to vector<1x16x1xf32>
    %188 = vector.extract_strided_slice %93 {offsets = [0, 0, 15], sizes = [1, 16, 16], strides = [1, 1, 1]} : vector<1x16x31xf32> to vector<1x16x16xf32>
    %189 = vector.broadcast %187 : vector<1x16x1xf32> to vector<1x16x16xf32>
    %190 = arith.mulf %189, %188 : vector<1x16x16xf32>
    %191 = arith.addf %185, %190 : vector<1x16x16xf32>
    %192 = vector.extract_strided_slice %1 {offsets = [0, 513], sizes = [16, 1], strides = [1, 1]} : vector<16x530xf32> to vector<16x1xf32>
    %193 = vector.shape_cast %192 : vector<16x1xf32> to vector<1x16x1xf32>
    %194 = vector.broadcast %193 : vector<1x16x1xf32> to vector<1x16x16xf32>
    %195 = arith.addf %191, %194 : vector<1x16x16xf32>
    %cst_13 = arith.constant 0.000000e+00 : f32
    %196 = vector.broadcast %cst_13 : f32 to vector<1x16x16xf32>
    %197 = arith.cmpf ogt, %195, %196 : vector<1x16x16xf32>
    %cst_14 = arith.constant 0.000000e+00 : f32
    %198 = vector.broadcast %cst_14 : f32 to vector<1x16x16xf32>
    %199 = arith.minimumf %195, %198 : vector<1x16x16xf32>
    %200 = math.exp %199 : vector<1x16x16xf32>
    %cst_15 = arith.constant 1.000000e+00 : f32
    %201 = vector.broadcast %cst_15 : f32 to vector<1x16x16xf32>
    %202 = arith.subf %200, %201 : vector<1x16x16xf32>
    %203 = arith.select %197, %195, %202 : vector<1x16x16xi1>, vector<1x16x16xf32>
    %204 = vector.extract_strided_slice %203 {offsets = [0, 0, 0], sizes = [1, 1, 16], strides = [1, 1, 1]} : vector<1x16x16xf32> to vector<1x1x16xf32>
    %205 = vector.extract_strided_slice %203 {offsets = [0, 1, 0], sizes = [1, 1, 16], strides = [1, 1, 1]} : vector<1x16x16xf32> to vector<1x1x16xf32>
    %206 = vector.extract_strided_slice %203 {offsets = [0, 2, 0], sizes = [1, 1, 16], strides = [1, 1, 1]} : vector<1x16x16xf32> to vector<1x1x16xf32>
    %207 = vector.extract_strided_slice %203 {offsets = [0, 3, 0], sizes = [1, 1, 16], strides = [1, 1, 1]} : vector<1x16x16xf32> to vector<1x1x16xf32>
    %208 = vector.extract_strided_slice %203 {offsets = [0, 4, 0], sizes = [1, 1, 16], strides = [1, 1, 1]} : vector<1x16x16xf32> to vector<1x1x16xf32>
    %209 = vector.extract_strided_slice %203 {offsets = [0, 5, 0], sizes = [1, 1, 16], strides = [1, 1, 1]} : vector<1x16x16xf32> to vector<1x1x16xf32>
    %210 = vector.extract_strided_slice %203 {offsets = [0, 6, 0], sizes = [1, 1, 16], strides = [1, 1, 1]} : vector<1x16x16xf32> to vector<1x1x16xf32>
    %211 = vector.extract_strided_slice %203 {offsets = [0, 7, 0], sizes = [1, 1, 16], strides = [1, 1, 1]} : vector<1x16x16xf32> to vector<1x1x16xf32>
    %212 = vector.extract_strided_slice %203 {offsets = [0, 8, 0], sizes = [1, 1, 16], strides = [1, 1, 1]} : vector<1x16x16xf32> to vector<1x1x16xf32>
    %213 = vector.extract_strided_slice %203 {offsets = [0, 9, 0], sizes = [1, 1, 16], strides = [1, 1, 1]} : vector<1x16x16xf32> to vector<1x1x16xf32>
    %214 = vector.extract_strided_slice %203 {offsets = [0, 10, 0], sizes = [1, 1, 16], strides = [1, 1, 1]} : vector<1x16x16xf32> to vector<1x1x16xf32>
    %215 = vector.extract_strided_slice %203 {offsets = [0, 11, 0], sizes = [1, 1, 16], strides = [1, 1, 1]} : vector<1x16x16xf32> to vector<1x1x16xf32>
    %216 = vector.extract_strided_slice %203 {offsets = [0, 12, 0], sizes = [1, 1, 16], strides = [1, 1, 1]} : vector<1x16x16xf32> to vector<1x1x16xf32>
    %217 = vector.extract_strided_slice %203 {offsets = [0, 13, 0], sizes = [1, 1, 16], strides = [1, 1, 1]} : vector<1x16x16xf32> to vector<1x1x16xf32>
    %218 = vector.extract_strided_slice %203 {offsets = [0, 14, 0], sizes = [1, 1, 16], strides = [1, 1, 1]} : vector<1x16x16xf32> to vector<1x1x16xf32>
    %219 = vector.extract_strided_slice %203 {offsets = [0, 15, 0], sizes = [1, 1, 16], strides = [1, 1, 1]} : vector<1x16x16xf32> to vector<1x1x16xf32>
    %220 = tpu.concatenate %204, %205, %206, %207, %208, %209, %210, %211, %212, %213, %214, %215, %216, %217, %218, %219 in 2 : vector<1x1x16xf32>, vector<1x1x16xf32>, vector<1x1x16xf32>, vector<1x1x16xf32>, vector<1x1x16xf32>, vector<1x1x16xf32>, vector<1x1x16xf32>, vector<1x1x16xf32>, vector<1x1x16xf32>, vector<1x1x16xf32>, vector<1x1x16xf32>, vector<1x1x16xf32>, vector<1x1x16xf32>, vector<1x1x16xf32>, vector<1x1x16xf32>, vector<1x1x16xf32> -> vector<1x1x256xf32>
    %c0_16 = arith.constant 0 : index
    %c0_17 = arith.constant 0 : index
    %c0_18 = arith.constant 0 : index
    %221 = vector.load %arg4[%c0_16, %c0_17, %c0_18] : memref<1x1x256xf32, #tpu.memory_space<vmem>>, vector<1x1x256xf32>
    tpu.vector_store %arg4[%c0_16, %c0_17, %c0_18], %220 {strides = array<i32>} : memref<1x1x256xf32, #tpu.memory_space<vmem>>, vector<1x1x256xf32>,
    return
  }
  func.func @transform_0(%arg0: i32) -> (i32, i32, i32) {
    %c0_i32 = arith.constant 0 : i32
    %c0_i32_0 = arith.constant 0 : i32
    %c0_i32_1 = arith.constant 0 : i32
    return %arg0, %c0_i32, %c0_i32_0 : i32, i32, i32
  }
  func.func @transform_1(%arg0: i32) -> (i32, i32) {
    %c0_i32 = arith.constant 0 : i32
    %c0_i32_0 = arith.constant 0 : i32
    %c0_i32_1 = arith.constant 0 : i32
    return %c0_i32, %c0_i32_0 : i32, i32
  }
  func.func @transform_2(%arg0: i32) -> (i32, i32) {
    %c0_i32 = arith.constant 0 : i32
    %c0_i32_0 = arith.constant 0 : i32
    %c0_i32_1 = arith.constant 0 : i32
    return %c0_i32, %c0_i32_0 : i32, i32
  }
  func.func @transform_3(%arg0: i32) -> (i32, i32, i32) {
    %c0_i32 = arith.constant 0 : i32
    %c0_i32_0 = arith.constant 0 : i32
    %c0_i32_1 = arith.constant 0 : i32
    return %arg0, %c0_i32, %c0_i32_0 : i32, i32, i32
  }
}

</mosaic_0001>

<bundles_post_ra>
// kernel: tpu_custom_call.1
= control target key start
LH: loop header
LB: loop body
LE: loop exit
PB: predicated region body
PF: predicated region fallthrough
CT: control target
= control target key end

     0   :  { %8 = vsyncpa [#allocation3], 0  ;;  %s6269_s0 = inlined_call_operand.hbm [shape: f32[2,8,127], index: 0, kind: input, shape index: {}]   ;;  %s6270_s1 = inlined_call_operand.vmem [shape: f32[16,530], index: 1, kind: input, shape index: {}]   ;;  %s6271_s2 = inlined_call_operand.vmem [shape: f32[64,16], index: 2, kind: input, shape index: {}]   ;;  %s6272_s3 = inlined_call_operand.hbm [shape: f32[2,1,256], index: 3, kind: output, shape index: {}]  }
   0x1   :  { %10 = vsyncpa [#allocation3 + $0x1], 0 }
   0x2   :  { %11 = vsyncpa [#allocation4], 0 }
   0x3   :  { %13 = vsyncpa [#allocation4 + $0x1], 0  ;;  %s4308_s12 = smov 0   ;;  %s4310_s13 = smov 0  }
   0x4   :  { %s4312_s14 = smov 0   ;;  %s4314_s15 = smov 0  }
   0x5 LB: > { %s4329_s16 = sadd.s32 4294967295, %s4242_s15   ;;  %s3376_s17 = sadd.s32 4294967294, %s4242_s15   ;;  %s4242_s15 = sphi %s4314_s15, %s6763_s15   ;;  %s4238_s14 = sphi %s4312_s14, %s6762_s14   ;;  %s4234_s13 = sphi %s4310_s13, %s6761_s13   ;;  %s4230_s12 = sphi %s4308_s12, %s6760_s12  }
   0x6   : > { %s4333_s18 = sadd.s32 1, %s4242_s15   ;;  %s26_s19 = sadd.s32 1, %s4238_s14 }
   0x7   : > { %s23_s20 = ssub.s32 %s4242_s15, %s4333_s18  ;;  %p33_p0 = scmp.ne.s32.totalorder %s4238_s14, %s4234_s13 }
   0x8   : > { %p24_p1 = scmp.eq.s32.totalorder %s23_s20, 0  ;;  %p34_p2 = scmp.eq.s32.totalorder %s4242_s15, 0 }
   0x9   : > { %p39_p3 = scmp.ne.s32.totalorder %s4234_s13, %s4230_s12  ;;  %p40_p4 = scmp.eq.s32.totalorder %s4329_s16, 0 }
   0xa   : > { %s4345_s21 = scalar_select %p24_p1, %s4238_s14, %s26_s19  }
   0xb   : > { %p4347_p5 = por %p34_p2, %p33_p0  ;;  %p4351_p6 = por %p40_p4, %p39_p3 }
   0xc   : > { %p105_p7 = scmp.eq.s32.totalorder %s4329_s16, 1  ;;  %p111_p8 = scmp.eq.s32.totalorder %s3376_s17, 1 }
   0xd   : > { %s6457_s23 = scalar_select %p4351_p6, 1, 0 }
   0xe   : > { %p4036_p10 = scmp.lt.s32.totalorder %s4242_s15, 2  ;;  %p4358_p11 = por %p105_p7, %p33_p0 }
   0xf   : > { %p4362_p12 = por %p111_p8, %p39_p3  ;;  %s137_s26 = sand.u32 1, %s4238_s14  }
  0x10   : > { %s6458_s24 = scalar_select %p4358_p11, 1, 0 }
  0x11   : > { %s6459_s25 = scalar_select %p4362_p12, 1, 0 }
  0x12   : > { %s3380_s27 = sshll.u32 %s4242_s15, 7  ;;  %s3379_s28 = sshll.u32 %s137_s26, 3 }
  0x13   : > { %s4371_s4 = scalar_lea.hbm %s6269_s0, %s3380_s27  ;;  %s141_s5 = scalar_lea.vmem [#allocation2], %s3379_s28 }
  0x14   : > { %s148_s6 = sshll.u32 %s141_s5, 4  ;;  %p4375_p13 = pnand %p4036_p10, %p4347_p5  ;;  %s4379_s6 = int_to_ptr.vmem [resolvable:$true] %s148_s6 }
  0x15   : > { %s138_s8 = scalar_lea.sflag [#allocation3], %s137_s26  ;;  %s4150_s9 = scalar_lea.hbm %s4371_s4, 128 }
  0x16   : > { %p4151_p2 = scmp.ne.s32.totalorder %s4371_s4, %s4150_s9  ;;  %p4152_p3 = pneg %p4375_p13 }
  0x17   : > { %s4155_s17 = scalar_lea.hbm %s6269_s0, 256  ;;  %p4156_p5 = scmp.lt.s32.totalorder %s4371_s4, %s6269_s0 }
  0x18   : > { %p4153_p4 = pnand %p4152_p3, %p4151_p2  ;;  %p4157_p8 = scmp.lt.s32.totalorder %s4155_s17, %s4150_s9 }
  0x1a   : > { %p4154_p7 = pneg %p4153_p4  ;;  %p4158_p10 = por %p4157_p8, %p4156_p5 }
  0x1c   : > { %p4159_p9 = pnand %p4158_p10, %p4154_p7 }
  0x1e   : > { %4162 = shalt.err (!%p4159_p9)
}
  0x1f   : > { %s4163_s22 = scalar_lea.vmem %s4379_s6, 128  ;;  %s4244_s26 = smov [#allocation2]  }
  0x20   : > { %p4164_p0 = scmp.ne.s32.totalorder %s4379_s6, %s4163_s22  ;;  %s4168_s27 = sshll.u32 %s4244_s26, 4  ;;  %s4169_s27 = int_to_ptr.vmem [resolvable:$false] %s4168_s27 }
  0x21   : > { %s4170_s28 = scalar_lea.vmem %s4169_s27, 256  ;;  %p4171_p4 = scmp.lt.s32.totalorder %s4379_s6, %s4169_s27 }
  0x22   : > { %p4166_p1 = pnand %p4164_p0, %p4152_p3  ;;  %p4172_p12 = scmp.lt.s32.totalorder %s4170_s28, %s4163_s22 }
  0x24   : > { %p4167_p2 = pneg %p4166_p1  ;;  %p4173_p11 = por %p4172_p12, %p4171_p4 }
  0x26   : > { %p4174_p6 = pnand %p4173_p11, %p4167_p2 }
  0x28   : > { %4177 = shalt.err (!%p4174_p6)
}
  0x29   : > { %4031 = dma.hbm_to_vmem [thread:$0]  (!%p4375_p13), %s4371_s4, 128, %s4379_s6, %s138_s8  }
  0x2a   : > { %p6461_p9 = scmp.lt.s32.totalorder %s4242_s15, 3  ;;  %p6462_p7 = scmp.ge.s32.totalorder %s4242_s15, 1 }
  0x2c   : > { %p154_p0 = pnand %p6462_p7, %p6461_p9 }
  0x2e   : > { %157 = sbr.rel (%p154_p0) target bundleno = 1484 (0x5cc), region = 32 }
  0x33   : > { %s4406_s29 = sand.u32 1, %s4234_s13   ;;  %p6463_p6 = scmp.ne.s32.totalorder %s6457_s23, 0 }
  0x34   : > { %s3382_s30 = sshll.u32 %s4406_s29, 3  ;;  %s160_s5 = scalar_lea.sflag [#allocation3], %s4406_s29 }
  0x35   : > { %s163_s9 = scalar_lea.vmem [#allocation2], %s3382_s30 }
  0x36   : > { %4221 = dma.done.wait (%p6463_p6), %s160_s5, 128  }
  0x37   : > { %4223 = vsyncadd (%p6463_p6), %s160_s5, 4294967168  ;;  %v4414_v0 = vld [vmem:[%s163_s9] sm:$0xff]  ;;  %s6342_s4 = smov 115   ;;  %s6275_s6 = smov 113   ;;  %vm2255_vm0 = vcmask 523264   ;;  %vm2850_vm3 = vcmask 56320  }
  0x38   : > { %242 = vrot.lane.b32.xlu1 %v4414_v0, %s6342_s4  ;;  %248 = vrot.lane.b32.xlu0 %v4414_v0, %s6275_s6  ;;  %s6430_s7 = smov 116   ;;  %s4248_s8 = smov 114   ;;  %v188_v9 = vld [vmem:[%s6270_s1 + $0x8] sm:$0xff]  ;;  %v187_v45 = vld [vmem:[%s6270_s1] sm:$0xff]  ;;  %vm2853_vm4 = vcmask 187392   ;;  %vm3248_vm7 = vcmask 130048  }
  0x39   : > { %s4249_s23 = smov 118   ;;  %s6432_s10 = smov 117   ;;  %v4479_v10 = vand.u32 4294901760, %v188_v9  ;;  %v4680_v56 = vand.u32 4294901760, %v187_v45  ;;  %vm3250_vm8 = vcmask 261120   ;;  %vm3252_vm9 = vcmask 392192  }
  0x3a   : > { %s4251_s11 = smov 120   ;;  %s4252_s17 = smov 119   ;;  %vm3255_vm10 = vcmask 654336   ;;  %vm3257_vm11 = vcmask 785408   ;;  %vm3259_vm12 = vcmask 916480  }
  0x3b   : > { %s4253_s19 = smov 122   ;;  %s4254_s20 = smov 121   ;;  %6464 = vst [vmem:[#allocation8_spill] sm:$0xff] %v4479_v10  ;;  %v4490_v13 = vsub.f32 %v188_v9, %v4479_v10  ;;  %747 = vmatprep.mubr.f32.mxu1 %v4479_v10  ;;  %6469 = vst [vmem:[#allocation13_spill] sm:$0xff] %v4680_v56 }
  0x3c   : > { %239 = vrot.lane.b32.xlu1 %v4414_v0, %s6430_s7  ;;  %245 = vrot.lane.b32.xlu0 %v4414_v0, %s4248_s8  ;;  %s4255_s22 = smov 124   ;;  %s4256_s26 = smov 123  }
  0x3d   : > { %s4257_s27 = smov 126   ;;  %s4258_s28 = smov 125   ;;  %6465 = vst [vmem:[#allocation9_spill] sm:$0xff] %v4490_v13  ;;  %v6285_v15 = vand.u32 4294901760, %v4490_v13 }
  0x3e   : > { %s4259_s30 = smov 127   ;;  %s6277_s5 = smov 112  }
  0x3f   : > { %v494_v17 = vsub.f32 %v4490_v13, %v6285_v15  ;;  %s6340_s6 = smov 80   ;;  %s6279_s9 = smov 96  }
  0x40   : > { %233 = vrot.lane.b32.xlu1 %v4414_v0, %s4249_s23  ;;  %236 = vrot.lane.b32.xlu0 %v4414_v0, %s6432_s10  ;;  %s3393_s4 = sshll.u32 %s4329_s16, 5  ;;  %p6757_p12 = scmp.ne.s32.totalorder %s6458_s24, 0 }
  0x41   : > { %v495_v19 = vand.u32 4294901760, %v494_v17 }
  0x43   : > { %496 = vmatprep.mubr.f32.mxu0 %v495_v19  ;;  %v4716_v19 = vsub.f32 %v187_v45, %v4680_v56 }
  0x44   : > { %227 = vrot.lane.b32.xlu1 %v4414_v0, %s4251_s11  ;;  %230 = vrot.lane.b32.xlu0 %v4414_v0, %s4252_s17 }
  0x45   : > { %6472 = vst [vmem:[#allocation16_spill] sm:$0xff] %v4716_v19 }
  0x48   : > { %221 = vrot.lane.b32.xlu1 %v4414_v0, %s4253_s19  ;;  %224 = vrot.lane.b32.xlu0 %v4414_v0, %s4254_s20 }
  0x4c   : > { %215 = vrot.lane.b32.xlu1 %v4414_v0, %s4255_s22  ;;  %218 = vrot.lane.b32.xlu0 %v4414_v0, %s4256_s26 }
  0x50   : > { %209 = vrot.lane.b32.xlu1 %v4414_v0, %s4257_s27  ;;  %212 = vrot.lane.b32.xlu0 %v4414_v0, %s4258_s28 }
  0x54   : > { %206 = vrot.lane.b32.xlu0 %v4414_v0, %s4259_s30 }
  0xaa   : > { %v4446_v1 = vpop.permute.xlu1 %242  ;;  %v4448_v2 = vpop.permute.xlu0 %248 }
  0xab   : > { %281 = vrot.lane.b32.xlu1 %v4448_v2, %s6277_s5  ;;  %v4586_v22 = vand.u32 4294901760, %v4448_v2  ;;  %v4589_v23 = vand.u32 4294901760, %v4446_v1 }
  0xad   : > { %v4596_v25 = vsub.f32 %v4448_v2, %v4586_v22  ;;  %v4606_v28 = vsub.f32 %v4446_v1, %v4589_v23 }
  0xae   : > { %v4452_v3 = vpop.permute.xlu1 %239  ;;  %v4454_v4 = vpop.permute.xlu0 %245 }
  0xaf   : > { %277 = vrot.lane.b32.xlu1 %v4446_v1, %s6277_s5  ;;  %279 = vrot.lane.b32.xlu0 %v4454_v4, %s6277_s5  ;;  %v4592_v24 = vand.u32 4294901760, %v4454_v4  ;;  %v4599_v26 = vand.u32 4294901760, %v4452_v3  ;;  %v6289_v30 = vand.u32 4294901760, %v4596_v25  ;;  %v6286_v34 = vand.u32 4294901760, %v4606_v28 }
  0xb1   : > { %v4610_v29 = vsub.f32 %v4454_v4, %v4592_v24  ;;  %v4618_v32 = vsub.f32 %v4452_v3, %v4599_v26  ;;  %v526_v37 = vsub.f32 %v4596_v25, %v6289_v30  ;;  %v4646_v44 = vsub.f32 %v4606_v28, %v6286_v34 }
  0xb2   : > { %v4460_v5 = vpop.permute.xlu1 %233  ;;  %v4462_v6 = vpop.permute.xlu0 %236 }
  0xb3   : > { %275 = vrot.lane.b32.xlu0 %v4452_v3, %s6277_s5  ;;  %273 = vrot.lane.b32.xlu1 %v4462_v6, %s6277_s5  ;;  %v4602_v27 = vand.u32 4294901760, %v4462_v6  ;;  %v4614_v31 = vand.u32 4294901760, %v4460_v5  ;;  %v6287_v35 = vand.u32 4294901760, %v4610_v29  ;;  %v6283_v41 = vand.u32 4294901760, %v4618_v32 }
  0xb4   : > { %v527_v49 = vand.u32 4294901760, %v526_v37 }
  0xb5   : > { %6466 = vst [vmem:[#allocation10_spill] sm:$0xff] %v4614_v31  ;;  %v4622_v33 = vsub.f32 %v4462_v6, %v4602_v27  ;;  %v4634_v38 = vsub.f32 %v4460_v5, %v4614_v31  ;;  %v4654_v46 = vsub.f32 %v4610_v29, %v6287_v35  ;;  %v4669_v53 = vsub.f32 %v4618_v32, %v6283_v41 }
  0xb6   : > { %v4468_v7 = vpop.permute.xlu1 %227  ;;  %v4470_v8 = vpop.permute.xlu0 %230 }
  0xb7   : > { %271 = vrot.lane.b32.xlu0 %v4460_v5, %s6277_s5  ;;  %269 = vrot.lane.b32.xlu1 %v4470_v8, %s6277_s5  ;;  %v4627_v36 = vand.u32 4294901760, %v4470_v8  ;;  %v4637_v40 = vand.u32 4294901760, %v4468_v7  ;;  %v6282_v42 = vand.u32 4294901760, %v4622_v33  ;;  %v6281_v50 = vand.u32 4294901760, %v4634_v38 }
  0xb8   : > { %v534_v61 = vand.u32 4294901760, %v4654_v46 }
  0xb9   : > { %6467 = vst [vmem:[#allocation11_spill] sm:$0xff] %v4627_v36  ;;  %6468 = vst [vmem:[#allocation12_spill] sm:$0xff] %v4637_v40  ;;  %v4658_v47 = vsub.f32 %v4470_v8, %v4627_v36  ;;  %v4674_v54 = vsub.f32 %v4622_v33, %v6282_v42  ;;  %v4678_v55 = vsub.f32 %v4468_v7, %v4637_v40 }
  0xba   : > { %v4481_v11 = vpop.permute.xlu1 %221  ;;  %v4483_v12 = vpop.permute.xlu0 %224 }
  0xbb   : > { %267 = vrot.lane.b32.xlu0 %v4468_v7, %s6277_s5  ;;  %265 = vrot.lane.b32.xlu1 %v4483_v12, %s6277_s5  ;;  %v4690_v62 = vand.u32 4294901760, %v4483_v12  ;;  %v4693_v63 = vand.u32 4294901760, %v4481_v11  ;;  %v6292_v17 = vand.u32 4294901760, %v4678_v55 }
  0xbd   : > { %6470 = vst [vmem:[#allocation14_spill] sm:$0xff] %v4690_v62  ;;  %6471 = vst [vmem:[#allocation15_spill] sm:$0xff] %v4693_v63  ;;  %v4733_v45 = vsub.f32 %v4483_v12, %v4690_v62  ;;  %v4737_v42 = vsub.f32 %v4481_v11, %v4693_v63 }
  0xbe   : > { %v4493_v14 = vpop.permute.xlu0 %218  ;;  %v4500_v16 = vpop.permute.xlu1 %215 }
  0xbf   : > { %263 = vrot.lane.b32.xlu0 %v4481_v11, %s6277_s5  ;;  %261 = vrot.lane.b32.xlu1 %v4493_v14, %s6277_s5  ;;  %6473 = vst [vmem:[#allocation17_spill] sm:$0xff] %v4737_v42 }
  0xc2   : > { %v4505_v18 = vpop.permute.xlu0 %212  ;;  %v4511_v20 = vpop.permute.xlu1 %209 }
  0xc3   : > { %259 = vrot.lane.b32.xlu0 %v4500_v16, %s6277_s5  ;;  %257 = vrot.lane.b32.xlu1 %v4505_v18, %s6277_s5 }
  0xc6   : > { %v4513_v21 = vpop.permute.xlu0 %206 }
  0xc7   : > { %255 = vrot.lane.b32.xlu0 %v4511_v20, %s6277_s5  ;;  %253 = vrot.lane.b32.xlu1 %v4513_v21, %s6277_s5 }
  0xcb   : > { %251 = vrot.lane.b32.xlu0 %v4414_v0, %s6277_s5  ;;  %377 = vrot.lane.b32.xlu1 %v4448_v2, %s6340_s6  ;;  %s4276_s5 = smov 7  }
  0xcf   : > { %329 = vrot.lane.b32.xlu0 %v4448_v2, %s6279_s9  ;;  %375 = vrot.lane.b32.xlu1 %v4454_v4, %s6340_s6 }
  0xd3   : > { %327 = vrot.lane.b32.xlu0 %v4454_v4, %s6279_s9  ;;  %373 = vrot.lane.b32.xlu1 %v4446_v1, %s6340_s6 }
  0xd7   : > { %325 = vrot.lane.b32.xlu0 %v4446_v1, %s6279_s9  ;;  %371 = vrot.lane.b32.xlu1 %v4452_v3, %s6340_s6  ;;  %v6284_v1 = vand.u32 4294901760, %v4658_v47 }
  0xdb   : > { %323 = vrot.lane.b32.xlu0 %v4452_v3, %s6279_s9  ;;  %369 = vrot.lane.b32.xlu1 %v4462_v6, %s6340_s6 }
  0xdf   : > { %321 = vrot.lane.b32.xlu0 %v4462_v6, %s6279_s9  ;;  %367 = vrot.lane.b32.xlu1 %v4460_v5, %s6340_s6 }
  0xe3   : > { %319 = vrot.lane.b32.xlu0 %v4460_v5, %s6279_s9  ;;  %365 = vrot.lane.b32.xlu1 %v4470_v8, %s6340_s6  ;;  %v4709_v5 = vsub.f32 %v4634_v38, %v6281_v50  ;;  %v4729_v50 = vsub.f32 %v4658_v47, %v6284_v1 }
  0xe7   : > { %317 = vrot.lane.b32.xlu0 %v4470_v8, %s6279_s9  ;;  %363 = vrot.lane.b32.xlu1 %v4468_v7, %s6340_s6 }
  0xeb   : > { %315 = vrot.lane.b32.xlu0 %v4468_v7, %s6279_s9  ;;  %361 = vrot.lane.b32.xlu1 %v4483_v12, %s6340_s6 }
  0xef   : > { %313 = vrot.lane.b32.xlu0 %v4483_v12, %s6279_s9  ;;  %359 = vrot.lane.b32.xlu1 %v4481_v11, %s6340_s6  ;;  %v6480_v12 = vand.u32 4294901760, %v4733_v45 }
  0xf1   : > { %v4808_v13 = vsub.f32 %v4733_v45, %v6480_v12 }
  0xf3   : > { %311 = vrot.lane.b32.xlu0 %v4481_v11, %s6279_s9  ;;  %357 = vrot.lane.b32.xlu1 %v4493_v14, %s6340_s6 }
  0xf7   : > { %309 = vrot.lane.b32.xlu0 %v4493_v14, %s6279_s9  ;;  %355 = vrot.lane.b32.xlu1 %v4500_v16, %s6340_s6 }
  0xfb   : > { %307 = vrot.lane.b32.xlu0 %v4500_v16, %s6279_s9  ;;  %353 = vrot.lane.b32.xlu1 %v4505_v18, %s6340_s6 }
  0xff   : > { %305 = vrot.lane.b32.xlu0 %v4505_v18, %s6279_s9  ;;  %351 = vrot.lane.b32.xlu1 %v4511_v20, %s6340_s6 }
 0x103   : > { %303 = vrot.lane.b32.xlu0 %v4511_v20, %s6279_s9  ;;  %349 = vrot.lane.b32.xlu1 %v4513_v21, %s6340_s6 }
 0x107   : > { %301 = vrot.lane.b32.xlu0 %v4513_v21, %s6279_s9  ;;  %347 = vrot.lane.b32.xlu1 %v4414_v0, %s6340_s6 }
 0x10b   : > { %299 = vrot.lane.b32.xlu0 %v4414_v0, %s6279_s9  ;;  %s6750_s9 = smov 117  }
 0x11d   : > { %v282_v39 = vpop.permute.xlu1 %281 }
 0x11e   : > { %v4641_v43 = vand.u32 4294901760, %v282_v39 }
 0x120   : > { %v4661_v48 = vsub.f32 %v282_v39, %v4641_v43  ;;  %3394 = vmatprep.subr.mxu0 %v4641_v43 }
 0x121   : > { %3395 = vmatpush3.msra.mxu0 %v4586_v22  ;;  %v278_v51 = vpop.permute.xlu1 %277  ;;  %v280_v52 = vpop.permute.xlu0 %279 }
 0x122   : > { %v4682_v57 = vand.u32 4294901760, %v278_v51  ;;  %v4684_v58 = vand.u32 4294901760, %v280_v52  ;;  %v6291_v59 = vand.u32 4294901760, %v4661_v48 }
 0x124   : > { %v4697_v2 = vsub.f32 %v278_v51, %v4682_v57  ;;  %v4700_v3 = vsub.f32 %v280_v52, %v4684_v58  ;;  %3396 = vmatprep.subr.mxu0 %v4684_v58  ;;  %v638_v4 = vsub.f32 %v4661_v48, %v6291_v59 }
 0x125   : > { %v274_v6 = vpop.permute.xlu1 %273  ;;  %3397 = vmatpush3.msra.mxu0 %v4592_v24  ;;  %v276_v7 = vpop.permute.xlu0 %275 }
 0x126   : > { %v4718_v37 = vand.u32 4294901760, %v274_v6  ;;  %v4720_v39 = vand.u32 4294901760, %v276_v7  ;;  %3398 = vmatprep.subr.mxu0 %v4682_v57  ;;  %v639_v46 = vand.u32 4294901760, %v638_v4  ;;  %v6288_v51 = vand.u32 4294901760, %v4700_v3 }
 0x127   : > { %3399 = vmatpush3.msra.mxu0 %v4589_v23  ;;  %v6290_v52 = vand.u32 4294901760, %v4697_v2 }
 0x128   : > { %v4740_v4 = vsub.f32 %v274_v6, %v4718_v37  ;;  %v4743_v41 = vsub.f32 %v276_v7, %v4720_v39  ;;  %3432 = vmatprep.subr.mxu1 %v639_v46  ;;  %3400 = vmatprep.subr.mxu0 %v4720_v39  ;;  %v645_v1 = vsub.f32 %v4700_v3, %v6288_v51  ;;  %v4755_v7 = vand.u32 4294901760, %v4493_v14 }
 0x129   : > { %3433 = vmatpush3.msra.mxu1 %v527_v49  ;;  %v270_v15 = vpop.permute.xlu1 %269  ;;  %3401 = vmatpush3.msra.mxu0 %v4599_v26  ;;  %v272_v11 = vpop.permute.xlu0 %271  ;;  %v652_v6 = vsub.f32 %v4697_v2, %v6290_v52  ;;  %v4760_v46 = vsub.f32 %v4678_v55, %v6292_v17  ;;  %v4773_v17 = vand.u32 4294901760, %v4500_v16 }
 0x12a   : > { %6474 = vst [vmem:[#allocation18_spill] sm:$0xff] %v4755_v7  ;;  %v4763_v35 = vand.u32 4294901760, %v270_v15  ;;  %v4765_v49 = vand.u32 4294901760, %v272_v11  ;;  %3402 = vmatprep.subr.mxu0 %v4718_v37  ;;  %v646_v51 = vand.u32 4294901760, %v645_v1  ;;  %v6295_v30 = vand.u32 4294901760, %v4743_v41 }
 0x12b   : > { %3403 = vmatpush3.msra.mxu0 %v4602_v27  ;;  %v6296_v52 = vand.u32 4294901760, %v4740_v4  ;;  %6476 = vst [vmem:[#allocation20_spill] sm:$0xff] %v4773_v17  ;;  %v653_v1 = vand.u32 4294901760, %v652_v6 }
 0x12c   : > { %6475 = vst [vmem:[#allocation19_spill] sm:$0xff] %v4763_v35  ;;  %v4777_v9 = vsub.f32 %v270_v15, %v4763_v35  ;;  %v4780_v34 = vsub.f32 %v272_v11, %v4765_v49  ;;  %3404 = vmatprep.subr.mxu0 %v4765_v49  ;;  %3434 = vmatprep.subr.mxu1 %v646_v51  ;;  %v4793_v51 = vand.u32 4294901760, %v4414_v0 }
 0x12d   : > { %v659_v8 = vsub.f32 %v4743_v41, %v6295_v30  ;;  %v266_v59 = vpop.permute.xlu1 %265  ;;  %3405 = vmatpush3.msra.mxu0 %v4614_v31  ;;  %3435 = vmatpush3.msra.mxu1 %v534_v61  ;;  %v268_v60 = vpop.permute.xlu0 %267  ;;  %v666_v15 = vsub.f32 %v4740_v4, %v6296_v52  ;;  %v6479_v52 = vand.u32 4294901760, %v4646_v44  ;;  %v4812_v31 = vsub.f32 %v4493_v14, %v4755_v7 }
 0x12e   : > { %v4795_v6 = vand.u32 4294901760, %v266_v59  ;;  %v4797_v10 = vand.u32 4294901760, %v268_v60  ;;  %3406 = vmatprep.subr.mxu0 %v4763_v35  ;;  %3436 = vmatprep.subr.mxu1 %v653_v1  ;;  %v6303_v30 = vand.u32 4294901760, %v4780_v34 }
 0x12f   : > { %v660_v61 = vand.u32 4294901760, %v659_v8  ;;  %3407 = vmatpush3.msra.mxu0 %v4627_v36  ;;  %3437 = vmatpush3.msra.mxu1 %v6479_v52  ;;  %6481 = vst [vmem:[#allocation23_spill] sm:$0xff] %v4812_v31  ;;  %v4816_v8 = vsub.f32 %v4500_v16, %v4773_v17  ;;  %v667_v52 = vand.u32 4294901760, %v666_v15  ;;  %v6482_v16 = vand.u32 4294901760, %v4669_v53 }
 0x130   : > { %6477 = vst [vmem:[#allocation21_spill] sm:$0xff] %v4795_v6  ;;  %6478 = vst [vmem:[#allocation22_spill] sm:$0xff] %v4797_v10  ;;  %v4819_v1 = vsub.f32 %v266_v59, %v4795_v6  ;;  %v4822_v44 = vsub.f32 %v268_v60, %v4797_v10  ;;  %3408 = vmatprep.subr.mxu0 %v4797_v10  ;;  %v673_v12 = vsub.f32 %v4780_v34, %v6303_v30 }
 0x131   : > { %3438 = vmatprep.subr.mxu1 %v660_v61  ;;  %v262_v14 = vpop.permute.xlu1 %261  ;;  %3409 = vmatpush3.msra.mxu0 %v4637_v40  ;;  %v264_v11 = vpop.permute.xlu0 %263  ;;  %v6483_v59 = vand.u32 4294901760, %v4777_v9  ;;  %v4835_v36 = vand.u32 4294901760, %v4505_v18  ;;  %v6484_v15 = vand.u32 4294901760, %v4737_v42  ;;  %v6485_v30 = vand.u32 4294901760, %v4716_v19 }
 0x132   : > { %3439 = vmatpush3.msra.mxu1 %v6482_v16  ;;  %v4847_v53 = vand.u32 4294901760, %v262_v14  ;;  %v4849_v16 = vand.u32 4294901760, %v264_v11  ;;  %3410 = vmatprep.subr.mxu0 %v4795_v6  ;;  %v6316_v10 = vand.u32 4294901760, %v4822_v44 }
 0x133   : > { %v680_v60 = vsub.f32 %v4777_v9, %v6483_v59  ;;  %v4840_v61 = vsub.f32 %v4737_v42, %v6484_v15  ;;  %v4845_v40 = vsub.f32 %v4716_v19, %v6485_v30  ;;  %3440 = vmatprep.subr.mxu1 %v667_v52  ;;  %v674_v59 = vand.u32 4294901760, %v673_v12  ;;  %3411 = vmatpush3.msra.mxu0 %v4690_v62 }
 0x134   : > { %6486 = vst [vmem:[#allocation24_spill] sm:$0xff] %v4847_v53  ;;  %6487 = vst [vmem:[#allocation25_spill] sm:$0xff] %v4849_v16  ;;  %v6488_v15 = vand.u32 4294901760, %v4674_v54  ;;  %v583_v30 = vand.u32 4294901760, %v4808_v13  ;;  %v4859_v19 = vand.u32 4294901760, %v4511_v20  ;;  %v4863_v42 = vsub.f32 %v4414_v0, %v4793_v51  ;;  %3412 = vmatprep.subr.mxu0 %v4849_v16 }
 0x135   : > { %v4866_v52 = vsub.f32 %v262_v14, %v4847_v53  ;;  %v4869_v12 = vsub.f32 %v264_v11, %v4849_v16  ;;  %v681_v54 = vand.u32 4294901760, %v680_v60  ;;  %v687_v13 = vsub.f32 %v4822_v44, %v6316_v10  ;;  %3413 = vmatpush3.msra.mxu0 %v4693_v63  ;;  %v260_v35 = vpop.permute.xlu0 %259 }
 0x136   : > { %3441 = vmatpush3.msra.mxu1 %v6488_v15  ;;  %6489 = vst [vmem:[#allocation26_spill] sm:$0xff] %v4859_v19  ;;  %6490 = vst [vmem:[#allocation27_spill] sm:$0xff] %v4863_v42  ;;  %v258_v15 = vpop.permute.xlu1 %257  ;;  %v6491_v0 = vand.u32 4294901760, %v4709_v5  ;;  %v6492_v14 = vand.u32 4294901760, %v4819_v1  ;;  %v4882_v62 = vand.u32 4294901760, %v4513_v21  ;;  %v4891_v63 = vand.u32 4294901760, %v260_v35  ;;  %3414 = vmatprep.subr.mxu0 %v4847_v53 }
 0x137   : > { %3442 = vmatprep.subr.mxu1 %v674_v59  ;;  %v4887_v59 = vsub.f32 %v4505_v18, %v4835_v36  ;;  %v4889_v10 = vand.u32 4294901760, %v258_v15  ;;  %v688_v5 = vand.u32 4294901760, %v687_v13  ;;  %3415 = vmatpush3.msra.mxu0 %v4755_v7  ;;  %v590_v60 = vand.u32 4294901760, %v4840_v61 }
 0x138   : > { %3443 = vmatpush3.msra.mxu1 %v6491_v0  ;;  %v694_v11 = vsub.f32 %v4819_v1, %v6492_v14  ;;  %6494 = vst [vmem:[#allocation29_spill] sm:$0xff] %v4891_v63  ;;  %v6323_v0 = vand.u32 4294901760, %v4869_v12  ;;  %v6495_v14 = vand.u32 4294901760, %v4729_v50  ;;  %v6328_v18 = vand.u32 4294901760, %v4866_v52  ;;  %3416 = vmatprep.subr.mxu0 %v4891_v63 }
 0x139   : > { %6493 = vst [vmem:[#allocation28_spill] sm:$0xff] %v4889_v10  ;;  %3444 = vmatprep.subr.mxu1 %v681_v54  ;;  %v4903_v6 = vsub.f32 %v4511_v20, %v4859_v19  ;;  %v4906_v54 = vsub.f32 %v258_v15, %v4889_v10  ;;  %v4909_v13 = vsub.f32 %v260_v35, %v4891_v63  ;;  %v6496_v20 = vand.u32 4294901760, %v4760_v46  ;;  %v256_v16 = vpop.permute.xlu0 %255 }
 0x13a   : > { %3445 = vmatpush3.msra.mxu1 %v6495_v14  ;;  %v695_v50 = vand.u32 4294901760, %v694_v11  ;;  %v701_v61 = vsub.f32 %v4869_v12, %v6323_v0  ;;  %v254_v14 = vpop.permute.xlu1 %253  ;;  %3417 = vmatpush3.msra.mxu0 %v4773_v17  ;;  %v708_v35 = vsub.f32 %v4866_v52, %v6328_v18  ;;  %v6497_v15 = vand.u32 4294901760, %v4812_v31 }
 0x13b   : > { %3446 = vmatprep.subr.mxu1 %v688_v5  ;;  %v4927_v0 = vsub.f32 %v4513_v21, %v4882_v62  ;;  %v4929_v63 = vand.u32 4294901760, %v254_v14  ;;  %v4931_v17 = vand.u32 4294901760, %v256_v16  ;;  %3418 = vmatprep.subr.mxu0 %v4889_v10  ;;  %v6334_v21 = vand.u32 4294901760, %v4906_v54 }
 0x13c   : > { %3447 = vmatpush3.msra.mxu1 %v6496_v20  ;;  %v596_v5 = vsub.f32 %v4812_v31, %v6497_v15  ;;  %v702_v46 = vand.u32 4294901760, %v701_v61  ;;  %v6333_v20 = vand.u32 4294901760, %v4909_v13  ;;  %3419 = vmatpush3.msra.mxu0 %v4835_v36  ;;  %v6499_v15 = vand.u32 4294901760, %v4816_v8 }
 0x13d   : > { %6498 = vst [vmem:[#allocation30_spill] sm:$0xff] %v4931_v17  ;;  %3448 = vmatprep.subr.mxu1 %v695_v50  ;;  %v4943_v53 = vsub.f32 %v254_v14, %v4929_v63  ;;  %v4946_v50 = vsub.f32 %v256_v16, %v4931_v17  ;;  %3420 = vmatprep.subr.mxu0 %v4931_v17  ;;  %v6500_v16 = vand.u32 4294901760, %v4887_v59 }
 0x13e   : > { %3449 = vmatpush3.msra.mxu1 %v583_v30  ;;  %v603_v18 = vsub.f32 %v4816_v8, %v6499_v15  ;;  %v709_v30 = vand.u32 4294901760, %v708_v35  ;;  %v715_v61 = vsub.f32 %v4909_v13, %v6333_v20  ;;  %3421 = vmatpush3.msra.mxu0 %v4859_v19  ;;  %v252_v15 = vpop.permute.xlu0 %251  ;;  %v597_v11 = vand.u32 4294901760, %v596_v5 }
 0x13f   : > { %3450 = vmatprep.subr.mxu1 %v702_v46  ;;  %v722_v14 = vsub.f32 %v4906_v54, %v6334_v21  ;;  %v610_v7 = vsub.f32 %v4887_v59, %v6500_v16  ;;  %v4960_v35 = vand.u32 4294901760, %v252_v15  ;;  %3422 = vmatprep.subr.mxu0 %v4929_v63  ;;  %v501_v21 = vand.u32 4294901760, %v4845_v40 }
 0x140   : > { %3451 = vmatpush3.msra.mxu1 %v590_v60  ;;  %v716_v20 = vand.u32 4294901760, %v715_v61  ;;  %v6345_v60 = vand.u32 4294901760, %v4946_v50  ;;  %3423 = vmatpush3.msra.mxu0 %v4882_v62  ;;  %v604_v5 = vand.u32 4294901760, %v603_v18  ;;  %v6501_v19 = vand.u32 4294901760, %v4903_v6 }
 0x141   : > { %3452 = vmatprep.subr.mxu1 %v709_v30  ;;  %v6339_v46 = vand.u32 4294901760, %v4943_v53  ;;  %v4971_v17 = vsub.f32 %v252_v15, %v4960_v35  ;;  %3424 = vmatprep.subr.mxu0 %v4960_v35  ;;  %v723_v30 = vand.u32 4294901760, %v722_v14  ;;  %v611_v40 = vand.u32 4294901760, %v610_v7 }
 0x142   : > { %3453 = vmatpush3.msra.mxu1 %v597_v11  ;;  %v617_v16 = vsub.f32 %v4903_v6, %v6501_v19  ;;  %v729_v11 = vsub.f32 %v4946_v50, %v6345_v60  ;;  %3425 = vmatpush3.msra.mxu0 %v4793_v51  ;;  %v6502_v18 = vand.u32 4294901760, %v4927_v0  ;;  %v6503_v15 = vand.u32 4294901760, %v4863_v42 }
 0x143   : > { %3454 = vmatprep.subr.mxu1 %v716_v20  ;;  %v736_v19 = vsub.f32 %v4943_v53, %v6339_v46  ;;  %3470 = vmatprep.subr.mxu0 %v4661_v48 }
 0x144   : > { %3455 = vmatpush3.msra.mxu1 %v604_v5  ;;  %v624_v61 = vsub.f32 %v4927_v0, %v6502_v18  ;;  %v631_v20 = vsub.f32 %v4863_v42, %v6503_v15  ;;  %v730_v14 = vand.u32 4294901760, %v729_v11  ;;  %v6344_v5 = vand.u32 4294901760, %v4971_v17  ;;  %502 = vmatmul.mubr.f32.vlgmr.msra.gmra.mxu0 %v501_v21  ;;  %v193_v21 = vld [vmem:[%s6270_s1 + $0x30] sm:$0xff] }
 0x145   : > { %3456 = vmatprep.subr.mxu1 %v723_v30  ;;  %v618_v7 = vand.u32 4294901760, %v617_v16  ;;  %3471 = vmatpush3.msra.mxu0 %v4596_v25  ;;  %v737_v46 = vand.u32 4294901760, %v736_v19  ;;  %v4999_v16 = vpop.permute.xlu1 %377  ;;  %v5005_v19 = vpop.permute.xlu0 %329 }
 0x146   : > { %3457 = vmatpush3.msra.mxu1 %v611_v40  ;;  %v743_v18 = vsub.f32 %v4971_v17, %v6344_v5  ;;  %3472 = vmatprep.subr.mxu0 %v4700_v3  ;;  %v625_v30 = vand.u32 4294901760, %v624_v61  ;;  %v632_v15 = vand.u32 4294901760, %v631_v20  ;;  %v192_v40 = vld [vmem:[%s6270_s1 + $0x28] sm:$0xff]  ;;  %6504 = vst [vmem:[#allocation31_spill] sm:$0xff] %v5005_v19 }
 0x147   : > { %3458 = vmatprep.subr.mxu1 %v730_v14  ;;  %3473 = vmatpush3.msra.mxu0 %v4610_v29  ;;  %v5014_v61 = vand.u32 4294901760, %v192_v40  ;;  %v6511_v5 = vld [vmem:[#allocation10_spill] sm:$0xff] }
 0x148   : > { %3459 = vmatpush3.msra.mxu1 %v618_v7  ;;  %v744_v11 = vand.u32 4294901760, %v743_v18  ;;  %3474 = vmatprep.subr.mxu0 %v4697_v2 }
 0x149   : > { %3460 = vmatprep.subr.mxu1 %v737_v46  ;;  %3475 = vmatpush3.msra.mxu0 %v4606_v28  ;;  %v5010_v46 = vand.u32 4294901760, %v193_v21  ;;  %v5020_v20 = vpop.permute.xlu1 %375  ;;  %v5027_v7 = vpop.permute.xlu0 %327  ;;  %v5032_v18 = vsub.f32 %v192_v40, %v5014_v61  ;;  %v6510_v40 = vld [vmem:[#allocation17_spill] sm:$0xff] }
 0x14a   : > { %3461 = vmatpush3.msra.mxu1 %v625_v30  ;;  %3476 = vmatprep.subr.mxu0 %v4743_v41  ;;  %6506 = vst [vmem:[#allocation33_spill] sm:$0xff] %v5020_v20  ;;  %6507 = vst [vmem:[#allocation34_spill] sm:$0xff] %v5027_v7  ;;  %v6515_v7 = vld [vmem:[#allocation22_spill] sm:$0xff] }
 0x14b   : > { %3462 = vmatprep.subr.mxu1 %v744_v11  ;;  %3477 = vmatpush3.msra.mxu0 %v4618_v32  ;;  %6505 = vst [vmem:[#allocation32_spill] sm:$0xff] %v5010_v46  ;;  %v5025_v14 = vsub.f32 %v193_v21, %v5010_v46 }
 0x14c   : > { %3463 = vmatpush3.msra.mxu1 %v632_v15  ;;  %3478 = vmatprep.subr.mxu0 %v4740_v4  ;;  %v6512_v15 = vld [vmem:[#allocation19_spill] sm:$0xff] }
 0x14d   : > { %749 = vmatmul.mubr.f32.vlgmr.msra.gmra.mxu1 %v4680_v56  ;;  %3508 = vmatprep.subr.mxu1 %v4641_v43  ;;  %v6352_v30 = vand.u32 4294901760, %v5025_v14  ;;  %v5044_v11 = vpop.permute.xlu1 %373  ;;  %v5048_v21 = vpop.permute.xlu0 %325  ;;  %v6513_v56 = vand.u32 4294901760, %v5032_v18 }
 0x14e   : > { %3479 = vmatpush3.msra.mxu0 %v4622_v33  ;;  %3509 = vmatpush3.msra.mxu1 %v4586_v22  ;;  %6508 = vst [vmem:[#allocation35_spill] sm:$0xff] %v5044_v11  ;;  %6509 = vst [vmem:[#allocation36_spill] sm:$0xff] %v5048_v21  ;;  %v6514_v11 = vld [vmem:[#allocation11_spill] sm:$0xff] }
 0x14f   : > { %3480 = vmatprep.subr.mxu0 %v4780_v34  ;;  %3510 = vmatprep.subr.mxu1 %v4684_v58  ;;  %v509_v60 = vsub.f32 %v5025_v14, %v6352_v30  ;;  %v515_v21 = vsub.f32 %v5032_v18, %v6513_v56  ;;  %v6517_v30 = vld [vmem:[#allocation12_spill] sm:$0xff]  ;;  %v6519_v56 = vld [vmem:[#allocation21_spill] sm:$0xff] }
 0x150   : > { %3481 = vmatpush3.msra.mxu0 %v4634_v38  ;;  %3511 = vmatpush3.msra.mxu1 %v4592_v24 }
 0x151   : > { %3482 = vmatprep.subr.mxu0 %v4777_v9  ;;  %3512 = vmatprep.subr.mxu1 %v4682_v57  ;;  %v5066_v20 = vpop.permute.xlu1 %371  ;;  %v510_v19 = vand.u32 4294901760, %v509_v60 }
 0x152   : > { %3483 = vmatpush3.msra.mxu0 %v4658_v47  ;;  %3513 = vmatpush3.msra.mxu1 %v4589_v23  ;;  %6516 = vst [vmem:[#allocation17_spill] sm:$0xff] %v5066_v20  ;;  %v6522_v20 = vld [vmem:[#allocation15_spill] sm:$0xff] }
 0x153   : > { %3484 = vmatprep.subr.mxu0 %v4822_v44  ;;  %3514 = vmatprep.subr.mxu1 %v4720_v39 }
 0x154   : > { %3485 = vmatpush3.msra.mxu0 %v4678_v55  ;;  %3515 = vmatpush3.msra.mxu1 %v4599_v26 }
 0x155   : > { %3486 = vmatprep.subr.mxu0 %v4819_v1  ;;  %3516 = vmatprep.subr.mxu1 %v4718_v37  ;;  %v5080_v60 = vpop.permute.xlu1 %369 }
 0x156   : > { %3487 = vmatpush3.msra.mxu0 %v4733_v45  ;;  %3517 = vmatpush3.msra.mxu1 %v4602_v27  ;;  %6523 = vst [vmem:[#allocation12_spill] sm:$0xff] %v5080_v60  ;;  %v6530_v60 = vld [vmem:[#allocation16_spill] sm:$0xff] }
 0x157   : > { %3488 = vmatprep.subr.mxu0 %v4869_v12  ;;  %3518 = vmatprep.subr.mxu1 %v4765_v49 }
 0x158   : > { %3489 = vmatpush3.msra.mxu0 %v6510_v40  ;;  %3519 = vmatpush3.msra.mxu1 %v6511_v5 }
 0x159   : > { %3490 = vmatprep.subr.mxu0 %v4866_v52  ;;  %3520 = vmatprep.subr.mxu1 %v6512_v15  ;;  %v5070_v15 = vpop.permute.xlu0 %323 }
 0x15a   : > { %3491 = vmatpush3.msra.mxu0 %v4812_v31  ;;  %3521 = vmatpush3.msra.mxu1 %v6514_v11  ;;  %6518 = vst [vmem:[#allocation10_spill] sm:$0xff] %v5070_v15  ;;  %v516_v31 = vand.u32 4294901760, %v515_v21  ;;  %v6520_v11 = vld [vmem:[#allocation14_spill] sm:$0xff]  ;;  %v6524_v15 = vld [vmem:[#allocation24_spill] sm:$0xff] }
 0x15b   : > { %3492 = vmatprep.subr.mxu0 %v4909_v13  ;;  %3522 = vmatprep.subr.mxu1 %v6515_v7  ;;  %v6521_v7 = vld [vmem:[#allocation25_spill] sm:$0xff] }
 0x15c   : > { %3493 = vmatpush3.msra.mxu0 %v4816_v8  ;;  %3523 = vmatpush3.msra.mxu1 %v6517_v30 }
 0x15d   : > { %3494 = vmatprep.subr.mxu0 %v4906_v54  ;;  %3524 = vmatprep.subr.mxu1 %v6519_v56  ;;  %v5084_v21 = vpop.permute.xlu0 %321 }
 0x15e   : > { %3495 = vmatpush3.msra.mxu0 %v4887_v59  ;;  %3525 = vmatpush3.msra.mxu1 %v6520_v11  ;;  %6525 = vst [vmem:[#allocation21_spill] sm:$0xff] %v5084_v21  ;;  %v6526_v11 = vld [vmem:[#allocation18_spill] sm:$0xff]  ;;  %v5096_v21 = vpop.permute.xlu1 %367 }
 0x15f   : > { %3496 = vmatprep.subr.mxu0 %v4946_v50  ;;  %3526 = vmatprep.subr.mxu1 %v6521_v7 }
 0x160   : > { %511 = vmatprep.mubr.f32.mxu0 %v510_v19  ;;  %3497 = vmatpush3.msra.mxu0 %v4903_v6  ;;  %v6527_v19 = vld [vmem:[#allocation29_spill] sm:$0xff] }
 0x161   : > { %3527 = vmatpush3.msra.mxu1 %v6522_v20  ;;  %517 = vmatmul.mubr.f32.gmra.mxu0 %v516_v31  ;;  %v6528_v20 = vld [vmem:[#allocation9_spill] sm:$0xff]  ;;  %v6529_v31 = vld [vmem:[#allocation20_spill] sm:$0xff] }
 0x162   : > { %3498 = vmatprep.subr.mxu0 %v4943_v53  ;;  %3528 = vmatprep.subr.mxu1 %v6524_v15 }
 0x163   : > { %3499 = vmatpush3.msra.mxu0 %v4927_v0  ;;  %3529 = vmatpush3.msra.mxu1 %v6526_v11  ;;  %v6531_v11 = vand.u32 4294901760, %v4661_v48  ;;  %v6536_v48 = vand.u32 4294901760, %v4610_v29  ;;  %v6539_v29 = vand.u32 4294901760, %v4743_v41 }
 0x164   : > { %3500 = vmatprep.subr.mxu0 %v4971_v17  ;;  %3530 = vmatprep.subr.mxu1 %v6527_v19  ;;  %v5101_v19 = vpop.permute.xlu0 %319 }
 0x165   : > { %3501 = vmatpush3.msra.mxu0 %v4863_v42  ;;  %891 = vmatprep.mubr.f32.mxu0 %v6528_v20  ;;  %v6532_v42 = vand.u32 4294901760, %v4596_v25  ;;  %v5117_v25 = vpop.permute.xlu1 %365 }
 0x166   : > { %3531 = vmatpush3.msra.mxu1 %v6529_v31  ;;  %754 = vmatprep.mubr.f32.mxu1 %v5010_v46  ;;  %v6533_v31 = vld [vmem:[#allocation30_spill] sm:$0xff]  ;;  %v6534_v46 = vand.u32 4294901760, %v4700_v3 }
 0x167   : > { %894 = vmatmul.mubr.f32.vlgmr.msra.gmra.mxu0 %v6530_v60  ;;  %3532 = vmatprep.subr.mxu1 %v4889_v10  ;;  %v6535_v10 = vld [vmem:[#allocation26_spill] sm:$0xff] }
 0x168   : > { %3546 = vmatprep.subr.mxu0 %v6531_v11  ;;  %756 = vmatmul.mubr.f32.gmra.mxu1 %v5014_v61  ;;  %v6537_v11 = vand.u32 4294901760, %v4697_v2  ;;  %v5122_v3 = vpop.permute.xlu0 %317  ;;  %v6541_v2 = vand.u32 4294901760, %v4618_v32 }
 0x169   : > { %3533 = vmatpush3.msra.mxu1 %v4835_v36  ;;  %3547 = vmatpush3.msra.mxu0 %v6532_v42  ;;  %v6538_v42 = vand.u32 4294901760, %v4606_v28  ;;  %v6543_v28 = vand.u32 4294901760, %v4740_v4  ;;  %v5140_v41 = vpop.permute.xlu1 %363  ;;  %v6547_v4 = vand.u32 4294901760, %v4634_v38 }
 0x16a   : > { %3534 = vmatprep.subr.mxu1 %v6533_v31  ;;  %3548 = vmatprep.subr.mxu0 %v6534_v46  ;;  %v6540_v46 = vand.u32 4294901760, %v6528_v20  ;;  %v6545_v20 = vand.u32 4294901760, %v4780_v34  ;;  %v6550_v34 = vand.u32 4294901760, %v4658_v47 }
 0x16b   : > { %900 = vmatprep.mubr.f32.mxu0 %v5025_v14  ;;  %3535 = vmatpush3.msra.mxu1 %v6535_v10 }
 0x16c   : > { %3549 = vmatpush3.msra.mxu0 %v6536_v48  ;;  %3536 = vmatprep.subr.mxu1 %v4929_v63  ;;  %v6542_v48 = vand.u32 4294901760, %v6530_v60  ;;  %v5145_v32 = vpop.permute.xlu0 %315  ;;  %v6546_v60 = vand.u32 4294901760, %v5025_v14 }
 0x16d   : > { %903 = vmatmul.mubr.f32.gmra.mxu0 %v5032_v18  ;;  %3550 = vmatprep.subr.mxu0 %v6537_v11  ;;  %v6544_v11 = vand.u32 4294901760, %v4622_v33  ;;  %v6548_v33 = vand.u32 4294901760, %v4777_v9  ;;  %v5166_v38 = vpop.permute.xlu1 %361 }
 0x16e   : > { %3537 = vmatpush3.msra.mxu1 %v4882_v62  ;;  %3551 = vmatpush3.msra.mxu0 %v6538_v42  ;;  %v6566_v42 = vld [vmem:[#allocation22_spill] sm:$0xff] }
 0x16f   : > { %3538 = vmatprep.subr.mxu1 %v4960_v35  ;;  %3552 = vmatprep.subr.mxu0 %v6539_v29 }
 0x170   : > { %3539 = vmatpush3.msra.mxu1 %v4793_v51  ;;  %1007 = vmatprep.mubr.f32.mxu1 %v6540_v46  ;;  %v5171_v47 = vpop.permute.xlu0 %313  ;;  %v6568_v46 = vand.u32 4294901760, %v4816_v8 }
 0x171   : > { %3553 = vmatpush3.msra.mxu0 %v6541_v2  ;;  %1011 = vmatmul.mubr.f32.vlgmr.msra.gmra.mxu1 %v6542_v48  ;;  %v6569_v48 = vld [vmem:[#allocation33_spill] sm:$0xff] }
 0x172   : > { %3554 = vmatprep.subr.mxu0 %v6543_v28  ;;  %3584 = vmatprep.subr.mxu1 %v4641_v43  ;;  %v6551_v43 = vand.u32 4294901760, %v4822_v44  ;;  %v5222_v28 = vand.u32 4294901760, %v6569_v48 }
 0x173   : > { %3555 = vmatpush3.msra.mxu0 %v6544_v11  ;;  %3585 = vmatpush3.msra.mxu1 %v4586_v22  ;;  %v6549_v22 = vand.u32 4294901760, %v5032_v18  ;;  %v6570_v11 = vand.u32 4294901760, %v4906_v54 }
 0x174   : > { %3556 = vmatprep.subr.mxu0 %v6545_v20  ;;  %3586 = vmatprep.subr.mxu1 %v4684_v58  ;;  %v6552_v58 = vand.u32 4294901760, %v4678_v55  ;;  %v189_v55 = vld [vmem:[%s6270_s1 + $0x10] sm:$0xff] }
 0x175   : > { %1018 = vmatprep.mubr.f32.mxu1 %v6546_v60  ;;  %3557 = vmatpush3.msra.mxu0 %v6547_v4  ;;  %v5212_v29 = vand.u32 4294901760, %v189_v55  ;;  %v6574_v60 = vld [vmem:[#allocation14_spill] sm:$0xff]  ;;  %v6575_v4 = vld [vmem:[#allocation35_spill] sm:$0xff] }
 0x176   : > { %3587 = vmatpush3.msra.mxu1 %v4592_v24  ;;  %3558 = vmatprep.subr.mxu0 %v6548_v33  ;;  %v190_v24 = vld [vmem:[%s6270_s1 + $0x18] sm:$0xff]  ;;  %v6577_v33 = vand.u32 4294901760, %v4946_v50  ;;  %v5262_v50 = vsub.f32 %v6569_v48, %v5222_v28 }
 0x177   : > { %1022 = vmatmul.mubr.f32.gmra.mxu1 %v6549_v22  ;;  %3588 = vmatprep.subr.mxu1 %v4682_v57  ;;  %v6554_v57 = vand.u32 4294901760, %v4733_v45  ;;  %v5179_v9 = vand.u32 4294901760, %v190_v24  ;;  %v6559_v45 = vld [vmem:[#allocation19_spill] sm:$0xff]  ;;  %6567 = vst [vmem:[#allocation9_spill] sm:$0xff] %v5212_v29  ;;  %v5248_v22 = vsub.f32 %v189_v55, %v5212_v29  ;;  %v194_v55 = vld [vmem:[%s6270_s1 + $0x38] sm:$0xff] }
 0x178   : > { %3559 = vmatpush3.msra.mxu0 %v6550_v34  ;;  %3589 = vmatpush3.msra.mxu1 %v4589_v23  ;;  %v6553_v23 = vand.u32 4294901760, %v4819_v1  ;;  %v6560_v1 = vld [vmem:[#allocation31_spill] sm:$0xff]  ;;  %v6579_v34 = vld [vmem:[#allocation36_spill] sm:$0xff] }
 0x179   : > { %3560 = vmatprep.subr.mxu0 %v6551_v43  ;;  %3590 = vmatprep.subr.mxu1 %v4720_v39  ;;  %6555 = vst [vmem:[#allocation25_spill] sm:$0xff] %v5179_v9  ;;  %v6556_v39 = vand.u32 4294901760, %v4869_v12  ;;  %v5197_v44 = vand.u32 4294901760, %v6560_v1  ;;  %v6561_v12 = vld [vmem:[#allocation23_spill] sm:$0xff]  ;;  %v5205_v18 = vsub.f32 %v190_v24, %v5179_v9  ;;  %6578 = vst [vmem:[#allocation26_spill] sm:$0xff] %v5248_v22  ;;  %v5251_v43 = vand.u32 4294901760, %v6579_v34 }
 0x17a   : > { %3561 = vmatpush3.msra.mxu0 %v6552_v58  ;;  %3591 = vmatpush3.msra.mxu1 %v4599_v26  ;;  %v6557_v26 = vand.u32 4294901760, %v6510_v40  ;;  %v6562_v14 = vand.u32 4294901760, %v6561_v12  ;;  %v5207_v40 = vpop.permute.xlu0 %311  ;;  %v6581_v24 = vand.u32 4294901760, %v4903_v6  ;;  %v6582_v58 = vld [vmem:[#allocation15_spill] sm:$0xff]  ;;  %v6588_v12 = vld [vmem:[#allocation18_spill] sm:$0xff]  ;;  %v6593_v48 = vld [vmem:[#allocation12_spill] sm:$0xff] }
 0x17b   : > { %3562 = vmatprep.subr.mxu0 %v6553_v23  ;;  %3592 = vmatprep.subr.mxu1 %v4718_v37  ;;  %v5191_v37 = vand.u32 4294901760, %v4999_v16  ;;  %6564 = vst [vmem:[#allocation24_spill] sm:$0xff] %v5205_v18  ;;  %v5232_v8 = vsub.f32 %v6560_v1, %v5197_v44  ;;  %v6363_v54 = vand.u32 4294901760, %v5205_v18  ;;  %6580 = vst [vmem:[#allocation19_spill] sm:$0xff] %v5251_v43  ;;  %v6587_v1 = vand.u32 4294901760, %v4927_v0 }
 0x17c   : > { %3563 = vmatpush3.msra.mxu0 %v6554_v57  ;;  %3593 = vmatpush3.msra.mxu1 %v4602_v27  ;;  %v6558_v27 = vand.u32 4294901760, %v4866_v52  ;;  %v6565_v52 = vand.u32 4294901760, %v4909_v13  ;;  %v195_v13 = vld [vmem:[%s6270_s1 + $0x40] sm:$0xff]  ;;  %v6366_v0 = vand.u32 4294901760, %v5248_v22 }
 0x17d   : > { %3564 = vmatprep.subr.mxu0 %v6556_v39  ;;  %3594 = vmatprep.subr.mxu1 %v4765_v49  ;;  %v5199_v49 = vpop.permute.xlu1 %359  ;;  %v5219_v2 = vsub.f32 %v4999_v16, %v5191_v37  ;;  %v6573_v16 = vand.u32 4294901760, %v4887_v59  ;;  %v5258_v23 = vand.u32 4294901760, %v195_v13 }
 0x17e   : > { %3565 = vmatpush3.msra.mxu0 %v6557_v26  ;;  %3595 = vmatpush3.msra.mxu1 %v6511_v5  ;;  %v6563_v5 = vld [vmem:[#allocation11_spill] sm:$0xff]  ;;  %v5267_v39 = vpop.permute.xlu0 %309  ;;  %v6586_v26 = vand.u32 4294901760, %v4943_v53  ;;  %v5287_v53 = vsub.f32 %v5205_v18, %v6363_v54  ;;  %v5349_v54 = vand.u32 4294901760, %v5101_v19  ;;  %v5423_v18 = vand.u32 4294901760, %v5145_v32 }
 0x17f   : > { %3566 = vmatprep.subr.mxu0 %v6558_v27  ;;  %3596 = vmatprep.subr.mxu1 %v6559_v45  ;;  %6583 = vst [vmem:[#allocation31_spill] sm:$0xff] %v5258_v23  ;;  %v6364_v6 = vand.u32 4294901760, %v5219_v2  ;;  %v6365_v27 = vand.u32 4294901760, %v5232_v8 }
 0x180   : > { %3567 = vmatpush3.msra.mxu0 %v6562_v14  ;;  %3597 = vmatpush3.msra.mxu1 %v6563_v5  ;;  %v6589_v14 = vld [vmem:[#allocation10_spill] sm:$0xff]  ;;  %6605 = vst [vmem:[#allocation35_spill] sm:$0xff] %v5349_v54 }
 0x181   : > { %3568 = vmatprep.subr.mxu0 %v6565_v52  ;;  %3598 = vmatprep.subr.mxu1 %v6566_v42  ;;  %v5253_v59 = vpop.permute.xlu1 %357  ;;  %v5294_v5 = vand.u32 4294901760, %v6589_v14  ;;  %v6591_v52 = vand.u32 4294901760, %v4971_v17  ;;  %v6592_v42 = vld [vmem:[#allocation29_spill] sm:$0xff]  ;;  %v5313_v17 = vand.u32 4294901760, %v194_v55  ;;  %6614 = vst [vmem:[#allocation10_spill] sm:$0xff] %v5423_v18 }
 0x182   : > { %3569 = vmatpush3.msra.mxu0 %v6568_v46  ;;  %3599 = vmatpush3.msra.mxu1 %v6517_v30  ;;  %v6571_v30 = vld [vmem:[#allocation34_spill] sm:$0xff]  ;;  %v5302_v46 = vsub.f32 %v6579_v34, %v5251_v43 }
 0x183   : > { %3570 = vmatprep.subr.mxu0 %v6570_v11  ;;  %3600 = vmatprep.subr.mxu1 %v6519_v56  ;;  %v5235_v20 = vand.u32 4294901760, %v6571_v30  ;;  %v5242_v56 = vand.u32 4294901760, %v6575_v4  ;;  %6590 = vst [vmem:[#allocation11_spill] sm:$0xff] %v5294_v5  ;;  %v5305_v11 = vand.u32 4294901760, %v6593_v48  ;;  %6598 = vst [vmem:[#allocation33_spill] sm:$0xff] %v5313_v17 }
 0x184   : > { %3571 = vmatpush3.msra.mxu0 %v6573_v16  ;;  %3601 = vmatpush3.msra.mxu1 %v6574_v60  ;;  %v6597_v60 = vld [vmem:[#allocation8_spill] sm:$0xff] }
 0x185   : > { %6572 = vst [vmem:[#allocation16_spill] sm:$0xff] %v5235_v20  ;;  %6576 = vst [vmem:[#allocation30_spill] sm:$0xff] %v5242_v56  ;;  %3572 = vmatprep.subr.mxu0 %v6577_v33  ;;  %3602 = vmatprep.subr.mxu1 %v6521_v7  ;;  %v6584_v7 = vld [vmem:[#allocation17_spill] sm:$0xff]  ;;  %v5279_v45 = vsub.f32 %v6571_v30, %v5235_v20  ;;  %v6595_v30 = vld [vmem:[#allocation27_spill] sm:$0xff] }
 0x186   : > { %3573 = vmatpush3.msra.mxu0 %v6581_v24  ;;  %3603 = vmatpush3.msra.mxu1 %v6582_v58  ;;  %v5265_v57 = vand.u32 4294901760, %v6584_v7  ;;  %6594 = vst [vmem:[#allocation22_spill] sm:$0xff] %v5305_v11  ;;  %v6596_v16 = vand.u32 4294901760, %v6595_v30  ;;  %v6599_v24 = vld [vmem:[#allocation21_spill] sm:$0xff]  ;;  %v6601_v58 = vld [vmem:[#allocation20_spill] sm:$0xff]  ;;  %v5341_v30 = vsub.f32 %v5232_v8, %v6365_v27  ;;  %v5359_v27 = vsub.f32 %v5248_v22, %v6366_v0 }
 0x187   : > { %3574 = vmatprep.subr.mxu0 %v6586_v26  ;;  %3604 = vmatprep.subr.mxu1 %v6524_v15  ;;  %v5291_v15 = vsub.f32 %v6575_v4, %v5242_v56  ;;  %v5311_v4 = vsub.f32 %v195_v13, %v5258_v23  ;;  %v5320_v34 = vand.u32 4294901760, %v6599_v24  ;;  %v6602_v26 = vld [vmem:[#allocation13_spill] sm:$0xff]  ;;  %v6369_v13 = vand.u32 4294901760, %v5262_v50 }
 0x188   : > { %6585 = vst [vmem:[#allocation23_spill] sm:$0xff] %v5265_v57  ;;  %3575 = vmatpush3.msra.mxu0 %v6587_v1  ;;  %3605 = vmatpush3.msra.mxu1 %v6588_v12  ;;  %v5317_v33 = vsub.f32 %v6584_v7, %v5265_v57  ;;  %v5327_v1 = vsub.f32 %v5219_v2, %v6364_v6  ;;  %v5334_v7 = vpop.permute.xlu1 %355  ;;  %v5351_v6 = vpop.permute.xlu0 %307  ;;  %v5367_v12 = vand.u32 4294901760, %v5117_v25  ;;  %v5390_v22 = vand.u32 4294901760, %v5122_v3 }
 0x189   : > { %3576 = vmatprep.subr.mxu0 %v6591_v52  ;;  %3606 = vmatprep.subr.mxu1 %v6592_v42  ;;  %6600 = vst [vmem:[#allocation34_spill] sm:$0xff] %v5320_v34  ;;  %v5332_v52 = vand.u32 4294901760, %v5096_v21  ;;  %v6604_v42 = vld [vmem:[#allocation28_spill] sm:$0xff]  ;;  %v5376_v0 = vsub.f32 %v6599_v24, %v5320_v34  ;;  %v6609_v24 = vand.u32 4294901760, %v5279_v45 }
 0x18a   : > { %3577 = vmatpush3.msra.mxu0 %v6596_v16  ;;  %1188 = vmatprep.mubr.f32.mxu0 %v6597_v60  ;;  %6606 = vst [vmem:[#allocation36_spill] sm:$0xff] %v5367_v12  ;;  %v1563_v16 = vsub.f32 %v5262_v50, %v6369_v13  ;;  %6608 = vst [vmem:[#allocation15_spill] sm:$0xff] %v5390_v22  ;;  %v6616_v23 = vand.u32 4294901760, %v5317_v33 }
 0x18b   : > { %3607 = vmatpush3.msra.mxu1 %v6601_v58  ;;  %1190 = vmatmul.mubr.f32.vlgmr.msra.gmra.mxu0 %v6602_v26  ;;  %6603 = vst [vmem:[#allocation14_spill] sm:$0xff] %v5332_v52  ;;  %v5346_v58 = vsub.f32 %v6589_v14, %v5294_v5  ;;  %v5364_v14 = vsub.f32 %v6593_v48, %v5305_v11  ;;  %v1557_v48 = vand.u32 4294901760, %v5327_v1 }
 0x18c   : > { %3608 = vmatprep.subr.mxu1 %v6604_v42  ;;  %3622 = vmatprep.subr.mxu0 %v5191_v37  ;;  %v6607_v42 = vld [vmem:[#allocation32_spill] sm:$0xff]  ;;  %v1451_v1 = vsub.f32 %v5279_v45, %v6609_v24  ;;  %v6613_v24 = vand.u32 4294901760, %v5302_v46 }
 0x18d   : > { %3609 = vmatpush3.msra.mxu1 %v4835_v36  ;;  %3623 = vmatpush3.msra.mxu0 %v5197_v44  ;;  %v5372_v36 = vsub.f32 %v194_v55, %v5313_v17  ;;  %v5387_v55 = vsub.f32 %v5096_v21, %v5332_v52  ;;  %v5404_v21 = vand.u32 4294901760, %v5140_v41  ;;  %v5425_v17 = vpop.permute.xlu1 %353 }
 0x18e   : > { %3610 = vmatprep.subr.mxu1 %v6533_v31  ;;  %3624 = vmatprep.subr.mxu0 %v5222_v28  ;;  %v5401_v31 = vsub.f32 %v5101_v19, %v5349_v54  ;;  %v5416_v13 = vsub.f32 %v5302_v46, %v6613_v24  ;;  %v5420_v19 = vsub.f32 %v5117_v25, %v5367_v12  ;;  %v5432_v24 = vand.u32 4294901760, %v5166_v38 }
 0x18f   : > { %1195 = vmatprep.mubr.f32.mxu0 %v6607_v42  ;;  %3611 = vmatpush3.msra.mxu1 %v6535_v10  ;;  %v1445_v10 = vand.u32 4294901760, %v5341_v30  ;;  %6611 = vst [vmem:[#allocation18_spill] sm:$0xff] %v5404_v21  ;;  %v1564_v25 = vand.u32 4294901760, %v1563_v16  ;;  %v6618_v16 = vand.u32 4294901760, %v5346_v58 }
 0x190   : > { %3625 = vmatpush3.msra.mxu0 %v5235_v20  ;;  %3612 = vmatprep.subr.mxu1 %v4929_v63  ;;  %6610 = vst [vmem:[#allocation17_spill] sm:$0xff] %v5401_v31  ;;  %v6612_v63 = vand.u32 4294901760, %v5291_v15  ;;  %6615 = vst [vmem:[#allocation29_spill] sm:$0xff] %v5432_v24  ;;  %v5434_v20 = vpop.permute.xlu0 %305 }
 0x191   : > { %1197 = vmatmul.mubr.f32.gmra.mxu0 %v5014_v61  ;;  %3626 = vmatprep.subr.mxu0 %v5242_v56  ;;  %v5446_v56 = vand.u32 4294901760, %v5171_v47 }
 0x192   : > { %v5411_v30 = vsub.f32 %v5291_v15, %v6612_v63  ;;  %3613 = vmatpush3.msra.mxu1 %v4882_v62  ;;  %3627 = vmatpush3.msra.mxu0 %v5251_v43  ;;  %v1577_v62 = vsub.f32 %v5317_v33, %v6616_v23  ;;  %v5443_v43 = vsub.f32 %v5122_v3, %v5390_v22  ;;  %v1452_v63 = vand.u32 4294901760, %v1451_v1  ;;  %v5493_v23 = vpop.permute.xlu1 %351 }
 0x193   : > { %3614 = vmatprep.subr.mxu1 %v4960_v35  ;;  %3628 = vmatprep.subr.mxu0 %v5265_v57  ;;  %6617 = vst [vmem:[#allocation12_spill] sm:$0xff] %v5446_v56  ;;  %v1465_v57 = vsub.f32 %v5346_v58, %v6618_v16  ;;  %v5457_v3 = vsub.f32 %v5140_v41, %v5404_v21  ;;  %v6619_v16 = vand.u32 4294901760, %v5364_v14  ;;  %v6620_v35 = vand.u32 4294901760, %v5376_v0 }
 0x194   : > { %3615 = vmatpush3.msra.mxu1 %v4793_v51  ;;  %1299 = vmatprep.mubr.f32.mxu1 %v6597_v60  ;;  %v1571_v51 = vand.u32 4294901760, %v5411_v30  ;;  %v1459_v60 = vand.u32 4294901760, %v5416_v13  ;;  %v5465_v1 = vsub.f32 %v5145_v32, %v5423_v18  ;;  %v5479_v13 = vsub.f32 %v5166_v38, %v5432_v24 }
 0x195   : > { %3629 = vmatpush3.msra.mxu0 %v5294_v5  ;;  %1301 = vmatmul.mubr.f32.vlgmr.msra.gmra.mxu1 %v6602_v26  ;;  %v1584_v41 = vsub.f32 %v5364_v14, %v6619_v16  ;;  %v5475_v26 = vsub.f32 %v5376_v0, %v6620_v35  ;;  %v5482_v32 = vand.u32 4294901760, %v5199_v49  ;;  %v5488_v16 = vsub.f32 %v5171_v47, %v5446_v56 }
 0x196   : > { %3630 = vmatprep.subr.mxu0 %v5305_v11  ;;  %3660 = vmatprep.subr.mxu1 %v1557_v48  ;;  %v1578_v48 = vand.u32 4294901760, %v1577_v62  ;;  %v5491_v35 = vand.u32 4294901760, %v5207_v40  ;;  %v6623_v38 = vand.u32 4294901760, %v5387_v55  ;;  %v6624_v62 = vand.u32 4294901760, %v5401_v31  ;;  %v5505_v11 = vpop.permute.xlu0 %303 }
 0x197   : > { %6621 = vst [vmem:[#allocation27_spill] sm:$0xff] %v5482_v32  ;;  %3631 = vmatpush3.msra.mxu0 %v5320_v34  ;;  %3661 = vmatpush3.msra.mxu1 %v1445_v10  ;;  %v1466_v10 = vand.u32 4294901760, %v1465_v57  ;;  %v5503_v47 = vand.u32 4294901760, %v5253_v59  ;;  %v1585_v57 = vand.u32 4294901760, %v1584_v41  ;;  %v6629_v41 = vand.u32 4294901760, %v5443_v43 }
 0x198   : > { %6622 = vst [vmem:[#allocation8_spill] sm:$0xff] %v5491_v35  ;;  %3632 = vmatprep.subr.mxu0 %v5332_v52  ;;  %3662 = vmatprep.subr.mxu1 %v1564_v25  ;;  %v1591_v34 = vsub.f32 %v5387_v55, %v6623_v38  ;;  %v1479_v30 = vsub.f32 %v5401_v31, %v6624_v62  ;;  %v5512_v38 = vand.u32 4294901760, %v5267_v39  ;;  %v6627_v62 = vand.u32 4294901760, %v5420_v19 }
 0x199   : > { %6625 = vst [vmem:[#allocation21_spill] sm:$0xff] %v5503_v47  ;;  %1306 = vmatprep.mubr.f32.mxu1 %v6607_v42  ;;  %3633 = vmatpush3.msra.mxu0 %v5349_v54  ;;  %v1473_v31 = vand.u32 4294901760, %v5475_v26  ;;  %v5521_v42 = vsub.f32 %v5199_v49, %v5482_v32  ;;  %v5524_v25 = vand.u32 4294901760, %v5334_v7  ;;  %v1486_v52 = vsub.f32 %v5443_v43, %v6629_v41 }
 0x19a   : > { %6626 = vst [vmem:[#allocation20_spill] sm:$0xff] %v5512_v38  ;;  %3663 = vmatpush3.msra.mxu1 %v1452_v63  ;;  %3634 = vmatprep.subr.mxu0 %v5367_v12  ;;  %v1598_v5 = vsub.f32 %v5420_v19, %v6627_v62  ;;  %v5534_v26 = vsub.f32 %v5207_v40, %v5491_v35  ;;  %v1592_v49 = vand.u32 4294901760, %v1591_v34  ;;  %v1480_v12 = vand.u32 4294901760, %v1479_v30  ;;  %v350_v30 = vpop.permute.xlu1 %349 }
 0x19b   : > { %6628 = vst [vmem:[#allocation13_spill] sm:$0xff] %v5524_v25  ;;  %1308 = vmatmul.mubr.f32.gmra.mxu1 %v5014_v61  ;;  %3664 = vmatprep.subr.mxu1 %v1571_v51  ;;  %v5539_v61 = vsub.f32 %v5253_v59, %v5503_v47  ;;  %v5542_v51 = vand.u32 4294901760, %v5351_v6  ;;  %v6631_v41 = vand.u32 4294901760, %v5457_v3  ;;  %v6632_v62 = vand.u32 4294901760, %v5465_v1 }
 0x19c   : > { %3635 = vmatpush3.msra.mxu0 %v5390_v22  ;;  %3665 = vmatpush3.msra.mxu1 %v1459_v60  ;;  %v5553_v34 = vsub.f32 %v5267_v39, %v5512_v38  ;;  %v5556_v59 = vand.u32 4294901760, %v5425_v17  ;;  %v5561_v63 = vsub.f32 %v5334_v7, %v5524_v25  ;;  %v6633_v39 = vand.u32 4294901760, %v5479_v13 }
 0x19d   : > { %6630 = vst [vmem:[#allocation28_spill] sm:$0xff] %v5542_v51  ;;  %3636 = vmatprep.subr.mxu0 %v5404_v21  ;;  %3666 = vmatprep.subr.mxu1 %v1578_v48  ;;  %v1605_v40 = vsub.f32 %v5457_v3, %v6631_v41  ;;  %v1493_v60 = vsub.f32 %v5465_v1, %v6632_v62  ;;  %v1599_v48 = vand.u32 4294901760, %v1598_v5  ;;  %v5564_v41 = vand.u32 4294901760, %v5434_v20  ;;  %v302_v62 = vpop.permute.xlu0 %301 }
 0x19e   : > { %3637 = vmatpush3.msra.mxu0 %v5423_v18  ;;  %3667 = vmatpush3.msra.mxu1 %v1466_v10  ;;  %v1612_v21 = vsub.f32 %v5479_v13, %v6633_v39  ;;  %v1487_v18 = vand.u32 4294901760, %v1486_v52  ;;  %v6634_v5 = vand.u32 4294901760, %v5488_v16  ;;  %v5576_v54 = vand.u32 4294901760, %v5493_v23 }
 0x19f   : > { %3638 = vmatprep.subr.mxu0 %v5432_v24  ;;  %3668 = vmatprep.subr.mxu1 %v1585_v57  ;;  %v5581_v57 = vsub.f32 %v5351_v6, %v5542_v51  ;;  %v5584_v39 = vand.u32 4294901760, %v5505_v11  ;;  %v1606_v52 = vand.u32 4294901760, %v1605_v40  ;;  %v1494_v7 = vand.u32 4294901760, %v1493_v60  ;;  %v348_v6 = vpop.permute.xlu1 %347 }
 0x1a0   : > { %v1500_v10 = vsub.f32 %v5488_v16, %v6634_v5  ;;  %3639 = vmatpush3.msra.mxu0 %v5446_v56  ;;  %3669 = vmatpush3.msra.mxu1 %v1473_v31  ;;  %v5591_v56 = vsub.f32 %v5425_v17, %v5556_v59  ;;  %v5593_v31 = vand.u32 4294901760, %v350_v30  ;;  %v1613_v40 = vand.u32 4294901760, %v1612_v21 }
 0x1a1   : > { %3640 = vmatprep.subr.mxu0 %v5482_v32  ;;  %3670 = vmatprep.subr.mxu1 %v1592_v49  ;;  %v5598_v32 = vsub.f32 %v5434_v20, %v5564_v41  ;;  %v300_v49 = vpop.permute.xlu0 %299  ;;  %v6635_v60 = vand.u32 4294901760, %v5521_v42  ;;  %v5610_v20 = vsub.f32 %v5493_v23, %v5576_v54  ;;  %v5612_v24 = vand.u32 4294901760, %v302_v62 }
 0x1a2   : > { %3641 = vmatpush3.msra.mxu0 %v5491_v35  ;;  %3671 = vmatpush3.msra.mxu1 %v1480_v12  ;;  %v1501_v5 = vand.u32 4294901760, %v1500_v10  ;;  %v6636_v35 = vand.u32 4294901760, %v5534_v26  ;;  %v5621_v10 = vand.u32 4294901760, %v348_v6 }
 0x1a3   : > { %3642 = vmatprep.subr.mxu0 %v5503_v47  ;;  %3672 = vmatprep.subr.mxu1 %v1599_v48  ;;  %v1619_v17 = vsub.f32 %v5521_v42, %v6635_v60  ;;  %v5618_v48 = vsub.f32 %v5505_v11, %v5584_v39  ;;  %v6640_v60 = vand.u32 4294901760, %v5553_v34  ;;  %v5633_v11 = vand.u32 4294901760, %v300_v49 }
 0x1a4   : > { %v1507_v12 = vsub.f32 %v5534_v26, %v6636_v35  ;;  %3643 = vmatpush3.msra.mxu0 %v5512_v38  ;;  %3673 = vmatpush3.msra.mxu1 %v1487_v18  ;;  %6638 = vst [vmem:[#allocation37_spill] sm:$0xff] %v5621_v10  ;;  %v6639_v35 = vand.u32 4294901760, %v5539_v61  ;;  %v5630_v18 = vsub.f32 %v350_v30, %v5593_v31  ;;  %v6418_v30 = vand.u32 4294901760, %v5311_v4 }
 0x1a5   : > { %6637 = vst [vmem:[#allocation32_spill] sm:$0xff] %v5618_v48  ;;  %3644 = vmatprep.subr.mxu0 %v5524_v25  ;;  %3674 = vmatprep.subr.mxu1 %v1606_v52  ;;  %v1514_v22 = vsub.f32 %v5553_v34, %v6640_v60  ;;  %6641 = vst [vmem:[#allocation38_spill] sm:$0xff] %v5633_v11  ;;  %v6642_v25 = vand.u32 4294901760, %v5561_v63 }
 0x1a6   : > { %v1626_v23 = vsub.f32 %v5539_v61, %v6639_v35  ;;  %3645 = vmatpush3.msra.mxu0 %v5542_v51  ;;  %3675 = vmatpush3.msra.mxu1 %v1494_v7  ;;  %v1620_v35 = vand.u32 4294901760, %v1619_v17  ;;  %v1508_v38 = vand.u32 4294901760, %v1507_v12  ;;  %v5643_v51 = vsub.f32 %v302_v62, %v5612_v24 }
 0x1a7   : > { %3646 = vmatprep.subr.mxu0 %v5556_v59  ;;  %3676 = vmatprep.subr.mxu1 %v1613_v40  ;;  %v1633_v60 = vsub.f32 %v5561_v63, %v6642_v25  ;;  %v6643_v40 = vand.u32 4294901760, %v5581_v57  ;;  %v5653_v25 = vsub.f32 %v348_v6, %v5621_v10  ;;  %v1515_v12 = vand.u32 4294901760, %v1514_v22 }
 0x1a8   : > { %3647 = vmatpush3.msra.mxu0 %v5564_v41  ;;  %3677 = vmatpush3.msra.mxu1 %v1501_v5  ;;  %v1627_v62 = vand.u32 4294901760, %v1626_v23  ;;  %v5658_v7 = vsub.f32 %v300_v49, %v5633_v11  ;;  %v6646_v6 = vand.u32 4294901760, %v5598_v32  ;;  %v1419_v23 = vand.u32 4294901760, %v5359_v27 }
 0x1a9   : > { %v1521_v17 = vsub.f32 %v5581_v57, %v6643_v40  ;;  %3648 = vmatprep.subr.mxu0 %v5576_v54  ;;  %3678 = vmatprep.subr.mxu1 %v1620_v35  ;;  %v6645_v40 = vand.u32 4294901760, %v5591_v56  ;;  %v1634_v22 = vand.u32 4294901760, %v1633_v60  ;;  %v1427_v49 = vsub.f32 %v5311_v4, %v6418_v30 }
 0x1aa   : > { %6644 = vst [vmem:[#allocation39_spill] sm:$0xff] %v5658_v7  ;;  %3649 = vmatpush3.msra.mxu0 %v5584_v39  ;;  %3679 = vmatpush3.msra.mxu1 %v1508_v38  ;;  %v1528_v52 = vsub.f32 %v5598_v32, %v6646_v6  ;;  %v6647_v35 = vand.u32 4294901760, %v5610_v20  ;;  %v6648_v5 = vand.u32 4294901760, %v5618_v48  ;;  %v6651_v38 = vand.u32 4294901760, %v5630_v18 }
 0x1ab   : > { %v1640_v21 = vsub.f32 %v5591_v56, %v6645_v40  ;;  %3650 = vmatprep.subr.mxu0 %v5593_v31  ;;  %3680 = vmatprep.subr.mxu1 %v1627_v62  ;;  %v1522_v6 = vand.u32 4294901760, %v1521_v17  ;;  %v6649_v62 = vand.u32 4294901760, %v5372_v36 }
 0x1ac   : > { %3651 = vmatpush3.msra.mxu0 %v5612_v24  ;;  %3681 = vmatpush3.msra.mxu1 %v1515_v12  ;;  %v1647_v40 = vsub.f32 %v5610_v20, %v6647_v35  ;;  %v1535_v60 = vsub.f32 %v5618_v48, %v6648_v5  ;;  %v6650_v35 = vand.u32 4294901760, %v5287_v53  ;;  %v1654_v5 = vsub.f32 %v5630_v18, %v6651_v38 }
 0x1ad   : > { %3652 = vmatprep.subr.mxu0 %v5621_v10  ;;  %3682 = vmatprep.subr.mxu1 %v1634_v22  ;;  %v1433_v30 = vsub.f32 %v5372_v36, %v6649_v62  ;;  %v1641_v17 = vand.u32 4294901760, %v1640_v21  ;;  %v1529_v27 = vand.u32 4294901760, %v1528_v52  ;;  %v1428_v22 = vand.u32 4294901760, %v1427_v49 }
 0x1ae   : > { %3653 = vmatpush3.msra.mxu0 %v5633_v11  ;;  %1414 = vmatprep.mubr.f32.mxu0 %v6650_v35  ;;  %v6652_v10 = vand.u32 4294901760, %v5643_v51  ;;  %v1648_v12 = vand.u32 4294901760, %v1647_v40  ;;  %v1536_v11 = vand.u32 4294901760, %v1535_v60  ;;  %v6653_v21 = vand.u32 4294901760, %v5653_v25  ;;  %v6657_v60 = vld [vmem:[#allocation16_spill] sm:$0xff]  ;;  %v6660_v35 = vld [vmem:[#allocation19_spill] sm:$0xff] }
 0x1af   : > { %3683 = vmatpush3.msra.mxu1 %v1522_v6  ;;  %1420 = vmatmul.mubr.f32.vlgmr.msra.gmra.mxu0 %v1419_v23  ;;  %v1434_v53 = vand.u32 4294901760, %v1433_v30  ;;  %v6654_v23 = vand.u32 4294901760, %v5658_v7  ;;  %v6656_v6 = vld [vmem:[#allocation17_spill] sm:$0xff] }
 0x1b0   : > { %v1542_v62 = vsub.f32 %v5643_v51, %v6652_v10  ;;  %3684 = vmatprep.subr.mxu1 %v1641_v17  ;;  %3698 = vmatprep.subr.mxu0 %v5219_v2  ;;  %v1661_v52 = vsub.f32 %v5653_v25, %v6653_v21  ;;  %v1655_v10 = vand.u32 4294901760, %v1654_v5  ;;  %v6661_v17 = vld [vmem:[#allocation23_spill] sm:$0xff] }
 0x1b1   : > { %3685 = vmatpush3.msra.mxu1 %v1529_v27  ;;  %3699 = vmatpush3.msra.mxu0 %v5232_v8  ;;  %v1549_v49 = vsub.f32 %v5658_v7, %v6654_v23  ;;  %v6658_v27 = vld [vmem:[#allocation33_spill] sm:$0xff]  ;;  %v6662_v5 = vld [vmem:[#allocation11_spill] sm:$0xff] }
 0x1b2   : > { %3686 = vmatprep.subr.mxu1 %v1648_v12  ;;  %3700 = vmatprep.subr.mxu0 %v5262_v50  ;;  %v1543_v38 = vand.u32 4294901760, %v1542_v62  ;;  %v1662_v30 = vand.u32 4294901760, %v1661_v52  ;;  %v6659_v12 = vld [vmem:[#allocation30_spill] sm:$0xff]  ;;  %v6666_v21 = vld [vmem:[#allocation35_spill] sm:$0xff]  ;;  %v6667_v52 = vld [vmem:[#allocation36_spill] sm:$0xff] }
 0x1b3   : > { %1429 = vmatprep.mubr.f32.mxu0 %v1428_v22  ;;  %3687 = vmatpush3.msra.mxu1 %v1536_v11  ;;  %v1550_v40 = vand.u32 4294901760, %v1549_v49  ;;  %v6655_v11 = vld [vmem:[#allocation31_spill] sm:$0xff]  ;;  %v6663_v22 = vld [vmem:[#allocation22_spill] sm:$0xff] }
 0x1b4   : > { %3701 = vmatpush3.msra.mxu0 %v5279_v45  ;;  %3688 = vmatprep.subr.mxu1 %v1655_v10  ;;  %v6664_v62 = vld [vmem:[#allocation34_spill] sm:$0xff]  ;;  %v6668_v23 = vld [vmem:[#allocation15_spill] sm:$0xff] }
 0x1b5   : > { %1435 = vmatmul.mubr.f32.gmra.mxu0 %v1434_v53  ;;  %3702 = vmatprep.subr.mxu0 %v5291_v15  ;;  %v6665_v53 = vld [vmem:[#allocation14_spill] sm:$0xff] }
 0x1b6   : > { %3689 = vmatpush3.msra.mxu1 %v1543_v38  ;;  %3703 = vmatpush3.msra.mxu0 %v5302_v46  ;;  %v6669_v49 = vld [vmem:[#allocation18_spill] sm:$0xff]  ;;  %v6671_v38 = vld [vmem:[#allocation29_spill] sm:$0xff] }
 0x1b7   : > { %3690 = vmatprep.subr.mxu1 %v1662_v30  ;;  %3704 = vmatprep.subr.mxu0 %v5317_v33  ;;  %v6670_v10 = vld [vmem:[#allocation10_spill] sm:$0xff]  ;;  %v6672_v30 = vld [vmem:[#allocation12_spill] sm:$0xff] }
 0x1b8   : > { %3691 = vmatpush3.msra.mxu1 %v1550_v40  ;;  %1665 = vmatprep.mubr.f32.mxu1 %v5179_v9  ;;  %v6673_v40 = vld [vmem:[#allocation27_spill] sm:$0xff]  ;;  %v6677_v9 = vld [vmem:[#allocation24_spill] sm:$0xff] }
 0x1b9   : > { %3705 = vmatpush3.msra.mxu0 %v5346_v58  ;;  %1667 = vmatmul.mubr.f32.vlgmr.msra.gmra.mxu1 %v5212_v29  ;;  %v6676_v29 = vld [vmem:[#allocation13_spill] sm:$0xff] }
 0x1ba   : > { %3706 = vmatprep.subr.mxu0 %v5364_v14  ;;  %3736 = vmatprep.subr.mxu1 %v5191_v37 }
 0x1bb   : > { %3707 = vmatpush3.msra.mxu0 %v5376_v0  ;;  %3737 = vmatpush3.msra.mxu1 %v5197_v44 }
 0x1bc   : > { %3708 = vmatprep.subr.mxu0 %v5387_v55  ;;  %3738 = vmatprep.subr.mxu1 %v5222_v28 }
 0x1bd   : > { %1672 = vmatprep.mubr.f32.mxu1 %v6655_v11  ;;  %3709 = vmatpush3.msra.mxu0 %v6656_v6  ;;  %v6675_v11 = vld [vmem:[#allocation20_spill] sm:$0xff] }
 0x1be   : > { %3739 = vmatpush3.msra.mxu1 %v6657_v60  ;;  %3710 = vmatprep.subr.mxu0 %v5420_v19 }
 0x1bf   : > { %1674 = vmatmul.mubr.f32.gmra.mxu1 %v6658_v27  ;;  %3740 = vmatprep.subr.mxu1 %v6659_v12  ;;  %v6674_v27 = vld [vmem:[#allocation8_spill] sm:$0xff] }
 0x1c0   : > { %3711 = vmatpush3.msra.mxu0 %v5443_v43  ;;  %3741 = vmatpush3.msra.mxu1 %v6660_v35 }
 0x1c1   : > { %3712 = vmatprep.subr.mxu0 %v5457_v3  ;;  %3742 = vmatprep.subr.mxu1 %v6661_v17 }
 0x1c2   : > { %3713 = vmatpush3.msra.mxu0 %v5465_v1  ;;  %3743 = vmatpush3.msra.mxu1 %v6662_v5 }
 0x1c3   : > { %3714 = vmatprep.subr.mxu0 %v5479_v13  ;;  %3744 = vmatprep.subr.mxu1 %v6663_v22 }
 0x1c4   : > { %3715 = vmatpush3.msra.mxu0 %v5488_v16  ;;  %3745 = vmatpush3.msra.mxu1 %v6664_v62 }
 0x1c5   : > { %3716 = vmatprep.subr.mxu0 %v5521_v42  ;;  %3746 = vmatprep.subr.mxu1 %v6665_v53 }
 0x1c6   : > { %3717 = vmatpush3.msra.mxu0 %v5534_v26  ;;  %3747 = vmatpush3.msra.mxu1 %v6666_v21 }
 0x1c7   : > { %3718 = vmatprep.subr.mxu0 %v5539_v61  ;;  %3748 = vmatprep.subr.mxu1 %v6667_v52 }
 0x1c8   : > { %3719 = vmatpush3.msra.mxu0 %v5553_v34  ;;  %3749 = vmatpush3.msra.mxu1 %v6668_v23 }
 0x1c9   : > { %3720 = vmatprep.subr.mxu0 %v5561_v63  ;;  %3750 = vmatprep.subr.mxu1 %v6669_v49 }
 0x1ca   : > { %3721 = vmatpush3.msra.mxu0 %v5581_v57  ;;  %3751 = vmatpush3.msra.mxu1 %v6670_v10 }
 0x1cb   : > { %3722 = vmatprep.subr.mxu0 %v5591_v56  ;;  %3752 = vmatprep.subr.mxu1 %v6671_v38 }
 0x1cc   : > { %3723 = vmatpush3.msra.mxu0 %v5598_v32  ;;  %3753 = vmatpush3.msra.mxu1 %v6672_v30 }
 0x1cd   : > { %3724 = vmatprep.subr.mxu0 %v5610_v20  ;;  %3754 = vmatprep.subr.mxu1 %v6673_v40  ;;  %v6678_v40 = vld [vmem:[#allocation28_spill] sm:$0xff] }
 0x1ce   : > { %3725 = vmatpush3.msra.mxu0 %v5618_v48  ;;  %3755 = vmatpush3.msra.mxu1 %v6674_v27  ;;  %v6679_v48 = vld [vmem:[#allocation26_spill] sm:$0xff] }
 0x1cf   : > { %3726 = vmatprep.subr.mxu0 %v5630_v18  ;;  %3756 = vmatprep.subr.mxu1 %v5503_v47  ;;  %v6680_v47 = vand.u32 4294901760, %v5219_v2  ;;  %v6684_v2 = vand.u32 4294901760, %v5291_v15  ;;  %v6691_v15 = vand.u32 4294901760, %v6679_v48 }
 0x1d0   : > { %3727 = vmatpush3.msra.mxu0 %v5643_v51  ;;  %3757 = vmatpush3.msra.mxu1 %v6675_v11  ;;  %v6681_v11 = vand.u32 4294901760, %v5232_v8  ;;  %v6685_v8 = vand.u32 4294901760, %v5302_v46  ;;  %v6693_v46 = vand.u32 4294901760, %v5376_v0  ;;  %v6698_v0 = vand.u32 4294901760, %v5372_v36 }
 0x1d1   : > { %3728 = vmatprep.subr.mxu0 %v5653_v25  ;;  %3758 = vmatprep.subr.mxu1 %v6676_v29 }
 0x1d2   : > { %3729 = vmatpush3.msra.mxu0 %v5658_v7  ;;  %1809 = vmatprep.mubr.f32.mxu0 %v6677_v9  ;;  %v6682_v7 = vand.u32 4294901760, %v5262_v50  ;;  %v6686_v50 = vld [vmem:[#allocation37_spill] sm:$0xff] }
 0x1d3   : > { %3759 = vmatpush3.msra.mxu1 %v6678_v40  ;;  %1812 = vmatmul.mubr.f32.vlgmr.msra.gmra.mxu0 %v6679_v48  ;;  %v6683_v40 = vand.u32 4294901760, %v5279_v45  ;;  %v6689_v45 = vand.u32 4294901760, %v6677_v9  ;;  %v6695_v9 = vand.u32 4294901760, %v5311_v4  ;;  %v6719_v48 = vld [vmem:[#allocation20_spill] sm:$0xff] }
 0x1d4   : > { %3760 = vmatprep.subr.mxu1 %v5556_v59  ;;  %3774 = vmatprep.subr.mxu0 %v6680_v47  ;;  %v6687_v47 = vand.u32 4294901760, %v5317_v33  ;;  %v6694_v33 = vand.u32 4294901760, %v5387_v55  ;;  %v6705_v55 = vand.u32 4294901760, %v5534_v26  ;;  %v6713_v26 = vld [vmem:[#allocation27_spill] sm:$0xff] }
 0x1d5   : > { %3761 = vmatpush3.msra.mxu1 %v5564_v41  ;;  %3775 = vmatpush3.msra.mxu0 %v6681_v11  ;;  %v6690_v11 = vand.u32 4294901760, %v5346_v58  ;;  %v6696_v58 = vand.u32 4294901760, %v6656_v6  ;;  %v6721_v6 = vld [vmem:[#allocation39_spill] sm:$0xff] }
 0x1d6   : > { %3762 = vmatprep.subr.mxu1 %v5576_v54  ;;  %3776 = vmatprep.subr.mxu0 %v6682_v7  ;;  %v6688_v7 = vld [vmem:[#allocation38_spill] sm:$0xff] }
 0x1d7   : > { %1818 = vmatprep.mubr.f32.mxu0 %v5311_v4  ;;  %3763 = vmatpush3.msra.mxu1 %v5584_v39  ;;  %v6701_v4 = vand.u32 4294901760, %v5465_v1  ;;  %v6708_v1 = vand.u32 4294901760, %v5561_v63  ;;  %v6712_v63 = vand.u32 4294901760, %v5610_v20  ;;  %v6720_v20 = vand.u32 4294901760, %v5653_v25 }
 0x1d8   : > { %3777 = vmatpush3.msra.mxu0 %v6683_v40  ;;  %3764 = vmatprep.subr.mxu1 %v5593_v31  ;;  %v6692_v40 = vand.u32 4294901760, %v5364_v14  ;;  %v6702_v14 = vand.u32 4294901760, %v5479_v13  ;;  %v6709_v13 = vand.u32 4294901760, %v5581_v57  ;;  %v6717_v57 = vld [vmem:[#allocation21_spill] sm:$0xff]  ;;  %v4263_v25 = vmov 0  }
 0x1d9   : > { %1821 = vmatmul.mubr.f32.gmra.mxu0 %v5372_v36  ;;  %3778 = vmatprep.subr.mxu0 %v6684_v2  ;;  %v6704_v36 = vand.u32 4294901760, %v5521_v42  ;;  %v6711_v42 = vand.u32 4294901760, %v5598_v32  ;;  %v6718_v32 = vand.u32 4294901760, %v5643_v51  ;;  %v6726_v51 = vld [vmem:[#allocation31_spill] sm:$0xff] }
 0x1da   : > { %3765 = vmatpush3.msra.mxu1 %v5612_v24  ;;  %3779 = vmatpush3.msra.mxu0 %v6685_v8 }
 0x1db   : > { %3766 = vmatprep.subr.mxu1 %v6686_v50  ;;  %3780 = vmatprep.subr.mxu0 %v6687_v47  ;;  %v199_v47 = vld [vmem:[%s6271_s2 + $0x10] sm:$0xff] }
 0x1dc   : > { %3767 = vmatpush3.msra.mxu1 %v6688_v7  ;;  %1925 = vmatprep.mubr.f32.mxu1 %v6689_v45 }
 0x1dd   : > { %3781 = vmatpush3.msra.mxu0 %v6690_v11  ;;  %1929 = vmatmul.mubr.f32.vlgmr.msra.gmra.mxu1 %v6691_v15 }
 0x1de   : > { %3782 = vmatprep.subr.mxu0 %v6692_v40  ;;  %3812 = vmatprep.subr.mxu1 %v5191_v37  ;;  %v6697_v37 = vand.u32 4294901760, %v5420_v19  ;;  %v6706_v19 = vand.u32 4294901760, %v5539_v61  ;;  %v6714_v61 = vld [vmem:[#allocation32_spill] sm:$0xff]  ;;  %v5966_v40 = vand.u32 4294901760, %v199_v47 }
 0x1df   : > { %3783 = vmatpush3.msra.mxu0 %v6693_v46  ;;  %3813 = vmatpush3.msra.mxu1 %v5197_v44  ;;  %v6699_v44 = vand.u32 4294901760, %v5443_v43  ;;  %v6703_v43 = vand.u32 4294901760, %v5488_v16  ;;  %v6710_v16 = vand.u32 4294901760, %v5591_v56  ;;  %v6716_v56 = vand.u32 4294901760, %v5630_v18  ;;  %v6725_v18 = vld [vmem:[#allocation9_spill] sm:$0xff]  ;;  %v198_v46 = vld [vmem:[%s6271_s2 + $0x8] sm:$0xff] }
 0x1e0   : > { %3784 = vmatprep.subr.mxu0 %v6694_v33  ;;  %3814 = vmatprep.subr.mxu1 %v5222_v28  ;;  %v6700_v28 = vand.u32 4294901760, %v5457_v3  ;;  %v6707_v3 = vand.u32 4294901760, %v5553_v34  ;;  %v6715_v34 = vand.u32 4294901760, %v6714_v61 }
 0x1e1   : > { %1936 = vmatprep.mubr.f32.mxu1 %v6695_v9  ;;  %3785 = vmatpush3.msra.mxu0 %v6696_v58  ;;  %v5975_v58 = vand.u32 4294901760, %v198_v46 }
 0x1e2   : > { %3815 = vmatpush3.msra.mxu1 %v6657_v60  ;;  %3786 = vmatprep.subr.mxu0 %v6697_v37  ;;  %v6722_v60 = vand.u32 4294901760, %v6721_v6 }
 0x1e3   : > { %1940 = vmatmul.mubr.f32.gmra.mxu1 %v6698_v0  ;;  %3816 = vmatprep.subr.mxu1 %v6659_v12  ;;  %v6723_v12 = vld [vmem:[#allocation25_spill] sm:$0xff]  ;;  %v5981_v0 = vsub.f32 %v199_v47, %v5966_v40 }
 0x1e4   : > { %3787 = vmatpush3.msra.mxu0 %v6699_v44  ;;  %3817 = vmatpush3.msra.mxu1 %v6660_v35  ;;  %v6727_v35 = vld [vmem:[#allocation33_spill] sm:$0xff] }
 0x1e5   : > { %3788 = vmatprep.subr.mxu0 %v6700_v28  ;;  %3818 = vmatprep.subr.mxu1 %v6661_v17  ;;  %v202_v17 = vld [vmem:[%s6271_s2 + $0x28] sm:$0xff]  ;;  %v197_v44 = vld [vmem:[%s6271_s2] sm:$0xff] }
 0x1e6   : > { %3789 = vmatpush3.msra.mxu0 %v6701_v4  ;;  %3819 = vmatpush3.msra.mxu1 %v6662_v5  ;;  %v5990_v4 = vsub.f32 %v198_v46, %v5975_v58  ;;  %v4267_v46 = vmov 7  }
 0x1e7   : > { %3790 = vmatprep.subr.mxu0 %v6702_v14  ;;  %3820 = vmatprep.subr.mxu1 %v6663_v22  ;;  %v5992_v14 = vand.u32 4294901760, %v197_v44 }
 0x1e8   : > { %3791 = vmatpush3.msra.mxu0 %v6703_v43  ;;  %3821 = vmatpush3.msra.mxu1 %v6664_v62  ;;  %v5921_v62 = vand.u32 4294901760, %v202_v17  ;;  %6734 = vst [vmem:[#allocation22_spill] sm:$0xff] %v5990_v4 }
 0x1e9   : > { %3792 = vmatprep.subr.mxu0 %v6704_v36  ;;  %3822 = vmatprep.subr.mxu1 %v6665_v53  ;;  %v201_v53 = vld [vmem:[%s6271_s2 + $0x20] sm:$0xff]  ;;  %v5996_v36 = vand.u32 4294901760, %v5981_v0 }
 0x1ea   : > { %3793 = vmatpush3.msra.mxu0 %v6705_v55  ;;  %3823 = vmatpush3.msra.mxu1 %v6666_v21 }
 0x1eb   : > { %3794 = vmatprep.subr.mxu0 %v6706_v19  ;;  %3824 = vmatprep.subr.mxu1 %v6667_v52  ;;  %6735 = vst [vmem:[#allocation34_spill] sm:$0xff] %v5996_v36  ;;  %v6000_v19 = vand.u32 4294901760, %v5990_v4 }
 0x1ec   : > { %3795 = vmatpush3.msra.mxu0 %v6707_v3  ;;  %3825 = vmatpush3.msra.mxu1 %v6668_v23  ;;  %v5934_v23 = vsub.f32 %v202_v17, %v5921_v62  ;;  %v6003_v3 = vsub.f32 %v197_v44, %v5992_v14  ;;  %v4264_v17 = vmov 3  }
 0x1ed   : > { %3796 = vmatprep.subr.mxu0 %v6708_v1  ;;  %3826 = vmatprep.subr.mxu1 %v6669_v49  ;;  %v5937_v49 = vand.u32 4294901760, %v201_v53  ;;  %6736 = vst [vmem:[#allocation14_spill] sm:$0xff] %v6000_v19  ;;  %v2410_v1 = vsub.f32 %v5981_v0, %v5996_v36 }
 0x1ee   : > { %3797 = vmatpush3.msra.mxu0 %v6709_v13  ;;  %3827 = vmatpush3.msra.mxu1 %v6670_v10  ;;  %v200_v10 = vld [vmem:[%s6271_s2 + $0x18] sm:$0xff]  ;;  %v5946_v2 = vand.u32 4294901760, %v5934_v23  ;;  %6737 = vst [vmem:[#allocation35_spill] sm:$0xff] %v6003_v3  ;;  %v2417_v13 = vsub.f32 %v5990_v4, %v6000_v19 }
 0x1ef   : > { %3798 = vmatprep.subr.mxu0 %v6710_v16  ;;  %3828 = vmatprep.subr.mxu1 %v6671_v38  ;;  %v5948_v8 = vand.u32 4294901760, %v200_v10  ;;  %v6012_v16 = vand.u32 4294901760, %v6003_v3 }
 0x1f0   : > { %3799 = vmatpush3.msra.mxu0 %v6711_v42  ;;  %3829 = vmatpush3.msra.mxu1 %v6672_v30  ;;  %6731 = vst [vmem:[#allocation19_spill] sm:$0xff] %v5946_v2  ;;  %v2389_v45 = vsub.f32 %v5934_v23, %v5946_v2  ;;  %v2411_v42 = vand.u32 4294901760, %v2410_v1  ;;  %v4269_v1 = vmov 6  }
 0x1f1   : > { %3800 = vmatprep.subr.mxu0 %v6712_v63  ;;  %3830 = vmatprep.subr.mxu1 %v6713_v26  ;;  %v5960_v11 = vsub.f32 %v200_v10, %v5948_v8  ;;  %6738 = vst [vmem:[#allocation36_spill] sm:$0xff] %v6012_v16  ;;  %v2418_v63 = vand.u32 4294901760, %v2417_v13  ;;  %v2424_v26 = vsub.f32 %v6003_v3, %v6012_v16 }
 0x1f2   : > { %3801 = vmatpush3.msra.mxu0 %v6715_v34  ;;  %3831 = vmatpush3.msra.mxu1 %v6674_v27  ;;  %v6724_v27 = vld [vmem:[#allocation28_spill] sm:$0xff]  ;;  %v2390_v33 = vand.u32 4294901760, %v2389_v45 }
 0x1f3   : > { %3802 = vmatprep.subr.mxu0 %v6716_v56  ;;  %3832 = vmatprep.subr.mxu1 %v6717_v57  ;;  %v5973_v9 = vand.u32 4294901760, %v5960_v11  ;;  %v2425_v61 = vand.u32 4294901760, %v2424_v26 }
 0x1f4   : > { %3803 = vmatpush3.msra.mxu0 %v6718_v32  ;;  %3833 = vmatpush3.msra.mxu1 %v6719_v48 }
 0x1f5   : > { %3804 = vmatprep.subr.mxu0 %v6720_v20  ;;  %3834 = vmatprep.subr.mxu1 %v6676_v29  ;;  %v5878_v29 = vld [vmem:[%s6270_s1 + $0x20] sm:$0xff]  ;;  %6733 = vst [vmem:[#allocation11_spill] sm:$0xff] %v5973_v9  ;;  %v2403_v28 = vsub.f32 %v5960_v11, %v5973_v9 }
 0x1f6   : > { %3805 = vmatpush3.msra.mxu0 %v6722_v60  ;;  %2106 = vmatprep.mubr.f32.mxu0 %v6723_v12 }
 0x1f7   : > { %3835 = vmatpush3.msra.mxu1 %v6724_v27  ;;  %2108 = vmatmul.mubr.f32.vlgmr.msra.gmra.mxu0 %v6725_v18  ;;  %v2404_v55 = vand.u32 4294901760, %v2403_v28  ;;  %v4268_v28 = vmov 8  }
 0x1f8   : > { %3836 = vmatprep.subr.mxu1 %v5556_v59  ;;  %2113 = vmatprep.mubr.f32.mxu0 %v6726_v51  ;;  %v5886_v59 = vld [vmem:[%s6270_s1 + $0x48] sm:$0xff] }
 0x1f9   : > { %3837 = vmatpush3.msra.mxu1 %v5564_v41  ;;  %2217 = vmatprep.mubr.f32.mxu1 %v6723_v12  ;;  %6728 = vst [vmem:[#allocation17_spill] sm:$0xff] %v5886_v59 }
 0x1fa   : > { %3838 = vmatprep.subr.mxu1 %v5576_v54  ;;  %4112 = vset.pattern.permute.xlu1 %v4263_v25  ;;  %v204_v54 = vld [vmem:[%s6271_s2 + $0x38] sm:$0xff] }
 0x1fb   : > { %3839 = vmatpush3.msra.mxu1 %v5584_v39  ;;  %2115 = vmatmul.mubr.f32.gmra.mxu0 %v6727_v35  ;;  %v5900_v41 = vand.u32 4294901760, %v204_v54 }
 0x1fc   : > { %3840 = vmatprep.subr.mxu1 %v5593_v31  ;;  %2233 = vperm.xlu1 %4112, %v5878_v29  }
 0x1fd   : > { %3841 = vmatpush3.msra.mxu1 %v5612_v24  ;;  %4113 = vset.pattern.permute.xlu0 %v4263_v25  ;;  %v203_v24 = vld [vmem:[%s6271_s2 + $0x30] sm:$0xff]  ;;  %v5906_v39 = vsub.f32 %v204_v54, %v5900_v41 }
 0x1fe   : > { %3842 = vmatprep.subr.mxu1 %v6686_v50  ;;  %2238 = vperm.xlu0 %4113, %v5886_v59   ;;  %v5908_v31 = vand.u32 4294901760, %v203_v24  ;;  %v5951_v50 = vsub.f32 %v201_v53, %v5937_v49  ;;  %v4265_v53 = vmov 4  }
 0x1ff   : > { %3843 = vmatpush3.msra.mxu1 %v6688_v7  ;;  %3910 = vmatprep.subr.mxu0 %v5900_v41  ;;  %v5916_v5 = vand.u32 4294901760, %v5906_v39 }
 0x200   : > { %2219 = vmatmul.mubr.f32.vlgmr.msra.gmra.mxu1 %v6725_v18  ;;  %3911 = vmatpush3.msra.mxu0 %v5900_v41  ;;  %v5919_v22 = vsub.f32 %v203_v24, %v5908_v31  ;;  %v5964_v15 = vand.u32 4294901760, %v5951_v50 }
 0x201   : > { %2224 = vmatprep.mubr.f32.mxu1 %v6726_v51  ;;  %6729 = vst [vmem:[#allocation16_spill] sm:$0xff] %v5916_v5  ;;  %3912 = vmatprep.subr.mxu0 %v5908_v31  ;;  %v2375_v21 = vsub.f32 %v5906_v39, %v5916_v5 }
 0x202   : > { %3913 = vmatpush3.msra.mxu0 %v5908_v31  ;;  %v5931_v52 = vand.u32 4294901760, %v5919_v22  ;;  %6732 = vst [vmem:[#allocation23_spill] sm:$0xff] %v5964_v15  ;;  %v2396_v37 = vsub.f32 %v5951_v50, %v5964_v15  ;;  %4114 = vset.pattern.permute.xlu1 %v4264_v17 }
 0x203   : > { %3914 = vmatprep.subr.mxu0 %v5921_v62  ;;  %v2376_v38 = vand.u32 4294901760, %v2375_v21  ;;  %4115 = vset.pattern.permute.xlu0 %v4265_v53 }
 0x204   : > { %2226 = vmatmul.mubr.f32.gmra.mxu1 %v6727_v35  ;;  %6730 = vst [vmem:[#allocation30_spill] sm:$0xff] %v5931_v52  ;;  %3915 = vmatpush3.msra.mxu0 %v5921_v62  ;;  %v2382_v30 = vsub.f32 %v5919_v22, %v5931_v52  ;;  %v2397_v43 = vand.u32 4294901760, %v2396_v37  ;;  %v3426_v34 = vpop.f32.mrf.mxu0 }
 0x205   : > { %3916 = vmatprep.subr.mxu0 %v5937_v49  ;;  %3929 = vmatprep.subr.mxu1 %v2376_v38 }
 0x206   : > { %v2383_v7 = vand.u32 4294901760, %v2382_v30  ;;  %3917 = vmatpush3.msra.mxu0 %v5937_v49  ;;  %3930 = vmatpush3.msra.mxu1 %v2376_v38  ;;  %v3427_v56 = vpop.f32.mrf.mxu0  ;;  %v4266_v30 = vmov 5  }
 0x207   : > { %3918 = vmatprep.subr.mxu0 %v5948_v8  ;;  %2869 = vperm.xlu1 %4114, %v5878_v29  }
 0x208   : > { %3931 = vmatprep.subr.mxu1 %v2383_v7  ;;  %3919 = vmatpush3.msra.mxu0 %v5948_v8 }
 0x209   : > { %3932 = vmatpush3.msra.mxu1 %v2383_v7  ;;  %3920 = vmatprep.subr.mxu0 %v5966_v40 }
 0x20a   : > { %3933 = vmatprep.subr.mxu1 %v2390_v33  ;;  %3921 = vmatpush3.msra.mxu0 %v5966_v40 }
 0x20b   : > { %3934 = vmatpush3.msra.mxu1 %v2390_v33  ;;  %3922 = vmatprep.subr.mxu0 %v5975_v58 }
 0x20c   : > { %3923 = vmatpush3.msra.mxu0 %v5975_v58  ;;  %3935 = vmatprep.subr.mxu1 %v2397_v43 }
 0x20d   : > { %3924 = vmatprep.subr.mxu0 %v5992_v14  ;;  %3936 = vmatpush3.msra.mxu1 %v2397_v43  ;;  %v3464_v48 = vpop.f32.mrf.mxu1 }
 0x20e   : > { %3925 = vmatpush3.msra.mxu0 %v5992_v14  ;;  %3937 = vmatprep.subr.mxu1 %v2404_v55 }
 0x20f   : > { %3948 = vmatprep.subr.mxu0 %v5906_v39  ;;  %3938 = vmatpush3.msra.mxu1 %v2404_v55  ;;  %v3465_v6 = vpop.f32.mrf.mxu1 }
 0x210   : > { %3939 = vmatprep.subr.mxu1 %v2411_v42  ;;  %2889 = vperm.xlu0 %4115, %v5878_v29   ;;  %v3466_v17 = vadd.f32 %v3465_v6, %v3464_v48 }
 0x211   : > { %3940 = vmatpush3.msra.mxu1 %v2411_v42  ;;  %2873 = vperm.xlu1 %4114, %v5886_v59  }
 0x212   : > { %3941 = vmatprep.subr.mxu1 %v2418_v63 }
 0x213   : > { %3942 = vmatpush3.msra.mxu1 %v2418_v63 }
 0x214   : > { %3943 = vmatprep.subr.mxu1 %v2425_v61  ;;  %4118 = vset.pattern.permute.xlu0 %v4266_v30 }
 0x215   : > { %3944 = vmatpush3.msra.mxu1 %v2425_v61  ;;  %2913 = vperm.xlu0 %4118, %v5886_v59  }
 0x216   : > { %3967 = vmatprep.subr.mxu1 %v5900_v41  ;;  %4116 = vset.pattern.permute.xlu1 %v4265_v53 }
 0x217   : > { %2893 = vperm.xlu1 %4116, %v5886_v59  }
 0x219   : > { %4120 = vset.pattern.permute.xlu0 %v4267_v46 }
 0x21a   : > { %2949 = vperm.xlu0 %4120, %v5878_v29  }
 0x21b   : > { %4117 = vset.pattern.permute.xlu1 %v4266_v30  ;;  %v3428_v30 = vadd.f32 %v3427_v56, %v3426_v34 }
 0x21c   : > { %2909 = vperm.xlu1 %4117, %v5878_v29  }
 0x21e   : > { %4123 = vset.pattern.permute.xlu0 %v4268_v28 }
 0x21f   : > { %2973 = vperm.xlu0 %4123, %v5886_v59  }
 0x220   : > { %4119 = vset.pattern.permute.xlu1 %v4269_v1  ;;  %v751_v1 = vadd.f32 %v3466_v17, %v3428_v30 }
 0x221   : > { %v3429_v57 = vpop.f32.mrf.mxu0  ;;  %2929 = vperm.xlu1 %4119, %v5878_v29  }
 0x223   : > { %v3430_v32 = vpop.f32.mrf.mxu0 }
 0x224   : > { %v3431_v16 = vadd.f32 %v3430_v32, %v3429_v57 }
 0x225   : > { %2933 = vperm.xlu1 %4119, %v5886_v59  }
 0x227   : > { %v3502_v20 = vpop.f32.mrf.mxu0 }
 0x228   : > { %v3467_v60 = vpop.f32.mrf.mxu1 }
 0x229   : > { %v3503_v12 = vpop.f32.mrf.mxu0  ;;  %4121 = vset.pattern.permute.xlu1 %v4267_v46 }
 0x22a   : > { %v3468_v27 = vpop.f32.mrf.mxu1  ;;  %2953 = vperm.xlu1 %4121, %v5886_v59   ;;  %v3504_v19 = vadd.f32 %v3503_v12, %v3502_v20 }
 0x22b   : > { %v3469_v36 = vadd.f32 %v3468_v27, %v3467_v60 }
 0x22c   : > { %v896_v5 = vadd.f32 %v3504_v19, %v751_v1 }
 0x22d   : > { %v6019_v18 = vpop.f32.mrf.mxu0  ;;  %v758_v3 = vadd.f32 %v3469_v36, %v3431_v16 }
 0x22e   : > { %4122 = vset.pattern.permute.xlu1 %v4268_v28 }
 0x22f   : > { %v3506_v25 = vpop.f32.mrf.mxu0  ;;  %2969 = vperm.xlu1 %4122, %v5878_v29  }
 0x230   : > { %v3507_v46 = vadd.f32 %v3506_v25, %v6019_v18 }
 0x231   : > { %v3540_v51 = vpop.f32.mrf.mxu1 }
 0x232   : > { %v905_v57 = vadd.f32 %v3507_v46, %v758_v3 }
 0x233   : > { %v3541_v35 = vpop.f32.mrf.mxu1 }
 0x234   : > { %v3542_v15 = vadd.f32 %v3541_v35, %v3540_v51 }
 0x236   : > { %v1013_v6 = vadd.f32 %v3542_v15, %v896_v5 }
 0x237   : > { %v3543_v24 = vpop.f32.mrf.mxu1 }
 0x239   : > { %v3544_v10 = vpop.f32.mrf.mxu1 }
 0x23a   : > { %v3545_v4 = vadd.f32 %v3544_v10, %v3543_v24 }
 0x23c   : > { %v1024_v27 = vadd.f32 %v3545_v4, %v905_v57 }
 0x24b   : > { %v3578_v54 = vpop.f32.mrf.mxu0 }
 0x24d   : > { %v3579_v21 = vpop.f32.mrf.mxu0 }
 0x24e   : > { %v3580_v48 = vadd.f32 %v3579_v21, %v3578_v54 }
 0x250   : > { %v1192_v32 = vadd.f32 %v3580_v48, %v1013_v6 }
 0x251   : > { %v3581_v38 = vpop.f32.mrf.mxu0 }
 0x253   : > { %v3582_v7 = vpop.f32.mrf.mxu0 }
 0x254   : > { %v3583_v20 = vadd.f32 %v3582_v7, %v3581_v38 }
 0x255   : > { %v3616_v47 = vpop.f32.mrf.mxu1 }
 0x256   : > { %v1199_v36 = vadd.f32 %v3583_v20, %v1024_v27 }
 0x257   : > { %v3617_v45 = vpop.f32.mrf.mxu1 }
 0x258   : > { %v3618_v59 = vadd.f32 %v3617_v45, %v3616_v47 }
 0x25a   : > { %v1303_v51 = vadd.f32 %v3618_v59, %v1192_v32 }
 0x25b   : > { %v3619_v37 = vpop.f32.mrf.mxu1 }
 0x25d   : > { %v3620_v43 = vpop.f32.mrf.mxu1 }
 0x25e   : > { %v3621_v35 = vadd.f32 %v3620_v43, %v3619_v37 }
 0x260   : > { %v1310_v15 = vadd.f32 %v3621_v35, %v1199_v36 }
 0x26f   : > { %v3654_v33 = vpop.f32.mrf.mxu0 }
 0x271   : > { %v3655_v44 = vpop.f32.mrf.mxu0 }
 0x272   : > { %v3656_v60 = vadd.f32 %v3655_v44, %v3654_v33 }
 0x274   : > { %v1422_v16 = vadd.f32 %v3656_v60, %v1303_v51 }
 0x275   : > { %v3657_v55 = vpop.f32.mrf.mxu0 }
 0x277   : > { %v3658_v42 = vpop.f32.mrf.mxu0 }
 0x278   : > { %v3659_v18 = vadd.f32 %v3658_v42, %v3657_v55 }
 0x279   : > { %v3692_v13 = vpop.f32.mrf.mxu1 }
 0x27a   : > { %v1437_v10 = vadd.f32 %v3659_v18, %v1310_v15 }
 0x27b   : > { %v3693_v63 = vpop.f32.mrf.mxu1 }
 0x27c   : > { %v3694_v28 = vadd.f32 %v3693_v63, %v3692_v13 }
 0x27e   : > { %v1669_v54 = vadd.f32 %v3694_v28, %v1422_v16 }
 0x27f   : > { %v3695_v61 = vpop.f32.mrf.mxu1 }
 0x281   : > { %v3696_v9 = vpop.f32.mrf.mxu1 }
 0x282   : > { %v3697_v24 = vadd.f32 %v3696_v9, %v3695_v61 }
 0x284   : > { %v1676_v45 = vadd.f32 %v3697_v24, %v1437_v10  ;;  %v4275_v10 = vmov 14  }
 0x293   : > { %v3730_v26 = vpop.f32.mrf.mxu0 }
 0x295   : > { %v3731_v53 = vpop.f32.mrf.mxu0 }
 0x296   : > { %v3732_v25 = vadd.f32 %v3731_v53, %v3730_v26  ;;  %v2234_v26 = vpop.permute.xlu1 %2233 }
 0x298   : > { %v1814_v38 = vadd.f32 %v3732_v25, %v1669_v54 }
 0x299   : > { %v3733_v2 = vpop.f32.mrf.mxu0 }
 0x29b   : > { %v3734_v34 = vpop.f32.mrf.mxu0 }
 0x29c   : > { %v3735_v47 = vadd.f32 %v3734_v34, %v3733_v2  ;;  %v2239_v2 = vpop.permute.xlu0 %2238 }
 0x29d   : > { %v3768_v52 = vpop.f32.mrf.mxu1 }
 0x29e   : > { %v1823_v43 = vadd.f32 %v3735_v47, %v1676_v45 }
 0x29f   : > { %v3769_v56 = vpop.f32.mrf.mxu1 }
 0x2a0   : > { %v3770_v21 = vadd.f32 %v3769_v56, %v3768_v52 }
 0x2a2   : > { %v1931_v33 = vadd.f32 %v3770_v21, %v1814_v38  ;;  %v4273_v21 = vmov 12  }
 0x2a3   : > { %v3771_v19 = vpop.f32.mrf.mxu1 }
 0x2a5   : > { %v3772_v3 = vpop.f32.mrf.mxu1 }
 0x2a6   : > { %v3773_v37 = vadd.f32 %v3772_v3, %v3771_v19  ;;  %v4274_v3 = vmov 13  }
 0x2a8   : > { %v1942_v53 = vadd.f32 %v3773_v37, %v1823_v43 }
 0x2b7   : > { %v3806_v12 = vpop.f32.mrf.mxu0 }
 0x2b9   : > { %v3807_v17 = vpop.f32.mrf.mxu0 }
 0x2ba   : > { %v3808_v7 = vadd.f32 %v3807_v17, %v3806_v12 }
 0x2bb   : > { %v3809_v5 = vpop.f32.mrf.mxu0 }
 0x2bc   : > { %v2110_v13 = vadd.f32 %v3808_v7, %v1931_v33 }
 0x2bd   : > { %v3810_v4 = vpop.f32.mrf.mxu0 }
 0x2be   : > { %v3811_v55 = vadd.f32 %v3810_v4, %v3809_v5 }
 0x2c0   : > { %v3844_v59 = vpop.f32.mrf.mxu1  ;;  %v2117_v61 = vadd.f32 %v3811_v55, %v1942_v53 }
 0x2c2   : > { %v3845_v44 = vpop.f32.mrf.mxu1 }
 0x2c3   : > { %v3846_v42 = vadd.f32 %v3845_v44, %v3844_v59 }
 0x2c4   : > { %v3847_v63 = vpop.f32.mrf.mxu1 }
 0x2c5   : > { %v2221_v9 = vadd.f32 %v3846_v42, %v2110_v13 }
 0x2c6   : > { %v3848_v52 = vpop.f32.mrf.mxu1 }
 0x2c7   : > { %v2241_v30 = vadd.f32 %v2234_v26, %v2221_v9  ;;  %v3849_v1 = vadd.f32 %v3848_v52, %v3847_v63 }
 0x2c9   : > { %v2245_v46 = vmin.f32 %v2241_v30, 0.0  ;;  %v2228_v48 = vadd.f32 %v3849_v1, %v2117_v61  ;;  %vm2243_vm1 = vcmp.gt.f32.partialorder %v2241_v30, 0.0 }
 0x2cb   : > { %v2247_v6 = vmul.f32 1.442695, %v2245_v46  ;;  %v2242_v34 = vadd.f32 %v2239_v2, %v2228_v48  ;;  %v4277_v46 = vmov 16   ;;  %v4278_v48 = vmov 15  }
 0x2cd   : > { %4142 = vpow2.f32 %v2247_v6  ;;  %v2246_v56 = vmin.f32 %v2242_v34, 0.0  ;;  %vm2244_vm2 = vcmp.gt.f32.partialorder %v2242_v34, 0.0  ;;  %v4279_v6 = vmov 17  }
 0x2cf   : > { %v2249_v57 = vmul.f32 1.442695, %v2246_v56  ;;  %v4281_v56 = vmov 2  }
 0x2d1   : > { %4144 = vpow2.f32 %v2249_v57  ;;  %v2870_v57 = vpop.permute.xlu1 %2869 }
 0x2da   : > { %v4143_v32 = vpop.eup %4142 }
 0x2db   : > { %v3384_v20 = vadd.f32 -1.0, %v4143_v32  ;;  %v2874_v32 = vpop.permute.xlu1 %2873 }
 0x2dd   : > { %v2253_v60 = vsel %vm2243_vm1, %v2241_v30, %v3384_v20 }
 0x2de   : > { %v4145_v12 = vpop.eup %4144  ;;  %v2257_v27 = vsel %vm2255_vm0, %v2253_v60, 0 }
 0x2df   : > { %v6035_v51 = vand.u32 4294901760, %v2257_v27  ;;  %v3385_v35 = vadd.f32 -1.0, %v4145_v12  ;;  %v2894_v20 = vpop.permute.xlu1 %2893 }
 0x2e1   : > { %v2336_v28 = vsub.f32 %v2257_v27, %v6035_v51  ;;  %v2254_v17 = vsel %vm2244_vm2, %v2242_v34, %v3385_v35  ;;  %3945 = vmatprep.mubr.f32.mxu1 %v6035_v51  ;;  %v4280_v34 = vmov 1   ;;  %v2890_v35 = vpop.permute.xlu0 %2889 }
 0x2e2   : > { %v2260_v19 = vsel %vm2255_vm0, %v2254_v17, 0 }
 0x2e3   : > { %v6040_v36 = vand.u32 4294901760, %v2260_v19  ;;  %v2337_v16 = vand.u32 4294901760, %v2336_v28  ;;  %v2910_v60 = vpop.permute.xlu1 %2909 }
 0x2e5   : > { %v2346_v18 = vsub.f32 %v2260_v19, %v6040_v36  ;;  %3946 = vmatmul.mubr.f32.vlgmr.msra.gmra.mxu1 %v6040_v36  ;;  %v2338_v25 = vsub.f32 %v2336_v28, %v2337_v16  ;;  %v2914_v17 = vpop.permute.xlu0 %2913 }
 0x2e6   : > { %3968 = vmatpush3.msra.mxu1 %v5900_v41  ;;  %3983 = vmatprep.mubr.f32.mxu1 %v2337_v16 }
 0x2e7   : > { %v2347_v5 = vand.u32 4294901760, %v2346_v18  ;;  %3969 = vmatprep.subr.mxu1 %v5908_v31  ;;  %v2339_v15 = vand.u32 4294901760, %v2338_v25  ;;  %v2930_v12 = vpop.permute.xlu1 %2929 }
 0x2e8   : > { %3970 = vmatpush3.msra.mxu1 %v5908_v31 }
 0x2e9   : > { %v2348_v54 = vsub.f32 %v2346_v18, %v2347_v5  ;;  %3971 = vmatprep.subr.mxu1 %v5921_v62  ;;  %3926 = vmatprep.mubr.f32.mxu0 %v2339_v15 }
 0x2ea   : > { %3972 = vmatpush3.msra.mxu1 %v5921_v62 }
 0x2eb   : > { %3973 = vmatprep.subr.mxu1 %v5937_v49  ;;  %v2349_v24 = vand.u32 4294901760, %v2348_v54  ;;  %v2934_v27 = vpop.permute.xlu1 %2933 }
 0x2ec   : > { %3974 = vmatpush3.msra.mxu1 %v5937_v49 }
 0x2ed   : > { %3975 = vmatprep.subr.mxu1 %v5948_v8  ;;  %3927 = vmatmul.mubr.f32.vlgmr.msra.gmra.mxu0 %v2349_v24 }
 0x2ee   : > { %3949 = vmatpush3.msra.mxu0 %v5906_v39  ;;  %3976 = vmatpush3.msra.mxu1 %v5948_v8  ;;  %v6739_v39 = vld [vmem:[#allocation22_spill] sm:$0xff] }
 0x2ef   : > { %3950 = vmatprep.subr.mxu0 %v5919_v22  ;;  %3964 = vmatprep.mubr.f32.mxu0 %v2336_v28 }
 0x2f0   : > { %3977 = vmatprep.subr.mxu1 %v5966_v40  ;;  %3951 = vmatpush3.msra.mxu0 %v5919_v22  ;;  %v6740_v22 = vld [vmem:[#allocation35_spill] sm:$0xff] }
 0x2f1   : > { %3978 = vmatpush3.msra.mxu1 %v5966_v40  ;;  %3952 = vmatprep.subr.mxu0 %v5934_v23 }
 0x2f2   : > { %3979 = vmatprep.subr.mxu1 %v5975_v58  ;;  %3953 = vmatpush3.msra.mxu0 %v5934_v23  ;;  %v6744_v23 = vld [vmem:[#allocation23_spill] sm:$0xff] }
 0x2f3   : > { %3980 = vmatpush3.msra.mxu1 %v5975_v58  ;;  %3954 = vmatprep.subr.mxu0 %v5951_v50 }
 0x2f4   : > { %3981 = vmatprep.subr.mxu1 %v5992_v14  ;;  %3955 = vmatpush3.msra.mxu0 %v5951_v50  ;;  %v6747_v50 = vld [vmem:[#allocation14_spill] sm:$0xff] }
 0x2f5   : > { %3982 = vmatpush3.msra.mxu1 %v5992_v14  ;;  %3956 = vmatprep.subr.mxu0 %v5960_v11 }
 0x2f6   : > { %3984 = vmatmul.mubr.f32.vlgmr.msra.gmra.mxu1 %v2347_v5  ;;  %4005 = vmatprep.subr.mxu1 %v5900_v41 }
 0x2f7   : > { %3957 = vmatpush3.msra.mxu0 %v5960_v11  ;;  %4006 = vmatpush3.msra.mxu1 %v5900_v41  ;;  %v6741_v41 = vld [vmem:[#allocation16_spill] sm:$0xff] }
 0x2f8   : > { %4021 = vmatprep.mubr.f32.mxu1 %v6035_v51  ;;  %3958 = vmatprep.subr.mxu0 %v5981_v0  ;;  %v6748_v11 = vld [vmem:[#allocation36_spill] sm:$0xff] }
 0x2f9   : > { %4007 = vmatprep.subr.mxu1 %v5908_v31  ;;  %3959 = vmatpush3.msra.mxu0 %v5981_v0  ;;  %v4271_v0 = vmov 10  }
 0x2fa   : > { %4008 = vmatpush3.msra.mxu1 %v5908_v31  ;;  %3960 = vmatprep.subr.mxu0 %v6739_v39  ;;  %v6742_v31 = vld [vmem:[#allocation30_spill] sm:$0xff] }
 0x2fb   : > { %4009 = vmatprep.subr.mxu1 %v5921_v62  ;;  %3961 = vmatpush3.msra.mxu0 %v6739_v39 }
 0x2fc   : > { %4010 = vmatpush3.msra.mxu1 %v5921_v62  ;;  %3962 = vmatprep.subr.mxu0 %v6740_v22  ;;  %v6743_v62 = vld [vmem:[#allocation19_spill] sm:$0xff] }
 0x2fd   : > { %4011 = vmatprep.subr.mxu1 %v5937_v49  ;;  %3963 = vmatpush3.msra.mxu0 %v6740_v22 }
 0x2fe   : > { %4012 = vmatpush3.msra.mxu1 %v5937_v49  ;;  %3965 = vmatmul.mubr.f32.vlgmr.msra.gmra.mxu0 %v2346_v18  ;;  %v6745_v49 = vld [vmem:[#allocation11_spill] sm:$0xff] }
 0x2ff   : > { %3986 = vmatprep.subr.mxu0 %v6741_v41  ;;  %4013 = vmatprep.subr.mxu1 %v5948_v8 }
 0x300   : > { %3987 = vmatpush3.msra.mxu0 %v6741_v41  ;;  %4002 = vmatprep.mubr.f32.mxu0 %v6035_v51  ;;  %v2954_v51 = vpop.permute.xlu1 %2953 }
 0x301   : > { %4014 = vmatpush3.msra.mxu1 %v5948_v8  ;;  %3988 = vmatprep.subr.mxu0 %v6742_v31  ;;  %v6746_v8 = vld [vmem:[#allocation34_spill] sm:$0xff] }
 0x302   : > { %4015 = vmatprep.subr.mxu1 %v5966_v40  ;;  %3989 = vmatpush3.msra.mxu0 %v6742_v31 }
 0x303   : > { %4016 = vmatpush3.msra.mxu1 %v5966_v40  ;;  %3990 = vmatprep.subr.mxu0 %v6743_v62  ;;  %v4270_v40 = vmov 9  }
 0x304   : > { %4017 = vmatprep.subr.mxu1 %v5975_v58  ;;  %3991 = vmatpush3.msra.mxu0 %v6743_v62  ;;  %v6132_v28 = vpop.permute.xlu1 %2969 }
 0x305   : > { %4018 = vmatpush3.msra.mxu1 %v5975_v58  ;;  %3992 = vmatprep.subr.mxu0 %v6744_v23  ;;  %v6749_v58 = vld [vmem:[#allocation17_spill] sm:$0xff] }
 0x306   : > { %4019 = vmatprep.subr.mxu1 %v5992_v14  ;;  %3993 = vmatpush3.msra.mxu0 %v6744_v23 }
 0x307   : > { %4020 = vmatpush3.msra.mxu1 %v5992_v14  ;;  %3994 = vmatprep.subr.mxu0 %v6745_v49  ;;  %v4272_v14 = vmov 11  }
 0x308   : > { %4022 = vmatmul.mubr.f32.vlgmr.msra.gmra.mxu1 %v6040_v36  ;;  %3995 = vmatpush3.msra.mxu0 %v6745_v49 }
 0x309   : > { %3996 = vmatprep.subr.mxu0 %v6746_v8  ;;  %4124 = vset.pattern.permute.xlu1 %v4270_v40 }
 0x30a   : > { %3997 = vmatpush3.msra.mxu0 %v6746_v8  ;;  %2989 = vperm.xlu1 %4124, %v5878_v29  }
 0x30b   : > { %3998 = vmatprep.subr.mxu0 %v6747_v50  ;;  %4125 = vset.pattern.permute.xlu0 %v4271_v0 }
 0x30c   : > { %3999 = vmatpush3.msra.mxu0 %v6747_v50  ;;  %3009 = vperm.xlu0 %4125, %v5878_v29  }
 0x30d   : > { %4000 = vmatprep.subr.mxu0 %v6748_v11 }
 0x30e   : > { %4001 = vmatpush3.msra.mxu0 %v6748_v11  ;;  %2993 = vperm.xlu1 %4124, %v6749_v58  }
 0x30f   : > { %4003 = vmatmul.mubr.f32.vlgmr.msra.gmra.mxu0 %v6040_v36  ;;  %v2950_v36 = vpop.permute.xlu0 %2949 }
 0x310   : > { %4128 = vset.pattern.permute.xlu0 %v4272_v14 }
 0x311   : > { %3033 = vperm.xlu0 %4128, %v6749_v58  }
 0x312   : > { %4126 = vset.pattern.permute.xlu1 %v4271_v0 }
 0x313   : > { %3013 = vperm.xlu1 %4126, %v6749_v58   ;;  %v2974_v16 = vpop.permute.xlu0 %2973 }
 0x315   : > { %4130 = vset.pattern.permute.xlu0 %v4274_v3 }
 0x316   : > { %3069 = vperm.xlu0 %4130, %v5878_v29  }
 0x317   : > { %4127 = vset.pattern.permute.xlu1 %v4272_v14 }
 0x318   : > { %3029 = vperm.xlu1 %4127, %v5878_v29  }
 0x31a   : > { %4133 = vset.pattern.permute.xlu0 %v4275_v10 }
 0x31c   : > { %4129 = vset.pattern.permute.xlu1 %v4273_v21 }
 0x31d   : > { %3049 = vperm.xlu1 %4129, %v5878_v29  }
 0x321   : > { %3053 = vperm.xlu1 %4129, %v6749_v58  }
 0x325   : > { %4131 = vset.pattern.permute.xlu1 %v4274_v3 }
 0x326   : > { %3073 = vperm.xlu1 %4131, %v6749_v58  }
 0x32a   : > { %4132 = vset.pattern.permute.xlu1 %v4275_v10 }
 0x385   : > { %v6134_v19 = vpop.permute.xlu1 %2989 }
 0x387   : > { %v6136_v25 = vpop.permute.xlu0 %3009 }
 0x38c   : > { %v3034_v15 = vpop.permute.xlu0 %3033 }
 0x391   : > { %v6142_v24 = vpop.permute.xlu0 %3069 }
 0x3a5   : > { %v3947_v47 = vpop.f32.mrf.mxu1 }
 0x3a7   : > { %v2462_v59 = vpop.f32.mrf.mxu1 }
 0x3ad   : > { %v3928_v38 = vpop.f32.mrf.mxu0 }
 0x3ae   : > { %v2469_v45 = vadd.f32 %v3947_v47, %v3928_v38 }
 0x3af   : > { %v2341_v7 = vpop.f32.mrf.mxu0 }
 0x3b0   : > { %v2463_v44 = vadd.f32 %v2462_v59, %v2341_v7 }
 0x3b6   : > { %v3985_v33 = vpop.f32.mrf.mxu1 }
 0x3b8   : > { %v2644_v55 = vpop.f32.mrf.mxu1 }
 0x3be   : > { %v3966_v4 = vpop.f32.mrf.mxu0 }
 0x3bf   : > { %v2564_v43 = vadd.f32 %v3966_v4, %v2469_v45 }
 0x3c0   : > { %v2556_v37 = vpop.f32.mrf.mxu0 }
 0x3c1   : > { %v2557_v13 = vadd.f32 %v2556_v37, %v2463_v44  ;;  %v2653_v42 = vadd.f32 %v3985_v33, %v2564_v43 }
 0x3c3   : > { %v2645_v9 = vadd.f32 %v2644_v55, %v2557_v13 }
 0x3c8   : > { %v4023_v63 = vpop.f32.mrf.mxu1 }
 0x3ca   : > { %v2832_v1 = vpop.f32.mrf.mxu1 }
 0x3cf   : > { %v4004_v26 = vpop.f32.mrf.mxu0 }
 0x3d0   : > { %v2754_v53 = vadd.f32 %v4004_v26, %v2653_v42 }
 0x3d1   : > { %v2747_v52 = vpop.f32.mrf.mxu0 }
 0x3d2   : > { %v2839_v61 = vadd.f32 %v4023_v63, %v2754_v53  ;;  %v2748_v30 = vadd.f32 %v2747_v52, %v2645_v9 }
 0x3d4   : > { %v2833_v2 = vadd.f32 %v2832_v1, %v2748_v30  ;;  %2846 = vrot.lane.b32.xlu0 %v2839_v61, %s4276_s5 }
 0x3d6   : > { %2844 = vrot.lane.b32.xlu1 %v2833_v2, %s4276_s5 }
 0x3d8   : > { %3093 = vperm.xlu0 %4133, %v6749_v58  }
 0x3da   : > { %3089 = vperm.xlu1 %4132, %v5878_v29  }
 0x3dc   : > { %4135 = vset.pattern.permute.xlu0 %v4277_v46 }
 0x3dd   : > { %3129 = vperm.xlu0 %4135, %v5878_v29  }
 0x3de   : > { %4134 = vset.pattern.permute.xlu1 %v4278_v48 }
 0x3df   : > { %3109 = vperm.xlu1 %4134, %v5878_v29  }
 0x3e1   : > { %4138 = vset.pattern.permute.xlu0 %v4279_v6 }
 0x3e2   : > { %3153 = vperm.xlu0 %4138, %v6749_v58  }
 0x3e3   : > { %3113 = vperm.xlu1 %4134, %v6749_v58  }
 0x3e6   : > { %4140 = vset.pattern.permute.xlu0 %v4280_v34 }
 0x3e7   : > { %4136 = vset.pattern.permute.xlu1 %v4277_v46  ;;  %3169 = vperm.xlu0 %4140, %v5878_v29  }
 0x3e8   : > { %3133 = vperm.xlu1 %4136, %v6749_v58  }
 0x3ec   : > { %4137 = vset.pattern.permute.xlu1 %v4279_v6 }
 0x3ed   : > { %3149 = vperm.xlu1 %4137, %v5878_v29  }
 0x3f1   : > { %4139 = vset.pattern.permute.xlu1 %v4281_v56 }
 0x3f2   : > { %2857 = vperm.xlu1 %4139, %v5878_v29   ;;  %v2994_v29 = vpop.permute.xlu1 %2993 }
 0x3f6   : > { %2861 = vperm.xlu1 %4139, %v6749_v58   ;;  %v3014_v18 = vpop.permute.xlu1 %3013 }
 0x3fa   : > { %4141 = vset.pattern.permute.xlu1 %v4280_v34  ;;  %v6138_v5 = vpop.permute.xlu1 %3029 }
 0x3fb   : > { %3173 = vperm.xlu1 %4141, %v6749_v58  }
 0x3fe   : > { %v6140_v54 = vpop.permute.xlu1 %3049 }
 0x402   : > { %v3054_v39 = vpop.permute.xlu1 %3053 }
 0x406   : > { %v3074_v23 = vpop.permute.xlu1 %3073 }
 0x446   : > { %v2847_v22 = vpop.permute.xlu0 %2846 }
 0x447   : > { %v2852_v41 = vsel %vm2850_vm3, 0.0, %v2847_v22 }
 0x448   : > { %v6146_v31 = vsel %vm2853_vm4, %v2852_v41, 0.0  ;;  %v2845_v8 = vpop.permute.xlu1 %2844 }
 0x449   : > { %v2877_v62 = vmul.f32 %v2874_v32, %v6146_v31  ;;  %v2897_v49 = vmul.f32 %v2894_v20, %v6146_v31  ;;  %v2917_v50 = vmul.f32 %v2914_v17, %v6146_v31  ;;  %v2937_v40 = vmul.f32 %v2934_v27, %v6146_v31 }
 0x44a   : > { %v2957_v58 = vmul.f32 %v2954_v51, %v6146_v31  ;;  %v2977_v14 = vmul.f32 %v2974_v16, %v6146_v31  ;;  %v2997_v3 = vmul.f32 %v2994_v29, %v6146_v31  ;;  %v2851_v10 = vsel %vm2850_vm3, 0.0, %v2845_v8 }
 0x44b   : > { %2882 = vrot.lane.b32.xlu1 %v2877_v62, %s4259_s30  ;;  %v6165_v7 = vsel %vm2853_vm4, %v2851_v10, 0.0  ;;  %v3017_v4 = vmul.f32 %v3014_v18, %v6146_v31  ;;  %v3037_v45 = vmul.f32 %v3034_v15, %v6146_v31  ;;  %v3057_v37 = vmul.f32 %v3054_v39, %v6146_v31 }
 0x44c   : > { %v2876_v59 = vmul.f32 %v2870_v57, %v6165_v7  ;;  %v2896_v33 = vmul.f32 %v2890_v35, %v6165_v7  ;;  %v2916_v44 = vmul.f32 %v2910_v60, %v6165_v7  ;;  %v3077_v43 = vmul.f32 %v3074_v23, %v6146_v31 }
 0x44d   : > { %v2936_v55 = vmul.f32 %v2930_v12, %v6165_v7  ;;  %v2956_v63 = vmul.f32 %v2950_v36, %v6165_v7  ;;  %v2976_v9 = vmul.f32 %v6132_v28, %v6165_v7  ;;  %v2996_v30 = vmul.f32 %v6134_v19, %v6165_v7 }
 0x44e   : > { %v3016_v2 = vmul.f32 %v6136_v25, %v6165_v7  ;;  %v3036_v46 = vmul.f32 %v6138_v5, %v6165_v7  ;;  %v3056_v48 = vmul.f32 %v6140_v54, %v6165_v7  ;;  %v3076_v6 = vmul.f32 %v6142_v24, %v6165_v7 }
 0x44f   : > { %2902 = vrot.lane.b32.xlu1 %v2897_v49, %s4257_s27 }
 0x453   : > { %2922 = vrot.lane.b32.xlu1 %v2917_v50, %s4258_s28  ;;  %v3094_v13 = vpop.permute.xlu0 %3093 }
 0x454   : > { %v3097_v42 = vmul.f32 %v3094_v13, %v6146_v31 }
 0x455   : > { %v3090_v11 = vpop.permute.xlu1 %3089 }
 0x456   : > { %v3096_v34 = vmul.f32 %v3090_v11, %v6165_v7 }
 0x457   : > { %2942 = vrot.lane.b32.xlu1 %v2937_v40, %s4255_s22 }
 0x458   : > { %v3130_v53 = vpop.permute.xlu0 %3129 }
 0x459   : > { %v3136_v52 = vmul.f32 %v3130_v53, %v6165_v7 }
 0x45a   : > { %v3110_v0 = vpop.permute.xlu1 %3109 }
 0x45b   : > { %2962 = vrot.lane.b32.xlu1 %v2957_v58, %s4256_s26  ;;  %v3116_v56 = vmul.f32 %v3110_v0, %v6165_v7 }
 0x45d   : > { %v3154_v57 = vpop.permute.xlu0 %3153 }
 0x45e   : > { %v3114_v21 = vpop.permute.xlu1 %3113  ;;  %v3157_v32 = vmul.f32 %v3154_v57, %v6146_v31 }
 0x45f   : > { %2982 = vrot.lane.b32.xlu1 %v2977_v14, %s4253_s19  ;;  %v3117_v26 = vmul.f32 %v3114_v21, %v6146_v31 }
 0x462   : > { %v3170_v17 = vpop.permute.xlu0 %3169 }
 0x463   : > { %3002 = vrot.lane.b32.xlu1 %v2997_v3, %s4254_s20  ;;  %v3134_v38 = vpop.permute.xlu1 %3133 }
 0x464   : > { %v3137_v47 = vmul.f32 %v3134_v38, %v6146_v31 }
 0x466   : > { %3142 = vrot.lane.b32.xlu0 %v3137_v47, %s4248_s8 }
 0x467   : > { %3022 = vrot.lane.b32.xlu1 %v3017_v4, %s4251_s11 }
 0x468   : > { %v3150_v61 = vpop.permute.xlu1 %3149 }
 0x469   : > { %v3156_v1 = vmul.f32 %v3150_v61, %v6165_v7 }
 0x46a   : > { %2880 = vrot.lane.b32.xlu0 %v2876_v59, %s4259_s30  ;;  %s6751_s30 = smov 116  }
 0x46b   : > { %3042 = vrot.lane.b32.xlu1 %v3037_v45, %s4252_s17 }
 0x46d   : > { %v2858_v20 = vpop.permute.xlu1 %2857 }
 0x46e   : > { %2900 = vrot.lane.b32.xlu0 %v2896_v33, %s4257_s27  ;;  %s6752_s27 = smov 115   ;;  %v2864_v23 = vmul.f32 %v2858_v20, %v6165_v7 }
 0x46f   : > { %3062 = vrot.lane.b32.xlu1 %v3057_v37, %s4249_s23 }
 0x471   : > { %v2862_v60 = vpop.permute.xlu1 %2861 }
 0x472   : > { %2920 = vrot.lane.b32.xlu0 %v2916_v44, %s4258_s28  ;;  %v2865_v41 = vmul.f32 %v2862_v60, %v6146_v31  ;;  %s3383_s28 = sshll.u32 %s4406_s29, 1 }
 0x473   : > { %3082 = vrot.lane.b32.xlu1 %v3077_v43, %s6750_s9  ;;  %s185_s6 = scalar_lea.vmem [#allocation5], %s3383_s28 }
 0x474   : > { %s3306_s7 = sshll.u32 %s185_s6, 4  ;;  %s3307_s7 = int_to_ptr.vmem [resolvable:$true] %s3306_s7 }
 0x476   : > { %2940 = vrot.lane.b32.xlu0 %v2936_v55, %s4255_s22  ;;  %s6753_s22 = smov 113   ;;  %v6218_v12 = vpop.permute.xlu1 %3173 }
 0x477   : > { %3102 = vrot.lane.b32.xlu1 %v3097_v42, %s6751_s30 }
 0x47a   : > { %2960 = vrot.lane.b32.xlu0 %v2956_v63, %s4256_s26  ;;  %s6756_s26 = smov 112  }
 0x47b   : > { %3122 = vrot.lane.b32.xlu1 %v3117_v26, %s6752_s27 }
 0x47e   : > { %2980 = vrot.lane.b32.xlu0 %v2976_v9, %s4253_s19  ;;  %s6754_s19 = smov 80  }
 0x47f   : > { %3140 = vrot.lane.b32.xlu1 %v3136_v52, %s4248_s8  ;;  %s4282_s8 = smov 16  }
 0x482   : > { %3000 = vrot.lane.b32.xlu0 %v2996_v30, %s4254_s20  ;;  %s6755_s20 = smov 96  }
 0x483   : > { %3160 = vrot.lane.b32.xlu1 %v3156_v1, %s6753_s22 }
 0x486   : > { %3020 = vrot.lane.b32.xlu0 %v3016_v2, %s4251_s11  ;;  %s4284_s11 = smov 48  }
 0x48a   : > { %3040 = vrot.lane.b32.xlu0 %v3036_v46, %s4252_s17  ;;  %s4285_s17 = smov 64  }
 0x48e   : > { %3060 = vrot.lane.b32.xlu0 %v3056_v48, %s4249_s23  ;;  %s4283_s23 = smov 32  }
 0x492   : > { %3080 = vrot.lane.b32.xlu0 %v3076_v6, %s6750_s9  ;;  %s3304_s9 = scalar_lea.hbm %s6272_s3, %s3393_s4 }
 0x496   : > { %3100 = vrot.lane.b32.xlu0 %v3096_v34, %s6751_s30  ;;  %s3292_s30 = scalar_lea.sflag [#allocation4], %s4406_s29 }
 0x49a   : > { %3120 = vrot.lane.b32.xlu0 %v3116_v56, %s6752_s27  ;;  %s4178_s27 = scalar_lea.vmem %s3307_s7, 32 }
 0x49b   : > { %p4179_p11 = scmp.ne.s32.totalorder %s3307_s7, %s4178_s27 }
 0x49d   : > { %p4180_p13 = pnand %p4179_p11, %p6757_p12 }
 0x49e   : > { %3162 = vrot.lane.b32.xlu0 %v3157_v32, %s6753_s22  ;;  %s4287_s22 = smov [#allocation5]  }
 0x49f   : > { %p4181_p1 = pneg %p4180_p13 }
 0x4bd   : > { %v2883_v27 = vpop.permute.xlu1 %2882 }
 0x4be   : > { %v2887_v49 = vadd.f32 %v2883_v27, %v2865_v41 }
 0x4c1   : > { %v2903_v51 = vpop.permute.xlu1 %2902 }
 0x4c2   : > { %v2907_v50 = vadd.f32 %v2903_v51, %v2887_v49 }
 0x4c5   : > { %v2923_v35 = vpop.permute.xlu1 %2922 }
 0x4c6   : > { %v2927_v40 = vadd.f32 %v2923_v35, %v2907_v50 }
 0x4c9   : > { %v2943_v28 = vpop.permute.xlu1 %2942 }
 0x4ca   : > { %v2947_v21 = vadd.f32 %v2943_v28, %v2927_v40 }
 0x4cd   : > { %v2963_v19 = vpop.permute.xlu1 %2962 }
 0x4ce   : > { %v2967_v10 = vadd.f32 %v2963_v19, %v2947_v21 }
 0x4d1   : > { %v2983_v29 = vpop.permute.xlu1 %2982 }
 0x4d2   : > { %v2987_v4 = vadd.f32 %v2983_v29, %v2967_v10 }
 0x4d5   : > { %v3003_v18 = vpop.permute.xlu1 %3002 }
 0x4d6   : > { %v3007_v31 = vadd.f32 %v3003_v18, %v2987_v4 }
 0x4d8   : > { %v3143_v36 = vpop.permute.xlu0 %3142 }
 0x4d9   : > { %v3023_v15 = vpop.permute.xlu1 %3022 }
 0x4da   : > { %v3027_v7 = vadd.f32 %v3023_v15, %v3007_v31 }
 0x4dc   : > { %v2881_v16 = vpop.permute.xlu0 %2880 }
 0x4dd   : > { %v3043_v24 = vpop.permute.xlu1 %3042  ;;  %v2886_v11 = vadd.f32 %v2881_v16, %v2864_v23 }
 0x4de   : > { %v3047_v43 = vadd.f32 %v3043_v24, %v3027_v7 }
 0x4e0   : > { %v2901_v25 = vpop.permute.xlu0 %2900 }
 0x4e1   : > { %v3063_v62 = vpop.permute.xlu1 %3062  ;;  %v2906_v58 = vadd.f32 %v2901_v25, %v2886_v11 }
 0x4e2   : > { %v3067_v63 = vadd.f32 %v3063_v62, %v3047_v43 }
 0x4e4   : > { %v2921_v5 = vpop.permute.xlu0 %2920 }
 0x4e5   : > { %v3083_v0 = vpop.permute.xlu1 %3082  ;;  %v2926_v3 = vadd.f32 %v2921_v5, %v2906_v58 }
 0x4e6   : > { %v3087_v53 = vadd.f32 %v3083_v0, %v3067_v63 }
 0x4e8   : > { %v2941_v54 = vpop.permute.xlu0 %2940 }
 0x4e9   : > { %v2946_v38 = vadd.f32 %v2941_v54, %v2926_v3  ;;  %v3103_v45 = vpop.permute.xlu1 %3102 }
 0x4ea   : > { %v3107_v61 = vadd.f32 %v3103_v45, %v3087_v53  ;;  %v4286_v45 = vmov 1966171168  }
 0x4eb   : > { %v3272_v31 = vunpack.c.l.s4 %v4286_v45 }
 0x4ec   : > { %v2961_v39 = vpop.permute.xlu0 %2960 }
 0x4ed   : > { %v2966_v59 = vadd.f32 %v2961_v39, %v2946_v38  ;;  %v3123_v55 = vpop.permute.xlu1 %3122  ;;  %v3273_v63 = vunpack.c.0.s8 %v3272_v31 }
 0x4ee   : > { %v3127_v2 = vadd.f32 %v3123_v55, %v3107_v61 }
 0x4f0   : > { %v2981_v22 = vpop.permute.xlu0 %2980  ;;  %v3147_v56 = vadd.f32 %v3143_v36, %v3127_v2 }
 0x4f1   : > { %v2986_v33 = vadd.f32 %v2981_v22, %v2966_v59  ;;  %v3141_v1 = vpop.permute.xlu1 %3140 }
 0x4f4   : > { %v3001_v8 = vpop.permute.xlu0 %3000 }
 0x4f5   : > { %v3006_v44 = vadd.f32 %v3001_v8, %v2986_v33  ;;  %v3161_v57 = vpop.permute.xlu1 %3160  ;;  %v3274_v33 = vlaneseq }
 0x4f7   : > { %vm3288_vm13 = vcmp.lt.s32.totalorder %v3274_v33, 256 }
 0x4f8   : > { %v3021_v14 = vpop.permute.xlu0 %3020 }
 0x4f9   : > { %v3026_v13 = vadd.f32 %v3021_v14, %v3006_v44 }
 0x4fc   : > { %v3041_v47 = vpop.permute.xlu0 %3040 }
 0x4fd   : > { %v3046_v26 = vadd.f32 %v3041_v47, %v3026_v13 }
 0x500   : > { %v3061_v37 = vpop.permute.xlu0 %3060 }
 0x501   : > { %v3066_v9 = vadd.f32 %v3061_v37, %v3046_v26  ;;  %v3275_v26 = vshrl.u32 %v3274_v33, 7 }
 0x504   : > { %v3081_v42 = vpop.permute.xlu0 %3080 }
 0x505   : > { %v3086_v30 = vadd.f32 %v3081_v42, %v3066_v9 }
 0x508   : > { %v3101_v52 = vpop.permute.xlu0 %3100 }
 0x509   : > { %v3106_v46 = vadd.f32 %v3101_v52, %v3086_v30 }
 0x50c   : > { %v3121_v48 = vpop.permute.xlu0 %3120 }
 0x50d   : > { %v3126_v6 = vadd.f32 %v3121_v48, %v3106_v46 }
 0x50f   : > { %v3146_v34 = vadd.f32 %v3141_v1, %v3126_v6  ;;  %v3276_v6 = vsub.s32 %v3273_v63, %v3275_v26 }
 0x510   : > { %v3163_v32 = vpop.permute.xlu0 %3162 }
 0x511   : > { %v3166_v20 = vadd.f32 %v3161_v57, %v3146_v34  ;;  %v3167_v60 = vadd.f32 %v3163_v32, %v3147_v56 }
 0x513   : > { %v3176_v27 = vadd.f32 %v3170_v17, %v3166_v20  ;;  %v3177_v51 = vadd.f32 %v6218_v12, %v3167_v60 }
 0x515   : > { %v3180_v35 = vmin.f32 %v3176_v27, 0.0  ;;  %v3181_v28 = vmin.f32 %v3177_v51, 0.0  ;;  %vm3178_vm5 = vcmp.gt.f32.partialorder %v3176_v27, 0.0  ;;  %vm3179_vm6 = vcmp.gt.f32.partialorder %v3177_v51, 0.0 }
 0x517   : > { %v3182_v19 = vmul.f32 1.442695, %v3180_v35  ;;  %v3184_v29 = vmul.f32 1.442695, %v3181_v28 }
 0x519   : > { %4146 = vpow2.f32 %v3182_v19 }
 0x51a   : > { %4148 = vpow2.f32 %v3184_v29 }
 0x526   : > { %v4147_v16 = vpop.eup %4146 }
 0x527   : > { %v4149_v18 = vpop.eup %4148  ;;  %v3386_v25 = vadd.f32 -1.0, %v4147_v16 }
 0x528   : > { %v3387_v5 = vadd.f32 -1.0, %v4149_v18 }
 0x529   : > { %v3188_v15 = vsel %vm3178_vm5, %v3176_v27, %v3386_v25 }
 0x52a   : > { %v3189_v36 = vsel %vm3179_vm6, %v3177_v51, %v3387_v5  ;;  %v3191_v54 = vrot.slane %v3188_v15, 1  ;;  %v3195_v12 = vrot.slane %v3188_v15, 2  ;;  %v3199_v39 = vrot.slane %v3188_v15, 3 }
 0x52b   : > { %v3220_v24 = vrot.slane %v3189_v36, 1  ;;  %v3224_v17 = vrot.slane %v3189_v36, 2  ;;  %v3228_v22 = vrot.slane %v3189_v36, 3  ;;  %v3203_v41 = vrot.slane %v3188_v15, 4 }
 0x52c   : > { %3192 = vrot.lane.b32.xlu1 %v3191_v54, %s4282_s8  ;;  %v3232_v62 = vrot.slane %v3189_v36, 4  ;;  %v3207_v23 = vrot.slane %v3188_v15, 5  ;;  %v3236_v49 = vrot.slane %v3189_v36, 5  ;;  %v3211_v8 = vrot.slane %v3188_v15, 6 }
 0x52d   : > { %3221 = vrot.lane.b32.xlu0 %v3220_v24, %s4282_s8  ;;  %v3240_v50 = vrot.slane %v3189_v36, 6  ;;  %v3215_v11 = vrot.slane %v3188_v15, 7  ;;  %v3244_v40 = vrot.slane %v3189_v36, 7  ;;  %s4182_s8 = sshll.u32 %s4287_s22, 4  ;;  %s4183_s8 = int_to_ptr.vmem [resolvable:$false] %s4182_s8 }
 0x52e   : > { %s4184_s16 = scalar_lea.vmem %s4183_s8, 64  ;;  %p4185_p3 = scmp.lt.s32.totalorder %s3307_s7, %s4183_s8 }
 0x52f   : > { %p4186_p5 = scmp.lt.s32.totalorder %s4184_s16, %s4178_s27 }
 0x530   : > { %3196 = vrot.lane.b32.xlu1 %v3195_v12, %s4283_s23 }
 0x531   : > { %3225 = vrot.lane.b32.xlu0 %v3224_v17, %s4283_s23  ;;  %p4187_p8 = por %p4186_p5, %p4185_p3 }
 0x533   : > { %p4188_p10 = pnand %p4187_p8, %p4181_p1 }
 0x534   : > { %3200 = vrot.lane.b32.xlu1 %v3199_v39, %s4284_s11 }
 0x535   : > { %3229 = vrot.lane.b32.xlu0 %v3228_v22, %s4284_s11 }
 0x538   : > { %3204 = vrot.lane.b32.xlu1 %v3203_v41, %s4285_s17 }
 0x539   : > { %3233 = vrot.lane.b32.xlu0 %v3232_v62, %s4285_s17 }
 0x53c   : > { %3208 = vrot.lane.b32.xlu1 %v3207_v23, %s6754_s19 }
 0x53d   : > { %3237 = vrot.lane.b32.xlu0 %v3236_v49, %s6754_s19 }
 0x540   : > { %3212 = vrot.lane.b32.xlu1 %v3211_v8, %s6755_s20 }
 0x541   : > { %3241 = vrot.lane.b32.xlu0 %v3240_v50, %s6755_s20 }
 0x544   : > { %3216 = vrot.lane.b32.xlu1 %v3215_v11, %s6756_s26 }
 0x545   : > { %3245 = vrot.lane.b32.xlu0 %v3244_v40, %s6756_s26 }
 0x59e   : > { %v3193_v58 = vpop.permute.xlu1 %3192 }
 0x59f   : > { %v3222_v0 = vpop.permute.xlu0 %3221  ;;  %v3249_v37 = vsel %vm3248_vm7, %v3188_v15, %v3193_v58 }
 0x5a0   : > { %v3261_v7 = vsel %vm3248_vm7, %v3189_v36, %v3222_v0 }
 0x5a2   : > { %v3197_v14 = vpop.permute.xlu1 %3196 }
 0x5a3   : > { %v3226_v21 = vpop.permute.xlu0 %3225  ;;  %v3251_v44 = vsel %vm3250_vm8, %v3249_v37, %v3197_v14 }
 0x5a4   : > { %v3262_v13 = vsel %vm3250_vm8, %v3261_v7, %v3226_v21 }
 0x5a6   : > { %v3201_v3 = vpop.permute.xlu1 %3200 }
 0x5a7   : > { %v3230_v10 = vpop.permute.xlu0 %3229  ;;  %v3253_v55 = vsel %vm3252_vm9, %v3251_v44, %v3201_v3 }
 0x5a8   : > { %v3263_v53 = vsel %vm3252_vm9, %v3262_v13, %v3230_v10 }
 0x5aa   : > { %v3205_v38 = vpop.permute.xlu1 %3204 }
 0x5ab   : > { %v3234_v47 = vpop.permute.xlu0 %3233  ;;  %v3254_v9 = vsel %vm2255_vm0, %v3253_v55, %v3205_v38 }
 0x5ac   : > { %v3264_v52 = vsel %vm2255_vm0, %v3263_v53, %v3234_v47 }
 0x5ae   : > { %v3209_v4 = vpop.permute.xlu1 %3208 }
 0x5af   : > { %v3238_v59 = vpop.permute.xlu0 %3237  ;;  %v3256_v61 = vsel %vm3255_vm10, %v3254_v9, %v3209_v4 }
 0x5b0   : > { %v3265_v30 = vsel %vm3255_vm10, %v3264_v52, %v3238_v59 }
 0x5b2   : > { %v3213_v43 = vpop.permute.xlu1 %3212 }
 0x5b3   : > { %v3242_v42 = vpop.permute.xlu0 %3241  ;;  %v3258_v1 = vsel %vm3257_vm11, %v3256_v61, %v3213_v43 }
 0x5b4   : > { %v3266_v46 = vsel %vm3257_vm11, %v3265_v30, %v3242_v42 }
 0x5b6   : > { %v3217_v2 = vpop.permute.xlu1 %3216 }
 0x5b7   : > { %v3246_v48 = vpop.permute.xlu0 %3245  ;;  %v3260_v34 = vsel %vm3259_vm12, %v3258_v1, %v3217_v2 }
 0x5b8   : > { %v3267_v56 = vsel %vm3259_vm12, %v3266_v46, %v3246_v48 }
 0x5b9   : > { %v3270_v57 = vcombine.low %v3260_v34, %v3267_v56 }
 0x5bb   : > { %v3277_v32 = vrot.slane %v3270_v57, %v3276_v6 }
 0x5bd   : > { %v3284_v20 = vrot.slane %v3277_v32, %v3276_v6 }
 0x5bf   : > { %3290 = vst.msk [vmem:[%s185_s6] sm:$0x3] %vm3288_vm13, %v3284_v20 }
 0x5c0   : > { %4191 = shalt.err (!%p4188_p10)
}
 0x5c1   : > { %s4192_s23 = scalar_lea.hbm %s3304_s9, 32  ;;  %s4196_s17 = scalar_lea.hbm %s6272_s3, 64 }
 0x5c2   : > { %p4193_p2 = scmp.ne.s32.totalorder %s3304_s9, %s4192_s23  ;;  %p4197_p7 = scmp.lt.s32.totalorder %s3304_s9, %s6272_s3 }
 0x5c3   : > { %p4198_p0 = scmp.lt.s32.totalorder %s4196_s17, %s4192_s23 }
 0x5c4   : > { %p4194_p4 = pnand %p4193_p2, %p6757_p12 }
 0x5c5   : > { %p4199_p6 = por %p4198_p0, %p4197_p7 }
 0x5c6   : > { %p4195_p9 = pneg %p4194_p4 }
 0x5c8   : > { %p4200_p11 = pnand %p4199_p6, %p4195_p9 }
 0x5ca   : > { %4203 = shalt.err (!%p4200_p11)
}
 0x5cb   : > { %4026 = dma.vmem_to_hbm [thread:$0]  (%p6757_p12), %s3307_s7, 32, %s3304_s9, %s3292_s30  }
 0x5cc PF: > { %s3318_s26 = sand.u32 1, %s4230_s12   ;;  %p6758_p13 = scmp.ne.s32.totalorder %s6459_s25, 0 }
 0x5cd   : > { %p6759_p1 = scmp.ge.s32.totalorder %s4242_s15, 2  ;;  %s3319_s28 = scalar_lea.sflag [#allocation4], %s3318_s26 }
 0x5cf   : > { %p4033_p3 = pnand %p6759_p1, %p6758_p13 }
 0x5d1   : > { %p4034_p5 = pneg %p4033_p3 }
 0x5d3   : > { %4225 = dma.done.wait (%p4034_p5), %s3319_s28, 32  }
 0x5d4   : > { %4227 = vsyncadd (%p4034_p5), %s3319_s28, 4294967264  ;;  %p16_p8 = scmp.ge.s32.totalorder %s4333_s18, 4   ;;  %s6760_s12 = smov %s4234_s13 }
 0x5d5   : > { %s6761_s13 = smov %s4238_s14  ;;  %s6762_s14 = smov %s4345_s21 }
 0x5d6   : > { %s6763_s15 = smov %s4333_s18  ;;  %18 = sbr.rel (!%p16_p8) target bundleno = 5 (0x5), region = 77 }
 0x5db   :  { %3324 = vsyncpa [#allocation3], 1 }
 0x5dc   :  { %3326 = vsyncpa [#allocation3 + $0x1], 1 }
 0x5dd   :  { %3327 = vsyncpa [#allocation4], 1 }
 0x5de   :  { %3329 = vsyncpa [#allocation4 + $0x1], 1 }

</bundles_post_ra>
